<compile_context>
chip_gen: v7x
topology: tpu7x:2x2x1
jax: 0.10.0
libtpu: 0.0.40
codegen_flags: <defaults>
</compile_context>

<pallas_src>
import math

import jax
import jax.numpy as jnp
from jax.experimental import pallas as pl
from jax.experimental.pallas import tpu as pltpu

# ---- small, d_model-divisible-by-heads configuration ----
D_MODEL = 32
HEADS = 4
D_K = D_MODEL // HEADS
D_FF = 16
N_LAYERS = 2
EPS = 1e-6
SCALE = 1.0 / math.sqrt(D_K)


# ---------------------------------------------------------------------------
# In-kernel math helpers
# ---------------------------------------------------------------------------
def _layernorm(x, a, b):
    """Annotated-Transformer LayerNorm: a*(x-mean)/(std+eps)+b, unbiased std."""
    mean = jnp.mean(x, axis=-1, keepdims=True)
    centered = x - mean
    var = jnp.sum(centered * centered, axis=-1, keepdims=True) * (
        1.0 / (x.shape[-1] - 1))
    inv = pl.reciprocal(jnp.sqrt(var) + EPS, approx=True)
    return a * centered * inv + b


def _mha(q_in, kv_in, wq, wk, wv, wo, bq, bk, bv, bo, bias):
    """Head-batched multi-headed attention on flat (N, D) tiles.

    q_in: (Nq, D), kv_in: (Nk, D)
    wq/wk/wv: (H, D, dk)   bq/bk/bv: (H, 1, dk)
    wo: (H, dk, D)         bo: (1, D)
    bias: (Nq, Nk) additive mask bias (0 or -1e9), block-diagonal over batch.
    """
    nq, d = q_in.shape
    nk = kv_in.shape[0]

    qb = jnp.broadcast_to(q_in[None], (HEADS, nq, d))
    kb = jnp.broadcast_to(kv_in[None], (HEADS, nk, d))

    q = jnp.einsum('hnd,hde->hne', qb, wq,
                   preferred_element_type=jnp.float32) + bq
    k = jnp.einsum('hnd,hde->hne', kb, wk,
                   preferred_element_type=jnp.float32) + bk
    v = jnp.einsum('hnd,hde->hne', kb, wv,
                   preferred_element_type=jnp.float32) + bv

    s = jnp.einsum('hqe,hke->hqk', q, k,
                   preferred_element_type=jnp.float32) * SCALE + bias
    s = s - jnp.max(s, axis=-1, keepdims=True)
    p = jnp.exp(s)
    p = p * pl.reciprocal(jnp.sum(p, axis=-1, keepdims=True), approx=True)

    o = jnp.einsum('hqk,hke->hqe', p, v, preferred_element_type=jnp.float32)
    # Output projection: concat_h(o_h) @ Wo == sum_h o_h @ Wo_h
    proj = jnp.einsum('hqe,hed->hqd', o, wo, preferred_element_type=jnp.float32)
    out = proj[0]
    for h in range(1, HEADS):
        out = out + proj[h]
    return out + bo


# ---------------------------------------------------------------------------
# Fused decoder kernel (all layers + final norm in one call)
# ---------------------------------------------------------------------------
def decoder_kernel(x_ref, mem_ref, tb_ref, sb_ref,
                   wq_ref, wk_ref, wv_ref, wo_ref,
                   bq_ref, bk_ref, bv_ref, bo_ref,
                   w1_ref, b1_ref, w2_ref, b2_ref,
                   lna_ref, lnb_ref, fa_ref, fb_ref,
                   o_ref):
    x = x_ref[...]          # (B*S, D) residual stream, VMEM-resident throughout
    mem = mem_ref[...]      # (B*Sm, D)
    tgt_bias = tb_ref[...]  # (B*S, B*S)
    src_bias = sb_ref[...]  # (B*S, B*Sm)

    for l in range(N_LAYERS):   # static unroll over layers
        # Sublayer 0: x + self_attn(LN(x), LN(x), LN(x), tgt_mask)
        n = _layernorm(x, lna_ref[l, 0], lnb_ref[l, 0])
        x = x + _mha(n, n,
                     wq_ref[l, 0], wk_ref[l, 0], wv_ref[l, 0], wo_ref[l, 0],
                     bq_ref[l, 0], bk_ref[l, 0], bv_ref[l, 0], bo_ref[l, 0],
                     tgt_bias)

        # Sublayer 1: x + src_attn(LN(x), memory, memory, src_mask)
        n = _layernorm(x, lna_ref[l, 1], lnb_ref[l, 1])
        x = x + _mha(n, mem,
                     wq_ref[l, 1], wk_ref[l, 1], wv_ref[l, 1], wo_ref[l, 1],
                     bq_ref[l, 1], bk_ref[l, 1], bv_ref[l, 1], bo_ref[l, 1],
                     src_bias)

        # Sublayer 2: x + W2(relu(W1 LN(x) + b1)) + b2
        n = _layernorm(x, lna_ref[l, 2], lnb_ref[l, 2])
        h = jnp.maximum(
            jnp.dot(n, w1_ref[l], preferred_element_type=jnp.float32)
            + b1_ref[l], 0.0)
        x = x + jnp.dot(h, w2_ref[l],
                        preferred_element_type=jnp.float32) + b2_ref[l]

    # Final LayerNorm, single store.
    o_ref[...] = _layernorm(x, fa_ref[...], fb_ref[...])


# ---------------------------------------------------------------------------
# Wrapper: parameter packing, mask->bias hoist, single pallas_call
# ---------------------------------------------------------------------------
def _block_diag_bias(mask):
    """(B, Sq, Sk) 0/1 mask -> (B*Sq, B*Sk) additive bias.

    -1e9 on masked and cross-batch entries, 0 elsewhere (batch fold).
    """
    B, Sq, Sk = mask.shape
    bias = jnp.where(mask > 0.5, 0.0, -1e9).astype(jnp.float32)   # (B,Sq,Sk)
    same = jnp.eye(B, dtype=bool)[:, None, :, None]               # (B,1,B,1)
    full = jnp.where(same, bias[:, :, None, :], -1e9)             # (B,Sq,B,Sk)
    return full.reshape(B * Sq, B * Sk)


def _pack_params(layer_params, final_norm):
    """Stack per-layer params and pre-split attention weights per head."""
    L = len(layer_params)

    def stack(key):
        return jnp.stack([p[key] for p in layer_params])

    # (L, 2, 4, D, D) / (L, 2, 4, D): index 1 selects self(0)/src(1) attention.
    aw = jnp.stack([jnp.stack([p["self_w"], p["src_w"]]) for p in layer_params])
    ab = jnp.stack([jnp.stack([p["self_b"], p["src_b"]]) for p in layer_params])

    def split_qkv(w):   # (L,2,D,D) -> (L,2,H,D,dk), head h = output cols h*dk:(h+1)*dk
        return w.reshape(L, 2, D_MODEL, HEADS, D_K).transpose(0, 1, 3, 2, 4)

    return dict(
        wq=split_qkv(aw[:, :, 0]), wk=split_qkv(aw[:, :, 1]),
        wv=split_qkv(aw[:, :, 2]),
        wo=aw[:, :, 3].reshape(L, 2, HEADS, D_K, D_MODEL),
        bq=ab[:, :, 0].reshape(L, 2, HEADS, 1, D_K),
        bk=ab[:, :, 1].reshape(L, 2, HEADS, 1, D_K),
        bv=ab[:, :, 2].reshape(L, 2, HEADS, 1, D_K),
        bo=ab[:, :, 3].reshape(L, 2, 1, D_MODEL),
        ff_w1=stack("ff_w1"), ff_b1=stack("ff_b1"),
        ff_w2=stack("ff_w2"), ff_b2=stack("ff_b2"),
        ln_a=stack("ln_a").reshape(L, 3, 1, D_MODEL),
        ln_b=stack("ln_b").reshape(L, 3, 1, D_MODEL),
        fln_a=final_norm["a"].reshape(1, D_MODEL),
        fln_b=final_norm["b"].reshape(1, D_MODEL),
    )


def decoder_forward(x, memory, src_mask, tgt_mask, layer_params, final_norm):
    B, S, D = x.shape
    SM = memory.shape[1]
    N, NM = B * S, B * SM

    p = _pack_params(layer_params, final_norm)
    tb = _block_diag_bias(tgt_mask)   # (N, N)
    sb = _block_diag_bias(src_mask)   # (N, NM)

    x2 = x.reshape(N, D)
    m2 = memory.reshape(NM, D)

    def spec(shape):
        nd = len(shape)
        return pl.BlockSpec(shape, lambda i, nd=nd: (0,) * nd)

    operands = (x2, m2, tb, sb,
                p["wq"], p["wk"], p["wv"], p["wo"],
                p["bq"], p["bk"], p["bv"], p["bo"],
                p["ff_w1"], p["ff_b1"], p["ff_w2"], p["ff_b2"],
                p["ln_a"], p["ln_b"], p["fln_a"], p["fln_b"])

    out2 = pl.pallas_call(
        decoder_kernel,
        out_shape=jax.ShapeDtypeStruct((N, D), jnp.float32),
        grid=(1,),
        in_specs=[spec(op.shape) for op in operands],
        out_specs=spec((N, D)),
        compiler_params=pltpu.CompilerParams(dimension_semantics=("arbitrary",)),
    )(*operands)
    return out2.reshape(B, S, D)


# ---------------------------------------------------------------------------
# Pure-JAX reference mirroring the PyTorch module (independent of packing)
# ---------------------------------------------------------------------------
def ref_decoder(x, memory, src_mask, tgt_mask, layer_params, final_norm):
    D = x.shape[-1]

    def layernorm(t, a, b):
        mean = t.mean(-1, keepdims=True)
        std = jnp.std(t, axis=-1, ddof=1, keepdims=True)
        return a * (t - mean) / (std + EPS) + b

    def mha(q_in, k_in, v_in, w, bvec, mask):
        B_ = q_in.shape[0]

        def lin(t, wi, bi):
            return jnp.einsum('bsd,de->bse', t, wi) + bi

        q = lin(q_in, w[0], bvec[0]).reshape(B_, -1, HEADS, D_K).transpose(0, 2, 1, 3)
        k = lin(k_in, w[1], bvec[1]).reshape(B_, -1, HEADS, D_K).transpose(0, 2, 1, 3)
        v = lin(v_in, w[2], bvec[2]).reshape(B_, -1, HEADS, D_K).transpose(0, 2, 1, 3)
        scores = jnp.einsum('bhqd,bhkd->bhqk', q, k) / math.sqrt(D_K)
        scores = jnp.where(mask[:, None, :, :] == 0, -1e9, scores)
        attn = jax.nn.softmax(scores, axis=-1)
        o = jnp.einsum('bhqk,bhkd->bhqd', attn, v)
        o = o.transpose(0, 2, 1, 3).reshape(B_, -1, D)
        return jnp.einsum('bsd,de->bse', o, w[3]) + bvec[3]

    for p in layer_params:
        n = layernorm(x, p["ln_a"][0], p["ln_b"][0])
        x = x + mha(n, n, n, p["self_w"], p["self_b"], tgt_mask)
        n = layernorm(x, p["ln_a"][1], p["ln_b"][1])
        x = x + mha(n, memory, memory, p["src_w"], p["src_b"], src_mask)
        n = layernorm(x, p["ln_a"][2], p["ln_b"][2])
        h = jnp.maximum(jnp.einsum('bsd,df->bsf', n, p["ff_w1"]) + p["ff_b1"], 0.0)
        x = x + jnp.einsum('bsf,fd->bsd', h, p["ff_w2"]) + p["ff_b2"]
    return layernorm(x, final_norm["a"], final_norm["b"])


# ---------------------------------------------------------------------------
# Deterministic parameter init
# ---------------------------------------------------------------------------
def init_params(key):
    layers = []
    for i in range(N_LAYERS):
        ks = jax.random.split(jax.random.fold_in(key, i), 12)
        layers.append({
            "self_w": 0.1 * jax.random.normal(ks[0], (4, D_MODEL, D_MODEL), jnp.float32),
            "self_b": 0.1 * jax.random.normal(ks[1], (4, D_MODEL), jnp.float32),
            "src_w": 0.1 * jax.random.normal(ks[2], (4, D_MODEL, D_MODEL), jnp.float32),
            "src_b": 0.1 * jax.random.normal(ks[3], (4, D_MODEL), jnp.float32),
            "ff_w1": 0.1 * jax.random.normal(ks[4], (D_MODEL, D_FF), jnp.float32),
            "ff_b1": 0.1 * jax.random.normal(ks[5], (1, D_FF), jnp.float32),
            "ff_w2": 0.1 * jax.random.normal(ks[6], (D_FF, D_MODEL), jnp.float32),
            "ff_b2": 0.1 * jax.random.normal(ks[7], (1, D_MODEL), jnp.float32),
            "ln_a": 1.0 + 0.05 * jax.random.normal(ks[8], (3, D_MODEL), jnp.float32),
            "ln_b": 0.05 * jax.random.normal(ks[9], (3, D_MODEL), jnp.float32),
        })
    kf = jax.random.split(jax.random.fold_in(key, 1000), 2)
    final_norm = {
        "a": 1.0 + 0.05 * jax.random.normal(kf[0], (D_MODEL,), jnp.float32),
        "b": 0.05 * jax.random.normal(kf[1], (D_MODEL,), jnp.float32),
    }
    return layers, final_norm


if __name__ == "__main__":
    B, S, SM = 2, 4, 4  # batch, tgt sequence, memory sequence
    key = jax.random.PRNGKey(0)
    kx, km, kp = jax.random.split(key, 3)

    x = jax.random.normal(kx, (B, S, D_MODEL), jnp.float32)
    memory = jax.random.normal(km, (B, SM, D_MODEL), jnp.float32)
    # tgt mask: causal; src mask: all visible (0 == masked out, as masked_fill(mask==0, -1e9))
    tgt_mask = jnp.broadcast_to(jnp.tril(jnp.ones((S, S), jnp.float32)), (B, S, S))
    src_mask = jnp.ones((B, S, SM), jnp.float32)

    layer_params, final_norm = init_params(kp)

    out = jax.block_until_ready(
        decoder_forward(x, memory, src_mask, tgt_mask, layer_params, final_norm))
    ref = jax.block_until_ready(
        ref_decoder(x, memory, src_mask, tgt_mask, layer_params, final_norm))

    assert out.shape == (B, S, D_MODEL)
    # Tolerance loosened slightly because the kernel uses the EUP approximate
    # reciprocal for softmax denominators and LayerNorm 1/(std+eps).
    err = float(jnp.max(jnp.abs(out - ref)))
    assert bool(jnp.allclose(out, ref, atol=2e-2, rtol=2e-2)), err
    print("KERNEL_OK")
</pallas_src>

<mosaic_0001>
module attributes {stable_mosaic.version = 11 : i64} {
  func.func @decoder_kernel(%arg0: i32, %arg1: memref<8x32xf32, #tpu.memory_space<vmem>>, %arg2: memref<8x32xf32, #tpu.memory_space<vmem>>, %arg3: memref<8x8xf32, #tpu.memory_space<vmem>>, %arg4: memref<8x8xf32, #tpu.memory_space<vmem>>, %arg5: memref<2x2x4x32x8xf32, #tpu.memory_space<vmem>>, %arg6: memref<2x2x4x32x8xf32, #tpu.memory_space<vmem>>, %arg7: memref<2x2x4x32x8xf32, #tpu.memory_space<vmem>>, %arg8: memref<2x2x4x8x32xf32, #tpu.memory_space<vmem>>, %arg9: memref<2x2x4x1x8xf32, #tpu.memory_space<vmem>>, %arg10: memref<2x2x4x1x8xf32, #tpu.memory_space<vmem>>, %arg11: memref<2x2x4x1x8xf32, #tpu.memory_space<vmem>>, %arg12: memref<2x2x1x32xf32, #tpu.memory_space<vmem>>, %arg13: memref<2x32x16xf32, #tpu.memory_space<vmem>>, %arg14: memref<2x1x16xf32, #tpu.memory_space<vmem>>, %arg15: memref<2x16x32xf32, #tpu.memory_space<vmem>>, %arg16: memref<2x1x32xf32, #tpu.memory_space<vmem>>, %arg17: memref<2x3x1x32xf32, #tpu.memory_space<vmem>>, %arg18: memref<2x3x1x32xf32, #tpu.memory_space<vmem>>, %arg19: memref<1x32xf32, #tpu.memory_space<vmem>>, %arg20: memref<1x32xf32, #tpu.memory_space<vmem>>, %arg21: memref<8x32xf32, #tpu.memory_space<vmem>>) attributes {dimension_semantics = [#tpu.dimension_semantics<arbitrary>], iteration_bounds = array<i64: 1>, scalar_prefetch = 0 : i64, scratch_operands = 0 : i64, tpu.core_type = #tpu.core_type<tc>, window_params = [{pipeline_mode = #tpu.pipeline_mode<synchronous>, transform_indices = @transform_0, window_bounds = array<i64: 8, 32>}, {pipeline_mode = #tpu.pipeline_mode<synchronous>, transform_indices = @transform_1, window_bounds = array<i64: 8, 32>}, {pipeline_mode = #tpu.pipeline_mode<synchronous>, transform_indices = @transform_2, window_bounds = array<i64: 8, 8>}, {pipeline_mode = #tpu.pipeline_mode<synchronous>, transform_indices = @transform_3, window_bounds = array<i64: 8, 8>}, {pipeline_mode = #tpu.pipeline_mode<synchronous>, transform_indices = @transform_4, window_bounds = array<i64: 2, 2, 4, 32, 8>}, {pipeline_mode = #tpu.pipeline_mode<synchronous>, transform_indices = @transform_5, window_bounds = array<i64: 2, 2, 4, 32, 8>}, {pipeline_mode = #tpu.pipeline_mode<synchronous>, transform_indices = @transform_6, window_bounds = array<i64: 2, 2, 4, 32, 8>}, {pipeline_mode = #tpu.pipeline_mode<synchronous>, transform_indices = @transform_7, window_bounds = array<i64: 2, 2, 4, 8, 32>}, {pipeline_mode = #tpu.pipeline_mode<synchronous>, transform_indices = @transform_8, window_bounds = array<i64: 2, 2, 4, 1, 8>}, {pipeline_mode = #tpu.pipeline_mode<synchronous>, transform_indices = @transform_9, window_bounds = array<i64: 2, 2, 4, 1, 8>}, {pipeline_mode = #tpu.pipeline_mode<synchronous>, transform_indices = @transform_10, window_bounds = array<i64: 2, 2, 4, 1, 8>}, {pipeline_mode = #tpu.pipeline_mode<synchronous>, transform_indices = @transform_11, window_bounds = array<i64: 2, 2, 1, 32>}, {pipeline_mode = #tpu.pipeline_mode<synchronous>, transform_indices = @transform_12, window_bounds = array<i64: 2, 32, 16>}, {pipeline_mode = #tpu.pipeline_mode<synchronous>, transform_indices = @transform_13, window_bounds = array<i64: 2, 1, 16>}, {pipeline_mode = #tpu.pipeline_mode<synchronous>, transform_indices = @transform_14, window_bounds = array<i64: 2, 16, 32>}, {pipeline_mode = #tpu.pipeline_mode<synchronous>, transform_indices = @transform_15, window_bounds = array<i64: 2, 1, 32>}, {pipeline_mode = #tpu.pipeline_mode<synchronous>, transform_indices = @transform_16, window_bounds = array<i64: 2, 3, 1, 32>}, {pipeline_mode = #tpu.pipeline_mode<synchronous>, transform_indices = @transform_17, window_bounds = array<i64: 2, 3, 1, 32>}, {pipeline_mode = #tpu.pipeline_mode<synchronous>, transform_indices = @transform_18, window_bounds = array<i64: 1, 32>}, {pipeline_mode = #tpu.pipeline_mode<synchronous>, transform_indices = @transform_19, window_bounds = array<i64: 1, 32>}, {pipeline_mode = #tpu.pipeline_mode<synchronous>, transform_indices = @transform_20, window_bounds = array<i64: 8, 32>}]} {
    %c0 = arith.constant 0 : index
    %c0_0 = arith.constant 0 : index
    %0 = vector.load %arg1[%c0, %c0_0] : memref<8x32xf32, #tpu.memory_space<vmem>>, vector<8x32xf32>
    %c0_1 = arith.constant 0 : index
    %c0_2 = arith.constant 0 : index
    %1 = vector.load %arg2[%c0_1, %c0_2] : memref<8x32xf32, #tpu.memory_space<vmem>>, vector<8x32xf32>
    %c0_3 = arith.constant 0 : index
    %c0_4 = arith.constant 0 : index
    %2 = vector.load %arg3[%c0_3, %c0_4] : memref<8x8xf32, #tpu.memory_space<vmem>>, vector<8x8xf32>
    %c0_5 = arith.constant 0 : index
    %c0_6 = arith.constant 0 : index
    %3 = vector.load %arg4[%c0_5, %c0_6] : memref<8x8xf32, #tpu.memory_space<vmem>>, vector<8x8xf32>
    %c0_7 = arith.constant 0 : index
    %c0_8 = arith.constant 0 : index
    %c0_9 = arith.constant 0 : index
    %c0_10 = arith.constant 0 : index
    %4 = vector.load %arg17[%c0_7, %c0_8, %c0_9, %c0_10] : memref<2x3x1x32xf32, #tpu.memory_space<vmem>>, vector<1x1x1x32xf32>
    %5 = vector.shape_cast %4 : vector<1x1x1x32xf32> to vector<1x32xf32>
    %c0_11 = arith.constant 0 : index
    %c0_12 = arith.constant 0 : index
    %c0_13 = arith.constant 0 : index
    %c0_14 = arith.constant 0 : index
    %6 = vector.load %arg18[%c0_11, %c0_12, %c0_13, %c0_14] : memref<2x3x1x32xf32, #tpu.memory_space<vmem>>, vector<1x1x1x32xf32>
    %7 = vector.shape_cast %6 : vector<1x1x1x32xf32> to vector<1x32xf32>
    %cst = arith.constant dense<0.000000e+00> : vector<8xf32>
    %8 = vector.multi_reduction <add>, %0, %cst [1] : vector<8x32xf32> to vector<8xf32>
    %9 = vector.shape_cast %8 : vector<8xf32> to vector<8x1xf32>
    %cst_15 = arith.constant 3.200000e+01 : f32
    %10 = vector.broadcast %cst_15 : f32 to vector<8x1xf32>
    %11 = arith.divf %9, %10 : vector<8x1xf32>
    %12 = vector.broadcast %11 : vector<8x1xf32> to vector<8x32xf32>
    %13 = arith.subf %0, %12 : vector<8x32xf32>
    %14 = arith.mulf %13, %13 : vector<8x32xf32>
    %cst_16 = arith.constant dense<0.000000e+00> : vector<8xf32>
    %15 = vector.multi_reduction <add>, %14, %cst_16 [1] : vector<8x32xf32> to vector<8xf32>
    %16 = vector.shape_cast %15 : vector<8xf32> to vector<8x1xf32>
    %cst_17 = arith.constant 0.0322580636 : f32
    %17 = vector.broadcast %cst_17 : f32 to vector<8x1xf32>
    %18 = arith.mulf %16, %17 : vector<8x1xf32>
    %19 = math.sqrt %18 : vector<8x1xf32>
    %cst_18 = arith.constant 9.99999997E-7 : f32
    %20 = vector.broadcast %cst_18 : f32 to vector<8x1xf32>
    %21 = arith.addf %19, %20 : vector<8x1xf32>
    %22 = tpu.reciprocal %21 {approx = true} : vector<8x1xf32> -> vector<8x1xf32>
    %23 = vector.broadcast %5 : vector<1x32xf32> to vector<8x32xf32>
    %24 = arith.mulf %23, %13 : vector<8x32xf32>
    %25 = vector.broadcast %22 : vector<8x1xf32> to vector<8x32xf32>
    %26 = arith.mulf %24, %25 : vector<8x32xf32>
    %27 = vector.broadcast %7 : vector<1x32xf32> to vector<8x32xf32>
    %28 = arith.addf %26, %27 : vector<8x32xf32>
    %c0_19 = arith.constant 0 : index
    %c0_20 = arith.constant 0 : index
    %c0_21 = arith.constant 0 : index
    %c0_22 = arith.constant 0 : index
    %c0_23 = arith.constant 0 : index
    %29 = vector.load %arg5[%c0_19, %c0_20, %c0_21, %c0_22, %c0_23] : memref<2x2x4x32x8xf32, #tpu.memory_space<vmem>>, vector<1x1x4x32x8xf32>
    %30 = vector.shape_cast %29 : vector<1x1x4x32x8xf32> to vector<4x32x8xf32>
    %c0_24 = arith.constant 0 : index
    %c0_25 = arith.constant 0 : index
    %c0_26 = arith.constant 0 : index
    %c0_27 = arith.constant 0 : index
    %c0_28 = arith.constant 0 : index
    %31 = vector.load %arg6[%c0_24, %c0_25, %c0_26, %c0_27, %c0_28] : memref<2x2x4x32x8xf32, #tpu.memory_space<vmem>>, vector<1x1x4x32x8xf32>
    %32 = vector.shape_cast %31 : vector<1x1x4x32x8xf32> to vector<4x32x8xf32>
    %c0_29 = arith.constant 0 : index
    %c0_30 = arith.constant 0 : index
    %c0_31 = arith.constant 0 : index
    %c0_32 = arith.constant 0 : index
    %c0_33 = arith.constant 0 : index
    %33 = vector.load %arg7[%c0_29, %c0_30, %c0_31, %c0_32, %c0_33] : memref<2x2x4x32x8xf32, #tpu.memory_space<vmem>>, vector<1x1x4x32x8xf32>
    %34 = vector.shape_cast %33 : vector<1x1x4x32x8xf32> to vector<4x32x8xf32>
    %c0_34 = arith.constant 0 : index
    %c0_35 = arith.constant 0 : index
    %c0_36 = arith.constant 0 : index
    %c0_37 = arith.constant 0 : index
    %c0_38 = arith.constant 0 : index
    %35 = vector.load %arg8[%c0_34, %c0_35, %c0_36, %c0_37, %c0_38] : memref<2x2x4x8x32xf32, #tpu.memory_space<vmem>>, vector<1x1x4x8x32xf32>
    %36 = vector.shape_cast %35 : vector<1x1x4x8x32xf32> to vector<4x8x32xf32>
    %c0_39 = arith.constant 0 : index
    %c0_40 = arith.constant 0 : index
    %c0_41 = arith.constant 0 : index
    %c0_42 = arith.constant 0 : index
    %c0_43 = arith.constant 0 : index
    %37 = vector.load %arg9[%c0_39, %c0_40, %c0_41, %c0_42, %c0_43] : memref<2x2x4x1x8xf32, #tpu.memory_space<vmem>>, vector<1x1x4x1x8xf32>
    %38 = vector.shape_cast %37 : vector<1x1x4x1x8xf32> to vector<4x1x8xf32>
    %c0_44 = arith.constant 0 : index
    %c0_45 = arith.constant 0 : index
    %c0_46 = arith.constant 0 : index
    %c0_47 = arith.constant 0 : index
    %c0_48 = arith.constant 0 : index
    %39 = vector.load %arg10[%c0_44, %c0_45, %c0_46, %c0_47, %c0_48] : memref<2x2x4x1x8xf32, #tpu.memory_space<vmem>>, vector<1x1x4x1x8xf32>
    %40 = vector.shape_cast %39 : vector<1x1x4x1x8xf32> to vector<4x1x8xf32>
    %c0_49 = arith.constant 0 : index
    %c0_50 = arith.constant 0 : index
    %c0_51 = arith.constant 0 : index
    %c0_52 = arith.constant 0 : index
    %c0_53 = arith.constant 0 : index
    %41 = vector.load %arg11[%c0_49, %c0_50, %c0_51, %c0_52, %c0_53] : memref<2x2x4x1x8xf32, #tpu.memory_space<vmem>>, vector<1x1x4x1x8xf32>
    %42 = vector.shape_cast %41 : vector<1x1x4x1x8xf32> to vector<4x1x8xf32>
    %c0_54 = arith.constant 0 : index
    %c0_55 = arith.constant 0 : index
    %c0_56 = arith.constant 0 : index
    %c0_57 = arith.constant 0 : index
    %43 = vector.load %arg12[%c0_54, %c0_55, %c0_56, %c0_57] : memref<2x2x1x32xf32, #tpu.memory_space<vmem>>, vector<1x1x1x32xf32>
    %44 = vector.shape_cast %43 : vector<1x1x1x32xf32> to vector<1x32xf32>
    %45 = vector.shape_cast %28 : vector<8x32xf32> to vector<1x8x32xf32>
    %46 = vector.shape_cast %45 : vector<1x8x32xf32> to vector<1x8x32xf32>
    %47 = vector.broadcast %46 : vector<1x8x32xf32> to vector<4x8x32xf32>
    %48 = vector.shape_cast %28 : vector<8x32xf32> to vector<1x8x32xf32>
    %49 = vector.shape_cast %48 : vector<1x8x32xf32> to vector<1x8x32xf32>
    %50 = vector.broadcast %49 : vector<1x8x32xf32> to vector<4x8x32xf32>
    "tpu.trace_start"() <{level = 10 : i32, message = "hnd,hde->hne"}> : () -> ()
    %cst_58 = arith.constant dense<0.000000e+00> : vector<4x8x8xf32>
    %51 = tpu.matmul %47, %30, %cst_58 {dimension_numbers = #tpu.dot_dimension_numbers<[2], [1], [1], [2], [0, 0, 0, 1, 1, 2], [0], [0]>} : vector<4x8x32xf32>, vector<4x32x8xf32>, vector<4x8x8xf32> -> vector<4x8x8xf32>
    "tpu.trace_stop"() : () -> ()
    %52 = vector.broadcast %38 : vector<4x1x8xf32> to vector<4x8x8xf32>
    %53 = arith.addf %51, %52 : vector<4x8x8xf32>
    "tpu.trace_start"() <{level = 10 : i32, message = "hnd,hde->hne"}> : () -> ()
    %cst_59 = arith.constant dense<0.000000e+00> : vector<4x8x8xf32>
    %54 = tpu.matmul %50, %32, %cst_59 {dimension_numbers = #tpu.dot_dimension_numbers<[2], [1], [1], [2], [0, 0, 0, 1, 1, 2], [0], [0]>} : vector<4x8x32xf32>, vector<4x32x8xf32>, vector<4x8x8xf32> -> vector<4x8x8xf32>
    "tpu.trace_stop"() : () -> ()
    %55 = vector.broadcast %40 : vector<4x1x8xf32> to vector<4x8x8xf32>
    %56 = arith.addf %54, %55 : vector<4x8x8xf32>
    "tpu.trace_start"() <{level = 10 : i32, message = "hnd,hde->hne"}> : () -> ()
    %cst_60 = arith.constant dense<0.000000e+00> : vector<4x8x8xf32>
    %57 = tpu.matmul %50, %34, %cst_60 {dimension_numbers = #tpu.dot_dimension_numbers<[2], [1], [1], [2], [0, 0, 0, 1, 1, 2], [0], [0]>} : vector<4x8x32xf32>, vector<4x32x8xf32>, vector<4x8x8xf32> -> vector<4x8x8xf32>
    "tpu.trace_stop"() : () -> ()
    %58 = vector.broadcast %42 : vector<4x1x8xf32> to vector<4x8x8xf32>
    %59 = arith.addf %57, %58 : vector<4x8x8xf32>
    "tpu.trace_start"() <{level = 10 : i32, message = "hqe,hke->hqk"}> : () -> ()
    %cst_61 = arith.constant dense<0.000000e+00> : vector<4x8x8xf32>
    %60 = tpu.matmul %53, %56, %cst_61 {dimension_numbers = #tpu.dot_dimension_numbers<[2], [2], [1], [1], [0, 0, 0, 1, 1, 1], [0], [0]>} : vector<4x8x8xf32>, vector<4x8x8xf32>, vector<4x8x8xf32> -> vector<4x8x8xf32>
    "tpu.trace_stop"() : () -> ()
    %cst_62 = arith.constant 0.353553385 : f32
    %61 = vector.broadcast %cst_62 : f32 to vector<4x8x8xf32>
    %62 = arith.mulf %60, %61 : vector<4x8x8xf32>
    %63 = vector.shape_cast %2 : vector<8x8xf32> to vector<1x8x8xf32>
    %64 = vector.broadcast %63 : vector<1x8x8xf32> to vector<4x8x8xf32>
    %65 = arith.addf %62, %64 : vector<4x8x8xf32>
    %cst_63 = arith.constant dense<0xFF800000> : vector<4x8xf32>
    %66 = vector.multi_reduction <maximumf>, %65, %cst_63 [2] : vector<4x8x8xf32> to vector<4x8xf32>
    %67 = vector.shape_cast %66 : vector<4x8xf32> to vector<4x8x1xf32>
    %68 = vector.broadcast %67 : vector<4x8x1xf32> to vector<4x8x8xf32>
    %69 = arith.subf %65, %68 : vector<4x8x8xf32>
    %70 = math.exp %69 : vector<4x8x8xf32>
    %cst_64 = arith.constant dense<0.000000e+00> : vector<4x8xf32>
    %71 = vector.multi_reduction <add>, %70, %cst_64 [2] : vector<4x8x8xf32> to vector<4x8xf32>
    %72 = vector.shape_cast %71 : vector<4x8xf32> to vector<4x8x1xf32>
    %73 = tpu.reciprocal %72 {approx = true} : vector<4x8x1xf32> -> vector<4x8x1xf32>
    %74 = vector.broadcast %73 : vector<4x8x1xf32> to vector<4x8x8xf32>
    %75 = arith.mulf %70, %74 : vector<4x8x8xf32>
    "tpu.trace_start"() <{level = 10 : i32, message = "hqk,hke->hqe"}> : () -> ()
    %cst_65 = arith.constant dense<0.000000e+00> : vector<4x8x8xf32>
    %76 = tpu.matmul %75, %59, %cst_65 {dimension_numbers = #tpu.dot_dimension_numbers<[2], [1], [1], [2], [0, 0, 0, 1, 1, 2], [0], [0]>} : vector<4x8x8xf32>, vector<4x8x8xf32>, vector<4x8x8xf32> -> vector<4x8x8xf32>
    "tpu.trace_stop"() : () -> ()
    "tpu.trace_start"() <{level = 10 : i32, message = "hqe,hed->hqd"}> : () -> ()
    %cst_66 = arith.constant dense<0.000000e+00> : vector<4x8x32xf32>
    %77 = tpu.matmul %76, %36, %cst_66 {dimension_numbers = #tpu.dot_dimension_numbers<[2], [1], [1], [2], [0, 0, 0, 1, 1, 2], [0], [0]>} : vector<4x8x8xf32>, vector<4x8x32xf32>, vector<4x8x32xf32> -> vector<4x8x32xf32>
    "tpu.trace_stop"() : () -> ()
    %78 = vector.extract_strided_slice %77 {offsets = [0, 0, 0], sizes = [1, 8, 32], strides = [1, 1, 1]} : vector<4x8x32xf32> to vector<1x8x32xf32>
    %79 = vector.shape_cast %78 : vector<1x8x32xf32> to vector<8x32xf32>
    %80 = vector.extract_strided_slice %77 {offsets = [1, 0, 0], sizes = [1, 8, 32], strides = [1, 1, 1]} : vector<4x8x32xf32> to vector<1x8x32xf32>
    %81 = vector.shape_cast %80 : vector<1x8x32xf32> to vector<8x32xf32>
    %82 = arith.addf %79, %81 : vector<8x32xf32>
    %83 = vector.extract_strided_slice %77 {offsets = [2, 0, 0], sizes = [1, 8, 32], strides = [1, 1, 1]} : vector<4x8x32xf32> to vector<1x8x32xf32>
    %84 = vector.shape_cast %83 : vector<1x8x32xf32> to vector<8x32xf32>
    %85 = arith.addf %82, %84 : vector<8x32xf32>
    %86 = vector.extract_strided_slice %77 {offsets = [3, 0, 0], sizes = [1, 8, 32], strides = [1, 1, 1]} : vector<4x8x32xf32> to vector<1x8x32xf32>
    %87 = vector.shape_cast %86 : vector<1x8x32xf32> to vector<8x32xf32>
    %88 = arith.addf %85, %87 : vector<8x32xf32>
    %89 = vector.broadcast %44 : vector<1x32xf32> to vector<8x32xf32>
    %90 = arith.addf %88, %89 : vector<8x32xf32>
    %91 = arith.addf %0, %90 : vector<8x32xf32>
    %c0_67 = arith.constant 0 : index
    %c1 = arith.constant 1 : index
    %c0_68 = arith.constant 0 : index
    %c0_69 = arith.constant 0 : index
    %92 = vector.load %arg17[%c0_67, %c1, %c0_68, %c0_69] : memref<2x3x1x32xf32, #tpu.memory_space<vmem>>, vector<1x1x1x32xf32>
    %93 = vector.shape_cast %92 : vector<1x1x1x32xf32> to vector<1x32xf32>
    %c0_70 = arith.constant 0 : index
    %c1_71 = arith.constant 1 : index
    %c0_72 = arith.constant 0 : index
    %c0_73 = arith.constant 0 : index
    %94 = vector.load %arg18[%c0_70, %c1_71, %c0_72, %c0_73] : memref<2x3x1x32xf32, #tpu.memory_space<vmem>>, vector<1x1x1x32xf32>
    %95 = vector.shape_cast %94 : vector<1x1x1x32xf32> to vector<1x32xf32>
    %cst_74 = arith.constant dense<0.000000e+00> : vector<8xf32>
    %96 = vector.multi_reduction <add>, %91, %cst_74 [1] : vector<8x32xf32> to vector<8xf32>
    %97 = vector.shape_cast %96 : vector<8xf32> to vector<8x1xf32>
    %cst_75 = arith.constant 3.200000e+01 : f32
    %98 = vector.broadcast %cst_75 : f32 to vector<8x1xf32>
    %99 = arith.divf %97, %98 : vector<8x1xf32>
    %100 = vector.broadcast %99 : vector<8x1xf32> to vector<8x32xf32>
    %101 = arith.subf %91, %100 : vector<8x32xf32>
    %102 = arith.mulf %101, %101 : vector<8x32xf32>
    %cst_76 = arith.constant dense<0.000000e+00> : vector<8xf32>
    %103 = vector.multi_reduction <add>, %102, %cst_76 [1] : vector<8x32xf32> to vector<8xf32>
    %104 = vector.shape_cast %103 : vector<8xf32> to vector<8x1xf32>
    %cst_77 = arith.constant 0.0322580636 : f32
    %105 = vector.broadcast %cst_77 : f32 to vector<8x1xf32>
    %106 = arith.mulf %104, %105 : vector<8x1xf32>
    %107 = math.sqrt %106 : vector<8x1xf32>
    %cst_78 = arith.constant 9.99999997E-7 : f32
    %108 = vector.broadcast %cst_78 : f32 to vector<8x1xf32>
    %109 = arith.addf %107, %108 : vector<8x1xf32>
    %110 = tpu.reciprocal %109 {approx = true} : vector<8x1xf32> -> vector<8x1xf32>
    %111 = vector.broadcast %93 : vector<1x32xf32> to vector<8x32xf32>
    %112 = arith.mulf %111, %101 : vector<8x32xf32>
    %113 = vector.broadcast %110 : vector<8x1xf32> to vector<8x32xf32>
    %114 = arith.mulf %112, %113 : vector<8x32xf32>
    %115 = vector.broadcast %95 : vector<1x32xf32> to vector<8x32xf32>
    %116 = arith.addf %114, %115 : vector<8x32xf32>
    %c0_79 = arith.constant 0 : index
    %c1_80 = arith.constant 1 : index
    %c0_81 = arith.constant 0 : index
    %c0_82 = arith.constant 0 : index
    %c0_83 = arith.constant 0 : index
    %117 = vector.load %arg5[%c0_79, %c1_80, %c0_81, %c0_82, %c0_83] : memref<2x2x4x32x8xf32, #tpu.memory_space<vmem>>, vector<1x1x4x32x8xf32>
    %118 = vector.shape_cast %117 : vector<1x1x4x32x8xf32> to vector<4x32x8xf32>
    %c0_84 = arith.constant 0 : index
    %c1_85 = arith.constant 1 : index
    %c0_86 = arith.constant 0 : index
    %c0_87 = arith.constant 0 : index
    %c0_88 = arith.constant 0 : index
    %119 = vector.load %arg6[%c0_84, %c1_85, %c0_86, %c0_87, %c0_88] : memref<2x2x4x32x8xf32, #tpu.memory_space<vmem>>, vector<1x1x4x32x8xf32>
    %120 = vector.shape_cast %119 : vector<1x1x4x32x8xf32> to vector<4x32x8xf32>
    %c0_89 = arith.constant 0 : index
    %c1_90 = arith.constant 1 : index
    %c0_91 = arith.constant 0 : index
    %c0_92 = arith.constant 0 : index
    %c0_93 = arith.constant 0 : index
    %121 = vector.load %arg7[%c0_89, %c1_90, %c0_91, %c0_92, %c0_93] : memref<2x2x4x32x8xf32, #tpu.memory_space<vmem>>, vector<1x1x4x32x8xf32>
    %122 = vector.shape_cast %121 : vector<1x1x4x32x8xf32> to vector<4x32x8xf32>
    %c0_94 = arith.constant 0 : index
    %c1_95 = arith.constant 1 : index
    %c0_96 = arith.constant 0 : index
    %c0_97 = arith.constant 0 : index
    %c0_98 = arith.constant 0 : index
    %123 = vector.load %arg8[%c0_94, %c1_95, %c0_96, %c0_97, %c0_98] : memref<2x2x4x8x32xf32, #tpu.memory_space<vmem>>, vector<1x1x4x8x32xf32>
    %124 = vector.shape_cast %123 : vector<1x1x4x8x32xf32> to vector<4x8x32xf32>
    %c0_99 = arith.constant 0 : index
    %c1_100 = arith.constant 1 : index
    %c0_101 = arith.constant 0 : index
    %c0_102 = arith.constant 0 : index
    %c0_103 = arith.constant 0 : index
    %125 = vector.load %arg9[%c0_99, %c1_100, %c0_101, %c0_102, %c0_103] : memref<2x2x4x1x8xf32, #tpu.memory_space<vmem>>, vector<1x1x4x1x8xf32>
    %126 = vector.shape_cast %125 : vector<1x1x4x1x8xf32> to vector<4x1x8xf32>
    %c0_104 = arith.constant 0 : index
    %c1_105 = arith.constant 1 : index
    %c0_106 = arith.constant 0 : index
    %c0_107 = arith.constant 0 : index
    %c0_108 = arith.constant 0 : index
    %127 = vector.load %arg10[%c0_104, %c1_105, %c0_106, %c0_107, %c0_108] : memref<2x2x4x1x8xf32, #tpu.memory_space<vmem>>, vector<1x1x4x1x8xf32>
    %128 = vector.shape_cast %127 : vector<1x1x4x1x8xf32> to vector<4x1x8xf32>
    %c0_109 = arith.constant 0 : index
    %c1_110 = arith.constant 1 : index
    %c0_111 = arith.constant 0 : index
    %c0_112 = arith.constant 0 : index
    %c0_113 = arith.constant 0 : index
    %129 = vector.load %arg11[%c0_109, %c1_110, %c0_111, %c0_112, %c0_113] : memref<2x2x4x1x8xf32, #tpu.memory_space<vmem>>, vector<1x1x4x1x8xf32>
    %130 = vector.shape_cast %129 : vector<1x1x4x1x8xf32> to vector<4x1x8xf32>
    %c0_114 = arith.constant 0 : index
    %c1_115 = arith.constant 1 : index
    %c0_116 = arith.constant 0 : index
    %c0_117 = arith.constant 0 : index
    %131 = vector.load %arg12[%c0_114, %c1_115, %c0_116, %c0_117] : memref<2x2x1x32xf32, #tpu.memory_space<vmem>>, vector<1x1x1x32xf32>
    %132 = vector.shape_cast %131 : vector<1x1x1x32xf32> to vector<1x32xf32>
    %133 = vector.shape_cast %116 : vector<8x32xf32> to vector<1x8x32xf32>
    %134 = vector.shape_cast %133 : vector<1x8x32xf32> to vector<1x8x32xf32>
    %135 = vector.broadcast %134 : vector<1x8x32xf32> to vector<4x8x32xf32>
    %136 = vector.shape_cast %1 : vector<8x32xf32> to vector<1x8x32xf32>
    %137 = vector.shape_cast %136 : vector<1x8x32xf32> to vector<1x8x32xf32>
    %138 = vector.broadcast %137 : vector<1x8x32xf32> to vector<4x8x32xf32>
    "tpu.trace_start"() <{level = 10 : i32, message = "hnd,hde->hne"}> : () -> ()
    %cst_118 = arith.constant dense<0.000000e+00> : vector<4x8x8xf32>
    %139 = tpu.matmul %135, %118, %cst_118 {dimension_numbers = #tpu.dot_dimension_numbers<[2], [1], [1], [2], [0, 0, 0, 1, 1, 2], [0], [0]>} : vector<4x8x32xf32>, vector<4x32x8xf32>, vector<4x8x8xf32> -> vector<4x8x8xf32>
    "tpu.trace_stop"() : () -> ()
    %140 = vector.broadcast %126 : vector<4x1x8xf32> to vector<4x8x8xf32>
    %141 = arith.addf %139, %140 : vector<4x8x8xf32>
    "tpu.trace_start"() <{level = 10 : i32, message = "hnd,hde->hne"}> : () -> ()
    %cst_119 = arith.constant dense<0.000000e+00> : vector<4x8x8xf32>
    %142 = tpu.matmul %138, %120, %cst_119 {dimension_numbers = #tpu.dot_dimension_numbers<[2], [1], [1], [2], [0, 0, 0, 1, 1, 2], [0], [0]>} : vector<4x8x32xf32>, vector<4x32x8xf32>, vector<4x8x8xf32> -> vector<4x8x8xf32>
    "tpu.trace_stop"() : () -> ()
    %143 = vector.broadcast %128 : vector<4x1x8xf32> to vector<4x8x8xf32>
    %144 = arith.addf %142, %143 : vector<4x8x8xf32>
    "tpu.trace_start"() <{level = 10 : i32, message = "hnd,hde->hne"}> : () -> ()
    %cst_120 = arith.constant dense<0.000000e+00> : vector<4x8x8xf32>
    %145 = tpu.matmul %138, %122, %cst_120 {dimension_numbers = #tpu.dot_dimension_numbers<[2], [1], [1], [2], [0, 0, 0, 1, 1, 2], [0], [0]>} : vector<4x8x32xf32>, vector<4x32x8xf32>, vector<4x8x8xf32> -> vector<4x8x8xf32>
    "tpu.trace_stop"() : () -> ()
    %146 = vector.broadcast %130 : vector<4x1x8xf32> to vector<4x8x8xf32>
    %147 = arith.addf %145, %146 : vector<4x8x8xf32>
    "tpu.trace_start"() <{level = 10 : i32, message = "hqe,hke->hqk"}> : () -> ()
    %cst_121 = arith.constant dense<0.000000e+00> : vector<4x8x8xf32>
    %148 = tpu.matmul %141, %144, %cst_121 {dimension_numbers = #tpu.dot_dimension_numbers<[2], [2], [1], [1], [0, 0, 0, 1, 1, 1], [0], [0]>} : vector<4x8x8xf32>, vector<4x8x8xf32>, vector<4x8x8xf32> -> vector<4x8x8xf32>
    "tpu.trace_stop"() : () -> ()
    %cst_122 = arith.constant 0.353553385 : f32
    %149 = vector.broadcast %cst_122 : f32 to vector<4x8x8xf32>
    %150 = arith.mulf %148, %149 : vector<4x8x8xf32>
    %151 = vector.shape_cast %3 : vector<8x8xf32> to vector<1x8x8xf32>
    %152 = vector.broadcast %151 : vector<1x8x8xf32> to vector<4x8x8xf32>
    %153 = arith.addf %150, %152 : vector<4x8x8xf32>
    %cst_123 = arith.constant dense<0xFF800000> : vector<4x8xf32>
    %154 = vector.multi_reduction <maximumf>, %153, %cst_123 [2] : vector<4x8x8xf32> to vector<4x8xf32>
    %155 = vector.shape_cast %154 : vector<4x8xf32> to vector<4x8x1xf32>
    %156 = vector.broadcast %155 : vector<4x8x1xf32> to vector<4x8x8xf32>
    %157 = arith.subf %153, %156 : vector<4x8x8xf32>
    %158 = math.exp %157 : vector<4x8x8xf32>
    %cst_124 = arith.constant dense<0.000000e+00> : vector<4x8xf32>
    %159 = vector.multi_reduction <add>, %158, %cst_124 [2] : vector<4x8x8xf32> to vector<4x8xf32>
    %160 = vector.shape_cast %159 : vector<4x8xf32> to vector<4x8x1xf32>
    %161 = tpu.reciprocal %160 {approx = true} : vector<4x8x1xf32> -> vector<4x8x1xf32>
    %162 = vector.broadcast %161 : vector<4x8x1xf32> to vector<4x8x8xf32>
    %163 = arith.mulf %158, %162 : vector<4x8x8xf32>
    "tpu.trace_start"() <{level = 10 : i32, message = "hqk,hke->hqe"}> : () -> ()
    %cst_125 = arith.constant dense<0.000000e+00> : vector<4x8x8xf32>
    %164 = tpu.matmul %163, %147, %cst_125 {dimension_numbers = #tpu.dot_dimension_numbers<[2], [1], [1], [2], [0, 0, 0, 1, 1, 2], [0], [0]>} : vector<4x8x8xf32>, vector<4x8x8xf32>, vector<4x8x8xf32> -> vector<4x8x8xf32>
    "tpu.trace_stop"() : () -> ()
    "tpu.trace_start"() <{level = 10 : i32, message = "hqe,hed->hqd"}> : () -> ()
    %cst_126 = arith.constant dense<0.000000e+00> : vector<4x8x32xf32>
    %165 = tpu.matmul %164, %124, %cst_126 {dimension_numbers = #tpu.dot_dimension_numbers<[2], [1], [1], [2], [0, 0, 0, 1, 1, 2], [0], [0]>} : vector<4x8x8xf32>, vector<4x8x32xf32>, vector<4x8x32xf32> -> vector<4x8x32xf32>
    "tpu.trace_stop"() : () -> ()
    %166 = vector.extract_strided_slice %165 {offsets = [0, 0, 0], sizes = [1, 8, 32], strides = [1, 1, 1]} : vector<4x8x32xf32> to vector<1x8x32xf32>
    %167 = vector.shape_cast %166 : vector<1x8x32xf32> to vector<8x32xf32>
    %168 = vector.extract_strided_slice %165 {offsets = [1, 0, 0], sizes = [1, 8, 32], strides = [1, 1, 1]} : vector<4x8x32xf32> to vector<1x8x32xf32>
    %169 = vector.shape_cast %168 : vector<1x8x32xf32> to vector<8x32xf32>
    %170 = arith.addf %167, %169 : vector<8x32xf32>
    %171 = vector.extract_strided_slice %165 {offsets = [2, 0, 0], sizes = [1, 8, 32], strides = [1, 1, 1]} : vector<4x8x32xf32> to vector<1x8x32xf32>
    %172 = vector.shape_cast %171 : vector<1x8x32xf32> to vector<8x32xf32>
    %173 = arith.addf %170, %172 : vector<8x32xf32>
    %174 = vector.extract_strided_slice %165 {offsets = [3, 0, 0], sizes = [1, 8, 32], strides = [1, 1, 1]} : vector<4x8x32xf32> to vector<1x8x32xf32>
    %175 = vector.shape_cast %174 : vector<1x8x32xf32> to vector<8x32xf32>
    %176 = arith.addf %173, %175 : vector<8x32xf32>
    %177 = vector.broadcast %132 : vector<1x32xf32> to vector<8x32xf32>
    %178 = arith.addf %176, %177 : vector<8x32xf32>
    %179 = arith.addf %91, %178 : vector<8x32xf32>
    %c0_127 = arith.constant 0 : index
    %c2 = arith.constant 2 : index
    %c0_128 = arith.constant 0 : index
    %c0_129 = arith.constant 0 : index
    %180 = vector.load %arg17[%c0_127, %c2, %c0_128, %c0_129] : memref<2x3x1x32xf32, #tpu.memory_space<vmem>>, vector<1x1x1x32xf32>
    %181 = vector.shape_cast %180 : vector<1x1x1x32xf32> to vector<1x32xf32>
    %c0_130 = arith.constant 0 : index
    %c2_131 = arith.constant 2 : index
    %c0_132 = arith.constant 0 : index
    %c0_133 = arith.constant 0 : index
    %182 = vector.load %arg18[%c0_130, %c2_131, %c0_132, %c0_133] : memref<2x3x1x32xf32, #tpu.memory_space<vmem>>, vector<1x1x1x32xf32>
    %183 = vector.shape_cast %182 : vector<1x1x1x32xf32> to vector<1x32xf32>
    %cst_134 = arith.constant dense<0.000000e+00> : vector<8xf32>
    %184 = vector.multi_reduction <add>, %179, %cst_134 [1] : vector<8x32xf32> to vector<8xf32>
    %185 = vector.shape_cast %184 : vector<8xf32> to vector<8x1xf32>
    %cst_135 = arith.constant 3.200000e+01 : f32
    %186 = vector.broadcast %cst_135 : f32 to vector<8x1xf32>
    %187 = arith.divf %185, %186 : vector<8x1xf32>
    %188 = vector.broadcast %187 : vector<8x1xf32> to vector<8x32xf32>
    %189 = arith.subf %179, %188 : vector<8x32xf32>
    %190 = arith.mulf %189, %189 : vector<8x32xf32>
    %cst_136 = arith.constant dense<0.000000e+00> : vector<8xf32>
    %191 = vector.multi_reduction <add>, %190, %cst_136 [1] : vector<8x32xf32> to vector<8xf32>
    %192 = vector.shape_cast %191 : vector<8xf32> to vector<8x1xf32>
    %cst_137 = arith.constant 0.0322580636 : f32
    %193 = vector.broadcast %cst_137 : f32 to vector<8x1xf32>
    %194 = arith.mulf %192, %193 : vector<8x1xf32>
    %195 = math.sqrt %194 : vector<8x1xf32>
    %cst_138 = arith.constant 9.99999997E-7 : f32
    %196 = vector.broadcast %cst_138 : f32 to vector<8x1xf32>
    %197 = arith.addf %195, %196 : vector<8x1xf32>
    %198 = tpu.reciprocal %197 {approx = true} : vector<8x1xf32> -> vector<8x1xf32>
    %199 = vector.broadcast %181 : vector<1x32xf32> to vector<8x32xf32>
    %200 = arith.mulf %199, %189 : vector<8x32xf32>
    %201 = vector.broadcast %198 : vector<8x1xf32> to vector<8x32xf32>
    %202 = arith.mulf %200, %201 : vector<8x32xf32>
    %203 = vector.broadcast %183 : vector<1x32xf32> to vector<8x32xf32>
    %204 = arith.addf %202, %203 : vector<8x32xf32>
    %c0_139 = arith.constant 0 : index
    %c0_140 = arith.constant 0 : index
    %c0_141 = arith.constant 0 : index
    %205 = vector.load %arg13[%c0_139, %c0_140, %c0_141] : memref<2x32x16xf32, #tpu.memory_space<vmem>>, vector<1x32x16xf32>
    %206 = vector.shape_cast %205 : vector<1x32x16xf32> to vector<32x16xf32>
    %cst_142 = arith.constant dense<0.000000e+00> : vector<8x16xf32>
    %207 = tpu.matmul %204, %206, %cst_142 {dimension_numbers = #tpu.dot_dimension_numbers<[1], [0], [0], [1], [0, 0, 1, 1], [], []>} : vector<8x32xf32>, vector<32x16xf32>, vector<8x16xf32> -> vector<8x16xf32>
    %c0_143 = arith.constant 0 : index
    %c0_144 = arith.constant 0 : index
    %c0_145 = arith.constant 0 : index
    %208 = vector.load %arg14[%c0_143, %c0_144, %c0_145] : memref<2x1x16xf32, #tpu.memory_space<vmem>>, vector<1x1x16xf32>
    %209 = vector.shape_cast %208 : vector<1x1x16xf32> to vector<1x16xf32>
    %210 = vector.broadcast %209 : vector<1x16xf32> to vector<8x16xf32>
    %211 = arith.addf %207, %210 : vector<8x16xf32>
    %cst_146 = arith.constant 0.000000e+00 : f32
    %212 = vector.broadcast %cst_146 : f32 to vector<8x16xf32>
    %213 = arith.maximumf %211, %212 : vector<8x16xf32>
    %c0_147 = arith.constant 0 : index
    %c0_148 = arith.constant 0 : index
    %c0_149 = arith.constant 0 : index
    %214 = vector.load %arg15[%c0_147, %c0_148, %c0_149] : memref<2x16x32xf32, #tpu.memory_space<vmem>>, vector<1x16x32xf32>
    %215 = vector.shape_cast %214 : vector<1x16x32xf32> to vector<16x32xf32>
    %cst_150 = arith.constant dense<0.000000e+00> : vector<8x32xf32>
    %216 = tpu.matmul %213, %215, %cst_150 {dimension_numbers = #tpu.dot_dimension_numbers<[1], [0], [0], [1], [0, 0, 1, 1], [], []>} : vector<8x16xf32>, vector<16x32xf32>, vector<8x32xf32> -> vector<8x32xf32>
    %217 = arith.addf %179, %216 : vector<8x32xf32>
    %c0_151 = arith.constant 0 : index
    %c0_152 = arith.constant 0 : index
    %c0_153 = arith.constant 0 : index
    %218 = vector.load %arg16[%c0_151, %c0_152, %c0_153] : memref<2x1x32xf32, #tpu.memory_space<vmem>>, vector<1x1x32xf32>
    %219 = vector.shape_cast %218 : vector<1x1x32xf32> to vector<1x32xf32>
    %220 = vector.broadcast %219 : vector<1x32xf32> to vector<8x32xf32>
    %221 = arith.addf %217, %220 : vector<8x32xf32>
    %c1_154 = arith.constant 1 : index
    %c0_155 = arith.constant 0 : index
    %c0_156 = arith.constant 0 : index
    %c0_157 = arith.constant 0 : index
    %222 = vector.load %arg17[%c1_154, %c0_155, %c0_156, %c0_157] : memref<2x3x1x32xf32, #tpu.memory_space<vmem>>, vector<1x1x1x32xf32>
    %223 = vector.shape_cast %222 : vector<1x1x1x32xf32> to vector<1x32xf32>
    %c1_158 = arith.constant 1 : index
    %c0_159 = arith.constant 0 : index
    %c0_160 = arith.constant 0 : index
    %c0_161 = arith.constant 0 : index
    %224 = vector.load %arg18[%c1_158, %c0_159, %c0_160, %c0_161] : memref<2x3x1x32xf32, #tpu.memory_space<vmem>>, vector<1x1x1x32xf32>
    %225 = vector.shape_cast %224 : vector<1x1x1x32xf32> to vector<1x32xf32>
    %cst_162 = arith.constant dense<0.000000e+00> : vector<8xf32>
    %226 = vector.multi_reduction <add>, %221, %cst_162 [1] : vector<8x32xf32> to vector<8xf32>
    %227 = vector.shape_cast %226 : vector<8xf32> to vector<8x1xf32>
    %cst_163 = arith.constant 3.200000e+01 : f32
    %228 = vector.broadcast %cst_163 : f32 to vector<8x1xf32>
    %229 = arith.divf %227, %228 : vector<8x1xf32>
    %230 = vector.broadcast %229 : vector<8x1xf32> to vector<8x32xf32>
    %231 = arith.subf %221, %230 : vector<8x32xf32>
    %232 = arith.mulf %231, %231 : vector<8x32xf32>
    %cst_164 = arith.constant dense<0.000000e+00> : vector<8xf32>
    %233 = vector.multi_reduction <add>, %232, %cst_164 [1] : vector<8x32xf32> to vector<8xf32>
    %234 = vector.shape_cast %233 : vector<8xf32> to vector<8x1xf32>
    %cst_165 = arith.constant 0.0322580636 : f32
    %235 = vector.broadcast %cst_165 : f32 to vector<8x1xf32>
    %236 = arith.mulf %234, %235 : vector<8x1xf32>
    %237 = math.sqrt %236 : vector<8x1xf32>
    %cst_166 = arith.constant 9.99999997E-7 : f32
    %238 = vector.broadcast %cst_166 : f32 to vector<8x1xf32>
    %239 = arith.addf %237, %238 : vector<8x1xf32>
    %240 = tpu.reciprocal %239 {approx = true} : vector<8x1xf32> -> vector<8x1xf32>
    %241 = vector.broadcast %223 : vector<1x32xf32> to vector<8x32xf32>
    %242 = arith.mulf %241, %231 : vector<8x32xf32>
    %243 = vector.broadcast %240 : vector<8x1xf32> to vector<8x32xf32>
    %244 = arith.mulf %242, %243 : vector<8x32xf32>
    %245 = vector.broadcast %225 : vector<1x32xf32> to vector<8x32xf32>
    %246 = arith.addf %244, %245 : vector<8x32xf32>
    %c1_167 = arith.constant 1 : index
    %c0_168 = arith.constant 0 : index
    %c0_169 = arith.constant 0 : index
    %c0_170 = arith.constant 0 : index
    %c0_171 = arith.constant 0 : index
    %247 = vector.load %arg5[%c1_167, %c0_168, %c0_169, %c0_170, %c0_171] : memref<2x2x4x32x8xf32, #tpu.memory_space<vmem>>, vector<1x1x4x32x8xf32>
    %248 = vector.shape_cast %247 : vector<1x1x4x32x8xf32> to vector<4x32x8xf32>
    %c1_172 = arith.constant 1 : index
    %c0_173 = arith.constant 0 : index
    %c0_174 = arith.constant 0 : index
    %c0_175 = arith.constant 0 : index
    %c0_176 = arith.constant 0 : index
    %249 = vector.load %arg6[%c1_172, %c0_173, %c0_174, %c0_175, %c0_176] : memref<2x2x4x32x8xf32, #tpu.memory_space<vmem>>, vector<1x1x4x32x8xf32>
    %250 = vector.shape_cast %249 : vector<1x1x4x32x8xf32> to vector<4x32x8xf32>
    %c1_177 = arith.constant 1 : index
    %c0_178 = arith.constant 0 : index
    %c0_179 = arith.constant 0 : index
    %c0_180 = arith.constant 0 : index
    %c0_181 = arith.constant 0 : index
    %251 = vector.load %arg7[%c1_177, %c0_178, %c0_179, %c0_180, %c0_181] : memref<2x2x4x32x8xf32, #tpu.memory_space<vmem>>, vector<1x1x4x32x8xf32>
    %252 = vector.shape_cast %251 : vector<1x1x4x32x8xf32> to vector<4x32x8xf32>
    %c1_182 = arith.constant 1 : index
    %c0_183 = arith.constant 0 : index
    %c0_184 = arith.constant 0 : index
    %c0_185 = arith.constant 0 : index
    %c0_186 = arith.constant 0 : index
    %253 = vector.load %arg8[%c1_182, %c0_183, %c0_184, %c0_185, %c0_186] : memref<2x2x4x8x32xf32, #tpu.memory_space<vmem>>, vector<1x1x4x8x32xf32>
    %254 = vector.shape_cast %253 : vector<1x1x4x8x32xf32> to vector<4x8x32xf32>
    %c1_187 = arith.constant 1 : index
    %c0_188 = arith.constant 0 : index
    %c0_189 = arith.constant 0 : index
    %c0_190 = arith.constant 0 : index
    %c0_191 = arith.constant 0 : index
    %255 = vector.load %arg9[%c1_187, %c0_188, %c0_189, %c0_190, %c0_191] : memref<2x2x4x1x8xf32, #tpu.memory_space<vmem>>, vector<1x1x4x1x8xf32>
    %256 = vector.shape_cast %255 : vector<1x1x4x1x8xf32> to vector<4x1x8xf32>
    %c1_192 = arith.constant 1 : index
    %c0_193 = arith.constant 0 : index
    %c0_194 = arith.constant 0 : index
    %c0_195 = arith.constant 0 : index
    %c0_196 = arith.constant 0 : index
    %257 = vector.load %arg10[%c1_192, %c0_193, %c0_194, %c0_195, %c0_196] : memref<2x2x4x1x8xf32, #tpu.memory_space<vmem>>, vector<1x1x4x1x8xf32>
    %258 = vector.shape_cast %257 : vector<1x1x4x1x8xf32> to vector<4x1x8xf32>
    %c1_197 = arith.constant 1 : index
    %c0_198 = arith.constant 0 : index
    %c0_199 = arith.constant 0 : index
    %c0_200 = arith.constant 0 : index
    %c0_201 = arith.constant 0 : index
    %259 = vector.load %arg11[%c1_197, %c0_198, %c0_199, %c0_200, %c0_201] : memref<2x2x4x1x8xf32, #tpu.memory_space<vmem>>, vector<1x1x4x1x8xf32>
    %260 = vector.shape_cast %259 : vector<1x1x4x1x8xf32> to vector<4x1x8xf32>
    %c1_202 = arith.constant 1 : index
    %c0_203 = arith.constant 0 : index
    %c0_204 = arith.constant 0 : index
    %c0_205 = arith.constant 0 : index
    %261 = vector.load %arg12[%c1_202, %c0_203, %c0_204, %c0_205] : memref<2x2x1x32xf32, #tpu.memory_space<vmem>>, vector<1x1x1x32xf32>
    %262 = vector.shape_cast %261 : vector<1x1x1x32xf32> to vector<1x32xf32>
    %263 = vector.shape_cast %246 : vector<8x32xf32> to vector<1x8x32xf32>
    %264 = vector.shape_cast %263 : vector<1x8x32xf32> to vector<1x8x32xf32>
    %265 = vector.broadcast %264 : vector<1x8x32xf32> to vector<4x8x32xf32>
    %266 = vector.shape_cast %246 : vector<8x32xf32> to vector<1x8x32xf32>
    %267 = vector.shape_cast %266 : vector<1x8x32xf32> to vector<1x8x32xf32>
    %268 = vector.broadcast %267 : vector<1x8x32xf32> to vector<4x8x32xf32>
    "tpu.trace_start"() <{level = 10 : i32, message = "hnd,hde->hne"}> : () -> ()
    %cst_206 = arith.constant dense<0.000000e+00> : vector<4x8x8xf32>
    %269 = tpu.matmul %265, %248, %cst_206 {dimension_numbers = #tpu.dot_dimension_numbers<[2], [1], [1], [2], [0, 0, 0, 1, 1, 2], [0], [0]>} : vector<4x8x32xf32>, vector<4x32x8xf32>, vector<4x8x8xf32> -> vector<4x8x8xf32>
    "tpu.trace_stop"() : () -> ()
    %270 = vector.broadcast %256 : vector<4x1x8xf32> to vector<4x8x8xf32>
    %271 = arith.addf %269, %270 : vector<4x8x8xf32>
    "tpu.trace_start"() <{level = 10 : i32, message = "hnd,hde->hne"}> : () -> ()
    %cst_207 = arith.constant dense<0.000000e+00> : vector<4x8x8xf32>
    %272 = tpu.matmul %268, %250, %cst_207 {dimension_numbers = #tpu.dot_dimension_numbers<[2], [1], [1], [2], [0, 0, 0, 1, 1, 2], [0], [0]>} : vector<4x8x32xf32>, vector<4x32x8xf32>, vector<4x8x8xf32> -> vector<4x8x8xf32>
    "tpu.trace_stop"() : () -> ()
    %273 = vector.broadcast %258 : vector<4x1x8xf32> to vector<4x8x8xf32>
    %274 = arith.addf %272, %273 : vector<4x8x8xf32>
    "tpu.trace_start"() <{level = 10 : i32, message = "hnd,hde->hne"}> : () -> ()
    %cst_208 = arith.constant dense<0.000000e+00> : vector<4x8x8xf32>
    %275 = tpu.matmul %268, %252, %cst_208 {dimension_numbers = #tpu.dot_dimension_numbers<[2], [1], [1], [2], [0, 0, 0, 1, 1, 2], [0], [0]>} : vector<4x8x32xf32>, vector<4x32x8xf32>, vector<4x8x8xf32> -> vector<4x8x8xf32>
    "tpu.trace_stop"() : () -> ()
    %276 = vector.broadcast %260 : vector<4x1x8xf32> to vector<4x8x8xf32>
    %277 = arith.addf %275, %276 : vector<4x8x8xf32>
    "tpu.trace_start"() <{level = 10 : i32, message = "hqe,hke->hqk"}> : () -> ()
    %cst_209 = arith.constant dense<0.000000e+00> : vector<4x8x8xf32>
    %278 = tpu.matmul %271, %274, %cst_209 {dimension_numbers = #tpu.dot_dimension_numbers<[2], [2], [1], [1], [0, 0, 0, 1, 1, 1], [0], [0]>} : vector<4x8x8xf32>, vector<4x8x8xf32>, vector<4x8x8xf32> -> vector<4x8x8xf32>
    "tpu.trace_stop"() : () -> ()
    %cst_210 = arith.constant 0.353553385 : f32
    %279 = vector.broadcast %cst_210 : f32 to vector<4x8x8xf32>
    %280 = arith.mulf %278, %279 : vector<4x8x8xf32>
    %281 = vector.shape_cast %2 : vector<8x8xf32> to vector<1x8x8xf32>
    %282 = vector.broadcast %281 : vector<1x8x8xf32> to vector<4x8x8xf32>
    %283 = arith.addf %280, %282 : vector<4x8x8xf32>
    %cst_211 = arith.constant dense<0xFF800000> : vector<4x8xf32>
    %284 = vector.multi_reduction <maximumf>, %283, %cst_211 [2] : vector<4x8x8xf32> to vector<4x8xf32>
    %285 = vector.shape_cast %284 : vector<4x8xf32> to vector<4x8x1xf32>
    %286 = vector.broadcast %285 : vector<4x8x1xf32> to vector<4x8x8xf32>
    %287 = arith.subf %283, %286 : vector<4x8x8xf32>
    %288 = math.exp %287 : vector<4x8x8xf32>
    %cst_212 = arith.constant dense<0.000000e+00> : vector<4x8xf32>
    %289 = vector.multi_reduction <add>, %288, %cst_212 [2] : vector<4x8x8xf32> to vector<4x8xf32>
    %290 = vector.shape_cast %289 : vector<4x8xf32> to vector<4x8x1xf32>
    %291 = tpu.reciprocal %290 {approx = true} : vector<4x8x1xf32> -> vector<4x8x1xf32>
    %292 = vector.broadcast %291 : vector<4x8x1xf32> to vector<4x8x8xf32>
    %293 = arith.mulf %288, %292 : vector<4x8x8xf32>
    "tpu.trace_start"() <{level = 10 : i32, message = "hqk,hke->hqe"}> : () -> ()
    %cst_213 = arith.constant dense<0.000000e+00> : vector<4x8x8xf32>
    %294 = tpu.matmul %293, %277, %cst_213 {dimension_numbers = #tpu.dot_dimension_numbers<[2], [1], [1], [2], [0, 0, 0, 1, 1, 2], [0], [0]>} : vector<4x8x8xf32>, vector<4x8x8xf32>, vector<4x8x8xf32> -> vector<4x8x8xf32>
    "tpu.trace_stop"() : () -> ()
    "tpu.trace_start"() <{level = 10 : i32, message = "hqe,hed->hqd"}> : () -> ()
    %cst_214 = arith.constant dense<0.000000e+00> : vector<4x8x32xf32>
    %295 = tpu.matmul %294, %254, %cst_214 {dimension_numbers = #tpu.dot_dimension_numbers<[2], [1], [1], [2], [0, 0, 0, 1, 1, 2], [0], [0]>} : vector<4x8x8xf32>, vector<4x8x32xf32>, vector<4x8x32xf32> -> vector<4x8x32xf32>
    "tpu.trace_stop"() : () -> ()
    %296 = vector.extract_strided_slice %295 {offsets = [0, 0, 0], sizes = [1, 8, 32], strides = [1, 1, 1]} : vector<4x8x32xf32> to vector<1x8x32xf32>
    %297 = vector.shape_cast %296 : vector<1x8x32xf32> to vector<8x32xf32>
    %298 = vector.extract_strided_slice %295 {offsets = [1, 0, 0], sizes = [1, 8, 32], strides = [1, 1, 1]} : vector<4x8x32xf32> to vector<1x8x32xf32>
    %299 = vector.shape_cast %298 : vector<1x8x32xf32> to vector<8x32xf32>
    %300 = arith.addf %297, %299 : vector<8x32xf32>
    %301 = vector.extract_strided_slice %295 {offsets = [2, 0, 0], sizes = [1, 8, 32], strides = [1, 1, 1]} : vector<4x8x32xf32> to vector<1x8x32xf32>
    %302 = vector.shape_cast %301 : vector<1x8x32xf32> to vector<8x32xf32>
    %303 = arith.addf %300, %302 : vector<8x32xf32>
    %304 = vector.extract_strided_slice %295 {offsets = [3, 0, 0], sizes = [1, 8, 32], strides = [1, 1, 1]} : vector<4x8x32xf32> to vector<1x8x32xf32>
    %305 = vector.shape_cast %304 : vector<1x8x32xf32> to vector<8x32xf32>
    %306 = arith.addf %303, %305 : vector<8x32xf32>
    %307 = vector.broadcast %262 : vector<1x32xf32> to vector<8x32xf32>
    %308 = arith.addf %306, %307 : vector<8x32xf32>
    %309 = arith.addf %221, %308 : vector<8x32xf32>
    %c1_215 = arith.constant 1 : index
    %c1_216 = arith.constant 1 : index
    %c0_217 = arith.constant 0 : index
    %c0_218 = arith.constant 0 : index
    %310 = vector.load %arg17[%c1_215, %c1_216, %c0_217, %c0_218] : memref<2x3x1x32xf32, #tpu.memory_space<vmem>>, vector<1x1x1x32xf32>
    %311 = vector.shape_cast %310 : vector<1x1x1x32xf32> to vector<1x32xf32>
    %c1_219 = arith.constant 1 : index
    %c1_220 = arith.constant 1 : index
    %c0_221 = arith.constant 0 : index
    %c0_222 = arith.constant 0 : index
    %312 = vector.load %arg18[%c1_219, %c1_220, %c0_221, %c0_222] : memref<2x3x1x32xf32, #tpu.memory_space<vmem>>, vector<1x1x1x32xf32>
    %313 = vector.shape_cast %312 : vector<1x1x1x32xf32> to vector<1x32xf32>
    %cst_223 = arith.constant dense<0.000000e+00> : vector<8xf32>
    %314 = vector.multi_reduction <add>, %309, %cst_223 [1] : vector<8x32xf32> to vector<8xf32>
    %315 = vector.shape_cast %314 : vector<8xf32> to vector<8x1xf32>
    %cst_224 = arith.constant 3.200000e+01 : f32
    %316 = vector.broadcast %cst_224 : f32 to vector<8x1xf32>
    %317 = arith.divf %315, %316 : vector<8x1xf32>
    %318 = vector.broadcast %317 : vector<8x1xf32> to vector<8x32xf32>
    %319 = arith.subf %309, %318 : vector<8x32xf32>
    %320 = arith.mulf %319, %319 : vector<8x32xf32>
    %cst_225 = arith.constant dense<0.000000e+00> : vector<8xf32>
    %321 = vector.multi_reduction <add>, %320, %cst_225 [1] : vector<8x32xf32> to vector<8xf32>
    %322 = vector.shape_cast %321 : vector<8xf32> to vector<8x1xf32>
    %cst_226 = arith.constant 0.0322580636 : f32
    %323 = vector.broadcast %cst_226 : f32 to vector<8x1xf32>
    %324 = arith.mulf %322, %323 : vector<8x1xf32>
    %325 = math.sqrt %324 : vector<8x1xf32>
    %cst_227 = arith.constant 9.99999997E-7 : f32
    %326 = vector.broadcast %cst_227 : f32 to vector<8x1xf32>
    %327 = arith.addf %325, %326 : vector<8x1xf32>
    %328 = tpu.reciprocal %327 {approx = true} : vector<8x1xf32> -> vector<8x1xf32>
    %329 = vector.broadcast %311 : vector<1x32xf32> to vector<8x32xf32>
    %330 = arith.mulf %329, %319 : vector<8x32xf32>
    %331 = vector.broadcast %328 : vector<8x1xf32> to vector<8x32xf32>
    %332 = arith.mulf %330, %331 : vector<8x32xf32>
    %333 = vector.broadcast %313 : vector<1x32xf32> to vector<8x32xf32>
    %334 = arith.addf %332, %333 : vector<8x32xf32>
    %c1_228 = arith.constant 1 : index
    %c1_229 = arith.constant 1 : index
    %c0_230 = arith.constant 0 : index
    %c0_231 = arith.constant 0 : index
    %c0_232 = arith.constant 0 : index
    %335 = vector.load %arg5[%c1_228, %c1_229, %c0_230, %c0_231, %c0_232] : memref<2x2x4x32x8xf32, #tpu.memory_space<vmem>>, vector<1x1x4x32x8xf32>
    %336 = vector.shape_cast %335 : vector<1x1x4x32x8xf32> to vector<4x32x8xf32>
    %c1_233 = arith.constant 1 : index
    %c1_234 = arith.constant 1 : index
    %c0_235 = arith.constant 0 : index
    %c0_236 = arith.constant 0 : index
    %c0_237 = arith.constant 0 : index
    %337 = vector.load %arg6[%c1_233, %c1_234, %c0_235, %c0_236, %c0_237] : memref<2x2x4x32x8xf32, #tpu.memory_space<vmem>>, vector<1x1x4x32x8xf32>
    %338 = vector.shape_cast %337 : vector<1x1x4x32x8xf32> to vector<4x32x8xf32>
    %c1_238 = arith.constant 1 : index
    %c1_239 = arith.constant 1 : index
    %c0_240 = arith.constant 0 : index
    %c0_241 = arith.constant 0 : index
    %c0_242 = arith.constant 0 : index
    %339 = vector.load %arg7[%c1_238, %c1_239, %c0_240, %c0_241, %c0_242] : memref<2x2x4x32x8xf32, #tpu.memory_space<vmem>>, vector<1x1x4x32x8xf32>
    %340 = vector.shape_cast %339 : vector<1x1x4x32x8xf32> to vector<4x32x8xf32>
    %c1_243 = arith.constant 1 : index
    %c1_244 = arith.constant 1 : index
    %c0_245 = arith.constant 0 : index
    %c0_246 = arith.constant 0 : index
    %c0_247 = arith.constant 0 : index
    %341 = vector.load %arg8[%c1_243, %c1_244, %c0_245, %c0_246, %c0_247] : memref<2x2x4x8x32xf32, #tpu.memory_space<vmem>>, vector<1x1x4x8x32xf32>
    %342 = vector.shape_cast %341 : vector<1x1x4x8x32xf32> to vector<4x8x32xf32>
    %c1_248 = arith.constant 1 : index
    %c1_249 = arith.constant 1 : index
    %c0_250 = arith.constant 0 : index
    %c0_251 = arith.constant 0 : index
    %c0_252 = arith.constant 0 : index
    %343 = vector.load %arg9[%c1_248, %c1_249, %c0_250, %c0_251, %c0_252] : memref<2x2x4x1x8xf32, #tpu.memory_space<vmem>>, vector<1x1x4x1x8xf32>
    %344 = vector.shape_cast %343 : vector<1x1x4x1x8xf32> to vector<4x1x8xf32>
    %c1_253 = arith.constant 1 : index
    %c1_254 = arith.constant 1 : index
    %c0_255 = arith.constant 0 : index
    %c0_256 = arith.constant 0 : index
    %c0_257 = arith.constant 0 : index
    %345 = vector.load %arg10[%c1_253, %c1_254, %c0_255, %c0_256, %c0_257] : memref<2x2x4x1x8xf32, #tpu.memory_space<vmem>>, vector<1x1x4x1x8xf32>
    %346 = vector.shape_cast %345 : vector<1x1x4x1x8xf32> to vector<4x1x8xf32>
    %c1_258 = arith.constant 1 : index
    %c1_259 = arith.constant 1 : index
    %c0_260 = arith.constant 0 : index
    %c0_261 = arith.constant 0 : index
    %c0_262 = arith.constant 0 : index
    %347 = vector.load %arg11[%c1_258, %c1_259, %c0_260, %c0_261, %c0_262] : memref<2x2x4x1x8xf32, #tpu.memory_space<vmem>>, vector<1x1x4x1x8xf32>
    %348 = vector.shape_cast %347 : vector<1x1x4x1x8xf32> to vector<4x1x8xf32>
    %c1_263 = arith.constant 1 : index
    %c1_264 = arith.constant 1 : index
    %c0_265 = arith.constant 0 : index
    %c0_266 = arith.constant 0 : index
    %349 = vector.load %arg12[%c1_263, %c1_264, %c0_265, %c0_266] : memref<2x2x1x32xf32, #tpu.memory_space<vmem>>, vector<1x1x1x32xf32>
    %350 = vector.shape_cast %349 : vector<1x1x1x32xf32> to vector<1x32xf32>
    %351 = vector.shape_cast %334 : vector<8x32xf32> to vector<1x8x32xf32>
    %352 = vector.shape_cast %351 : vector<1x8x32xf32> to vector<1x8x32xf32>
    %353 = vector.broadcast %352 : vector<1x8x32xf32> to vector<4x8x32xf32>
    %354 = vector.shape_cast %1 : vector<8x32xf32> to vector<1x8x32xf32>
    %355 = vector.shape_cast %354 : vector<1x8x32xf32> to vector<1x8x32xf32>
    %356 = vector.broadcast %355 : vector<1x8x32xf32> to vector<4x8x32xf32>
    "tpu.trace_start"() <{level = 10 : i32, message = "hnd,hde->hne"}> : () -> ()
    %cst_267 = arith.constant dense<0.000000e+00> : vector<4x8x8xf32>
    %357 = tpu.matmul %353, %336, %cst_267 {dimension_numbers = #tpu.dot_dimension_numbers<[2], [1], [1], [2], [0, 0, 0, 1, 1, 2], [0], [0]>} : vector<4x8x32xf32>, vector<4x32x8xf32>, vector<4x8x8xf32> -> vector<4x8x8xf32>
    "tpu.trace_stop"() : () -> ()
    %358 = vector.broadcast %344 : vector<4x1x8xf32> to vector<4x8x8xf32>
    %359 = arith.addf %357, %358 : vector<4x8x8xf32>
    "tpu.trace_start"() <{level = 10 : i32, message = "hnd,hde->hne"}> : () -> ()
    %cst_268 = arith.constant dense<0.000000e+00> : vector<4x8x8xf32>
    %360 = tpu.matmul %356, %338, %cst_268 {dimension_numbers = #tpu.dot_dimension_numbers<[2], [1], [1], [2], [0, 0, 0, 1, 1, 2], [0], [0]>} : vector<4x8x32xf32>, vector<4x32x8xf32>, vector<4x8x8xf32> -> vector<4x8x8xf32>
    "tpu.trace_stop"() : () -> ()
    %361 = vector.broadcast %346 : vector<4x1x8xf32> to vector<4x8x8xf32>
    %362 = arith.addf %360, %361 : vector<4x8x8xf32>
    "tpu.trace_start"() <{level = 10 : i32, message = "hnd,hde->hne"}> : () -> ()
    %cst_269 = arith.constant dense<0.000000e+00> : vector<4x8x8xf32>
    %363 = tpu.matmul %356, %340, %cst_269 {dimension_numbers = #tpu.dot_dimension_numbers<[2], [1], [1], [2], [0, 0, 0, 1, 1, 2], [0], [0]>} : vector<4x8x32xf32>, vector<4x32x8xf32>, vector<4x8x8xf32> -> vector<4x8x8xf32>
    "tpu.trace_stop"() : () -> ()
    %364 = vector.broadcast %348 : vector<4x1x8xf32> to vector<4x8x8xf32>
    %365 = arith.addf %363, %364 : vector<4x8x8xf32>
    "tpu.trace_start"() <{level = 10 : i32, message = "hqe,hke->hqk"}> : () -> ()
    %cst_270 = arith.constant dense<0.000000e+00> : vector<4x8x8xf32>
    %366 = tpu.matmul %359, %362, %cst_270 {dimension_numbers = #tpu.dot_dimension_numbers<[2], [2], [1], [1], [0, 0, 0, 1, 1, 1], [0], [0]>} : vector<4x8x8xf32>, vector<4x8x8xf32>, vector<4x8x8xf32> -> vector<4x8x8xf32>
    "tpu.trace_stop"() : () -> ()
    %cst_271 = arith.constant 0.353553385 : f32
    %367 = vector.broadcast %cst_271 : f32 to vector<4x8x8xf32>
    %368 = arith.mulf %366, %367 : vector<4x8x8xf32>
    %369 = vector.shape_cast %3 : vector<8x8xf32> to vector<1x8x8xf32>
    %370 = vector.broadcast %369 : vector<1x8x8xf32> to vector<4x8x8xf32>
    %371 = arith.addf %368, %370 : vector<4x8x8xf32>
    %cst_272 = arith.constant dense<0xFF800000> : vector<4x8xf32>
    %372 = vector.multi_reduction <maximumf>, %371, %cst_272 [2] : vector<4x8x8xf32> to vector<4x8xf32>
    %373 = vector.shape_cast %372 : vector<4x8xf32> to vector<4x8x1xf32>
    %374 = vector.broadcast %373 : vector<4x8x1xf32> to vector<4x8x8xf32>
    %375 = arith.subf %371, %374 : vector<4x8x8xf32>
    %376 = math.exp %375 : vector<4x8x8xf32>
    %cst_273 = arith.constant dense<0.000000e+00> : vector<4x8xf32>
    %377 = vector.multi_reduction <add>, %376, %cst_273 [2] : vector<4x8x8xf32> to vector<4x8xf32>
    %378 = vector.shape_cast %377 : vector<4x8xf32> to vector<4x8x1xf32>
    %379 = tpu.reciprocal %378 {approx = true} : vector<4x8x1xf32> -> vector<4x8x1xf32>
    %380 = vector.broadcast %379 : vector<4x8x1xf32> to vector<4x8x8xf32>
    %381 = arith.mulf %376, %380 : vector<4x8x8xf32>
    "tpu.trace_start"() <{level = 10 : i32, message = "hqk,hke->hqe"}> : () -> ()
    %cst_274 = arith.constant dense<0.000000e+00> : vector<4x8x8xf32>
    %382 = tpu.matmul %381, %365, %cst_274 {dimension_numbers = #tpu.dot_dimension_numbers<[2], [1], [1], [2], [0, 0, 0, 1, 1, 2], [0], [0]>} : vector<4x8x8xf32>, vector<4x8x8xf32>, vector<4x8x8xf32> -> vector<4x8x8xf32>
    "tpu.trace_stop"() : () -> ()
    "tpu.trace_start"() <{level = 10 : i32, message = "hqe,hed->hqd"}> : () -> ()
    %cst_275 = arith.constant dense<0.000000e+00> : vector<4x8x32xf32>
    %383 = tpu.matmul %382, %342, %cst_275 {dimension_numbers = #tpu.dot_dimension_numbers<[2], [1], [1], [2], [0, 0, 0, 1, 1, 2], [0], [0]>} : vector<4x8x8xf32>, vector<4x8x32xf32>, vector<4x8x32xf32> -> vector<4x8x32xf32>
    "tpu.trace_stop"() : () -> ()
    %384 = vector.extract_strided_slice %383 {offsets = [0, 0, 0], sizes = [1, 8, 32], strides = [1, 1, 1]} : vector<4x8x32xf32> to vector<1x8x32xf32>
    %385 = vector.shape_cast %384 : vector<1x8x32xf32> to vector<8x32xf32>
    %386 = vector.extract_strided_slice %383 {offsets = [1, 0, 0], sizes = [1, 8, 32], strides = [1, 1, 1]} : vector<4x8x32xf32> to vector<1x8x32xf32>
    %387 = vector.shape_cast %386 : vector<1x8x32xf32> to vector<8x32xf32>
    %388 = arith.addf %385, %387 : vector<8x32xf32>
    %389 = vector.extract_strided_slice %383 {offsets = [2, 0, 0], sizes = [1, 8, 32], strides = [1, 1, 1]} : vector<4x8x32xf32> to vector<1x8x32xf32>
    %390 = vector.shape_cast %389 : vector<1x8x32xf32> to vector<8x32xf32>
    %391 = arith.addf %388, %390 : vector<8x32xf32>
    %392 = vector.extract_strided_slice %383 {offsets = [3, 0, 0], sizes = [1, 8, 32], strides = [1, 1, 1]} : vector<4x8x32xf32> to vector<1x8x32xf32>
    %393 = vector.shape_cast %392 : vector<1x8x32xf32> to vector<8x32xf32>
    %394 = arith.addf %391, %393 : vector<8x32xf32>
    %395 = vector.broadcast %350 : vector<1x32xf32> to vector<8x32xf32>
    %396 = arith.addf %394, %395 : vector<8x32xf32>
    %397 = arith.addf %309, %396 : vector<8x32xf32>
    %c1_276 = arith.constant 1 : index
    %c2_277 = arith.constant 2 : index
    %c0_278 = arith.constant 0 : index
    %c0_279 = arith.constant 0 : index
    %398 = vector.load %arg17[%c1_276, %c2_277, %c0_278, %c0_279] : memref<2x3x1x32xf32, #tpu.memory_space<vmem>>, vector<1x1x1x32xf32>
    %399 = vector.shape_cast %398 : vector<1x1x1x32xf32> to vector<1x32xf32>
    %c1_280 = arith.constant 1 : index
    %c2_281 = arith.constant 2 : index
    %c0_282 = arith.constant 0 : index
    %c0_283 = arith.constant 0 : index
    %400 = vector.load %arg18[%c1_280, %c2_281, %c0_282, %c0_283] : memref<2x3x1x32xf32, #tpu.memory_space<vmem>>, vector<1x1x1x32xf32>
    %401 = vector.shape_cast %400 : vector<1x1x1x32xf32> to vector<1x32xf32>
    %cst_284 = arith.constant dense<0.000000e+00> : vector<8xf32>
    %402 = vector.multi_reduction <add>, %397, %cst_284 [1] : vector<8x32xf32> to vector<8xf32>
    %403 = vector.shape_cast %402 : vector<8xf32> to vector<8x1xf32>
    %cst_285 = arith.constant 3.200000e+01 : f32
    %404 = vector.broadcast %cst_285 : f32 to vector<8x1xf32>
    %405 = arith.divf %403, %404 : vector<8x1xf32>
    %406 = vector.broadcast %405 : vector<8x1xf32> to vector<8x32xf32>
    %407 = arith.subf %397, %406 : vector<8x32xf32>
    %408 = arith.mulf %407, %407 : vector<8x32xf32>
    %cst_286 = arith.constant dense<0.000000e+00> : vector<8xf32>
    %409 = vector.multi_reduction <add>, %408, %cst_286 [1] : vector<8x32xf32> to vector<8xf32>
    %410 = vector.shape_cast %409 : vector<8xf32> to vector<8x1xf32>
    %cst_287 = arith.constant 0.0322580636 : f32
    %411 = vector.broadcast %cst_287 : f32 to vector<8x1xf32>
    %412 = arith.mulf %410, %411 : vector<8x1xf32>
    %413 = math.sqrt %412 : vector<8x1xf32>
    %cst_288 = arith.constant 9.99999997E-7 : f32
    %414 = vector.broadcast %cst_288 : f32 to vector<8x1xf32>
    %415 = arith.addf %413, %414 : vector<8x1xf32>
    %416 = tpu.reciprocal %415 {approx = true} : vector<8x1xf32> -> vector<8x1xf32>
    %417 = vector.broadcast %399 : vector<1x32xf32> to vector<8x32xf32>
    %418 = arith.mulf %417, %407 : vector<8x32xf32>
    %419 = vector.broadcast %416 : vector<8x1xf32> to vector<8x32xf32>
    %420 = arith.mulf %418, %419 : vector<8x32xf32>
    %421 = vector.broadcast %401 : vector<1x32xf32> to vector<8x32xf32>
    %422 = arith.addf %420, %421 : vector<8x32xf32>
    %c1_289 = arith.constant 1 : index
    %c0_290 = arith.constant 0 : index
    %c0_291 = arith.constant 0 : index
    %423 = vector.load %arg13[%c1_289, %c0_290, %c0_291] : memref<2x32x16xf32, #tpu.memory_space<vmem>>, vector<1x32x16xf32>
    %424 = vector.shape_cast %423 : vector<1x32x16xf32> to vector<32x16xf32>
    %cst_292 = arith.constant dense<0.000000e+00> : vector<8x16xf32>
    %425 = tpu.matmul %422, %424, %cst_292 {dimension_numbers = #tpu.dot_dimension_numbers<[1], [0], [0], [1], [0, 0, 1, 1], [], []>} : vector<8x32xf32>, vector<32x16xf32>, vector<8x16xf32> -> vector<8x16xf32>
    %c1_293 = arith.constant 1 : index
    %c0_294 = arith.constant 0 : index
    %c0_295 = arith.constant 0 : index
    %426 = vector.load %arg14[%c1_293, %c0_294, %c0_295] : memref<2x1x16xf32, #tpu.memory_space<vmem>>, vector<1x1x16xf32>
    %427 = vector.shape_cast %426 : vector<1x1x16xf32> to vector<1x16xf32>
    %428 = vector.broadcast %427 : vector<1x16xf32> to vector<8x16xf32>
    %429 = arith.addf %425, %428 : vector<8x16xf32>
    %cst_296 = arith.constant 0.000000e+00 : f32
    %430 = vector.broadcast %cst_296 : f32 to vector<8x16xf32>
    %431 = arith.maximumf %429, %430 : vector<8x16xf32>
    %c1_297 = arith.constant 1 : index
    %c0_298 = arith.constant 0 : index
    %c0_299 = arith.constant 0 : index
    %432 = vector.load %arg15[%c1_297, %c0_298, %c0_299] : memref<2x16x32xf32, #tpu.memory_space<vmem>>, vector<1x16x32xf32>
    %433 = vector.shape_cast %432 : vector<1x16x32xf32> to vector<16x32xf32>
    %cst_300 = arith.constant dense<0.000000e+00> : vector<8x32xf32>
    %434 = tpu.matmul %431, %433, %cst_300 {dimension_numbers = #tpu.dot_dimension_numbers<[1], [0], [0], [1], [0, 0, 1, 1], [], []>} : vector<8x16xf32>, vector<16x32xf32>, vector<8x32xf32> -> vector<8x32xf32>
    %435 = arith.addf %397, %434 : vector<8x32xf32>
    %c1_301 = arith.constant 1 : index
    %c0_302 = arith.constant 0 : index
    %c0_303 = arith.constant 0 : index
    %436 = vector.load %arg16[%c1_301, %c0_302, %c0_303] : memref<2x1x32xf32, #tpu.memory_space<vmem>>, vector<1x1x32xf32>
    %437 = vector.shape_cast %436 : vector<1x1x32xf32> to vector<1x32xf32>
    %438 = vector.broadcast %437 : vector<1x32xf32> to vector<8x32xf32>
    %439 = arith.addf %435, %438 : vector<8x32xf32>
    %c0_304 = arith.constant 0 : index
    %c0_305 = arith.constant 0 : index
    %440 = vector.load %arg19[%c0_304, %c0_305] : memref<1x32xf32, #tpu.memory_space<vmem>>, vector<1x32xf32>
    %c0_306 = arith.constant 0 : index
    %c0_307 = arith.constant 0 : index
    %441 = vector.load %arg20[%c0_306, %c0_307] : memref<1x32xf32, #tpu.memory_space<vmem>>, vector<1x32xf32>
    %cst_308 = arith.constant dense<0.000000e+00> : vector<8xf32>
    %442 = vector.multi_reduction <add>, %439, %cst_308 [1] : vector<8x32xf32> to vector<8xf32>
    %443 = vector.shape_cast %442 : vector<8xf32> to vector<8x1xf32>
    %cst_309 = arith.constant 3.200000e+01 : f32
    %444 = vector.broadcast %cst_309 : f32 to vector<8x1xf32>
    %445 = arith.divf %443, %444 : vector<8x1xf32>
    %446 = vector.broadcast %445 : vector<8x1xf32> to vector<8x32xf32>
    %447 = arith.subf %439, %446 : vector<8x32xf32>
    %448 = arith.mulf %447, %447 : vector<8x32xf32>
    %cst_310 = arith.constant dense<0.000000e+00> : vector<8xf32>
    %449 = vector.multi_reduction <add>, %448, %cst_310 [1] : vector<8x32xf32> to vector<8xf32>
    %450 = vector.shape_cast %449 : vector<8xf32> to vector<8x1xf32>
    %cst_311 = arith.constant 0.0322580636 : f32
    %451 = vector.broadcast %cst_311 : f32 to vector<8x1xf32>
    %452 = arith.mulf %450, %451 : vector<8x1xf32>
    %453 = math.sqrt %452 : vector<8x1xf32>
    %cst_312 = arith.constant 9.99999997E-7 : f32
    %454 = vector.broadcast %cst_312 : f32 to vector<8x1xf32>
    %455 = arith.addf %453, %454 : vector<8x1xf32>
    %456 = tpu.reciprocal %455 {approx = true} : vector<8x1xf32> -> vector<8x1xf32>
    %457 = vector.broadcast %440 : vector<1x32xf32> to vector<8x32xf32>
    %458 = arith.mulf %457, %447 : vector<8x32xf32>
    %459 = vector.broadcast %456 : vector<8x1xf32> to vector<8x32xf32>
    %460 = arith.mulf %458, %459 : vector<8x32xf32>
    %461 = vector.broadcast %441 : vector<1x32xf32> to vector<8x32xf32>
    %462 = arith.addf %460, %461 : vector<8x32xf32>
    %c0_313 = arith.constant 0 : index
    %c0_314 = arith.constant 0 : index
    %463 = vector.load %arg21[%c0_313, %c0_314] : memref<8x32xf32, #tpu.memory_space<vmem>>, vector<8x32xf32>
    tpu.vector_store %arg21[%c0_313, %c0_314], %462 {strides = array<i32>} : memref<8x32xf32, #tpu.memory_space<vmem>>, vector<8x32xf32>,
    return
  }
  func.func @transform_0(%arg0: i32) -> (i32, i32) {
    %c0_i32 = arith.constant 0 : i32
    %c0_i32_0 = arith.constant 0 : i32
    %c0_i32_1 = arith.constant 0 : i32
    return %c0_i32, %c0_i32_0 : i32, i32
  }
  func.func @transform_1(%arg0: i32) -> (i32, i32) {
    %c0_i32 = arith.constant 0 : i32
    %c0_i32_0 = arith.constant 0 : i32
    %c0_i32_1 = arith.constant 0 : i32
    return %c0_i32, %c0_i32_0 : i32, i32
  }
  func.func @transform_2(%arg0: i32) -> (i32, i32) {
    %c0_i32 = arith.constant 0 : i32
    %c0_i32_0 = arith.constant 0 : i32
    %c0_i32_1 = arith.constant 0 : i32
    return %c0_i32, %c0_i32_0 : i32, i32
  }
  func.func @transform_3(%arg0: i32) -> (i32, i32) {
    %c0_i32 = arith.constant 0 : i32
    %c0_i32_0 = arith.constant 0 : i32
    %c0_i32_1 = arith.constant 0 : i32
    return %c0_i32, %c0_i32_0 : i32, i32
  }
  func.func @transform_4(%arg0: i32) -> (i32, i32, i32, i32, i32) {
    %c0_i32 = arith.constant 0 : i32
    %c0_i32_0 = arith.constant 0 : i32
    %c0_i32_1 = arith.constant 0 : i32
    %c0_i32_2 = arith.constant 0 : i32
    %c0_i32_3 = arith.constant 0 : i32
    %c0_i32_4 = arith.constant 0 : i32
    return %c0_i32, %c0_i32_0, %c0_i32_1, %c0_i32_2, %c0_i32_3 : i32, i32, i32, i32, i32
  }
  func.func @transform_5(%arg0: i32) -> (i32, i32, i32, i32, i32) {
    %c0_i32 = arith.constant 0 : i32
    %c0_i32_0 = arith.constant 0 : i32
    %c0_i32_1 = arith.constant 0 : i32
    %c0_i32_2 = arith.constant 0 : i32
    %c0_i32_3 = arith.constant 0 : i32
    %c0_i32_4 = arith.constant 0 : i32
    return %c0_i32, %c0_i32_0, %c0_i32_1, %c0_i32_2, %c0_i32_3 : i32, i32, i32, i32, i32
  }
  func.func @transform_6(%arg0: i32) -> (i32, i32, i32, i32, i32) {
    %c0_i32 = arith.constant 0 : i32
    %c0_i32_0 = arith.constant 0 : i32
    %c0_i32_1 = arith.constant 0 : i32
    %c0_i32_2 = arith.constant 0 : i32
    %c0_i32_3 = arith.constant 0 : i32
    %c0_i32_4 = arith.constant 0 : i32
    return %c0_i32, %c0_i32_0, %c0_i32_1, %c0_i32_2, %c0_i32_3 : i32, i32, i32, i32, i32
  }
  func.func @transform_7(%arg0: i32) -> (i32, i32, i32, i32, i32) {
    %c0_i32 = arith.constant 0 : i32
    %c0_i32_0 = arith.constant 0 : i32
    %c0_i32_1 = arith.constant 0 : i32
    %c0_i32_2 = arith.constant 0 : i32
    %c0_i32_3 = arith.constant 0 : i32
    %c0_i32_4 = arith.constant 0 : i32
    return %c0_i32, %c0_i32_0, %c0_i32_1, %c0_i32_2, %c0_i32_3 : i32, i32, i32, i32, i32
  }
  func.func @transform_8(%arg0: i32) -> (i32, i32, i32, i32, i32) {
    %c0_i32 = arith.constant 0 : i32
    %c0_i32_0 = arith.constant 0 : i32
    %c0_i32_1 = arith.constant 0 : i32
    %c0_i32_2 = arith.constant 0 : i32
    %c0_i32_3 = arith.constant 0 : i32
    %c0_i32_4 = arith.constant 0 : i32
    return %c0_i32, %c0_i32_0, %c0_i32_1, %c0_i32_2, %c0_i32_3 : i32, i32, i32, i32, i32
  }
  func.func @transform_9(%arg0: i32) -> (i32, i32, i32, i32, i32) {
    %c0_i32 = arith.constant 0 : i32
    %c0_i32_0 = arith.constant 0 : i32
    %c0_i32_1 = arith.constant 0 : i32
    %c0_i32_2 = arith.constant 0 : i32
    %c0_i32_3 = arith.constant 0 : i32
    %c0_i32_4 = arith.constant 0 : i32
    return %c0_i32, %c0_i32_0, %c0_i32_1, %c0_i32_2, %c0_i32_3 : i32, i32, i32, i32, i32
  }
  func.func @transform_10(%arg0: i32) -> (i32, i32, i32, i32, i32) {
    %c0_i32 = arith.constant 0 : i32
    %c0_i32_0 = arith.constant 0 : i32
    %c0_i32_1 = arith.constant 0 : i32
    %c0_i32_2 = arith.constant 0 : i32
    %c0_i32_3 = arith.constant 0 : i32
    %c0_i32_4 = arith.constant 0 : i32
    return %c0_i32, %c0_i32_0, %c0_i32_1, %c0_i32_2, %c0_i32_3 : i32, i32, i32, i32, i32
  }
  func.func @transform_11(%arg0: i32) -> (i32, i32, i32, i32) {
    %c0_i32 = arith.constant 0 : i32
    %c0_i32_0 = arith.constant 0 : i32
    %c0_i32_1 = arith.constant 0 : i32
    %c0_i32_2 = arith.constant 0 : i32
    %c0_i32_3 = arith.constant 0 : i32
    return %c0_i32, %c0_i32_0, %c0_i32_1, %c0_i32_2 : i32, i32, i32, i32
  }
  func.func @transform_12(%arg0: i32) -> (i32, i32, i32) {
    %c0_i32 = arith.constant 0 : i32
    %c0_i32_0 = arith.constant 0 : i32
    %c0_i32_1 = arith.constant 0 : i32
    %c0_i32_2 = arith.constant 0 : i32
    return %c0_i32, %c0_i32_0, %c0_i32_1 : i32, i32, i32
  }
  func.func @transform_13(%arg0: i32) -> (i32, i32, i32) {
    %c0_i32 = arith.constant 0 : i32
    %c0_i32_0 = arith.constant 0 : i32
    %c0_i32_1 = arith.constant 0 : i32
    %c0_i32_2 = arith.constant 0 : i32
    return %c0_i32, %c0_i32_0, %c0_i32_1 : i32, i32, i32
  }
  func.func @transform_14(%arg0: i32) -> (i32, i32, i32) {
    %c0_i32 = arith.constant 0 : i32
    %c0_i32_0 = arith.constant 0 : i32
    %c0_i32_1 = arith.constant 0 : i32
    %c0_i32_2 = arith.constant 0 : i32
    return %c0_i32, %c0_i32_0, %c0_i32_1 : i32, i32, i32
  }
  func.func @transform_15(%arg0: i32) -> (i32, i32, i32) {
    %c0_i32 = arith.constant 0 : i32
    %c0_i32_0 = arith.constant 0 : i32
    %c0_i32_1 = arith.constant 0 : i32
    %c0_i32_2 = arith.constant 0 : i32
    return %c0_i32, %c0_i32_0, %c0_i32_1 : i32, i32, i32
  }
  func.func @transform_16(%arg0: i32) -> (i32, i32, i32, i32) {
    %c0_i32 = arith.constant 0 : i32
    %c0_i32_0 = arith.constant 0 : i32
    %c0_i32_1 = arith.constant 0 : i32
    %c0_i32_2 = arith.constant 0 : i32
    %c0_i32_3 = arith.constant 0 : i32
    return %c0_i32, %c0_i32_0, %c0_i32_1, %c0_i32_2 : i32, i32, i32, i32
  }
  func.func @transform_17(%arg0: i32) -> (i32, i32, i32, i32) {
    %c0_i32 = arith.constant 0 : i32
    %c0_i32_0 = arith.constant 0 : i32
    %c0_i32_1 = arith.constant 0 : i32
    %c0_i32_2 = arith.constant 0 : i32
    %c0_i32_3 = arith.constant 0 : i32
    return %c0_i32, %c0_i32_0, %c0_i32_1, %c0_i32_2 : i32, i32, i32, i32
  }
  func.func @transform_18(%arg0: i32) -> (i32, i32) {
    %c0_i32 = arith.constant 0 : i32
    %c0_i32_0 = arith.constant 0 : i32
    %c0_i32_1 = arith.constant 0 : i32
    return %c0_i32, %c0_i32_0 : i32, i32
  }
  func.func @transform_19(%arg0: i32) -> (i32, i32) {
    %c0_i32 = arith.constant 0 : i32
    %c0_i32_0 = arith.constant 0 : i32
    %c0_i32_1 = arith.constant 0 : i32
    return %c0_i32, %c0_i32_0 : i32, i32
  }
  func.func @transform_20(%arg0: i32) -> (i32, i32) {
    %c0_i32 = arith.constant 0 : i32
    %c0_i32_0 = arith.constant 0 : i32
    %c0_i32_1 = arith.constant 0 : i32
    return %c0_i32, %c0_i32_0 : i32, i32
  }
}

</mosaic_0001>

<bundles_post_ra>
// kernel: tpu_custom_call.1
= control target key start
LH: loop header
LB: loop body
LE: loop exit
PB: predicated region body
PF: predicated region fallthrough
CT: control target
= control target key end

     0   :  { %s12045_s0 = inlined_call_operand.vmem [shape: f32[8,32], index: 0, kind: input, shape index: {}]   ;;  %s12046_s1 = inlined_call_operand.vmem [shape: f32[8,32], index: 1, kind: input, shape index: {}]   ;;  %s12047_s2 = inlined_call_operand.vmem [shape: f32[8,8], index: 2, kind: input, shape index: {}]   ;;  %s12048_s3 = inlined_call_operand.vmem [shape: f32[8,8], index: 3, kind: input, shape index: {}]   ;;  %s12049_s4 = inlined_call_operand.vmem [shape: f32[2,2,4,32,8], index: 4, kind: input, shape index: {}]   ;;  %s12050_s5 = inlined_call_operand.vmem [shape: f32[2,2,4,32,8], index: 5, kind: input, shape index: {}]   ;;  %s12051_s6 = inlined_call_operand.vmem [shape: f32[2,2,4,32,8], index: 6, kind: input, shape index: {}]   ;;  %s12052_s7 = inlined_call_operand.vmem [shape: f32[2,2,4,8,32], index: 7, kind: input, shape index: {}]   ;;  %s12053_s8 = inlined_call_operand.vmem [shape: f32[2,2,4,1,8], index: 8, kind: input, shape index: {}]   ;;  %s12054_s9 = inlined_call_operand.vmem [shape: f32[2,2,4,1,8], index: 9, kind: input, shape index: {}]   ;;  %s12055_s10 = inlined_call_operand.vmem [shape: f32[2,2,4,1,8], index: 10, kind: input, shape index: {}]   ;;  %s12056_s11 = inlined_call_operand.vmem [shape: f32[2,2,1,32], index: 11, kind: input, shape index: {}]   ;;  %s12057_s12 = inlined_call_operand.vmem [shape: f32[2,32,16], index: 12, kind: input, shape index: {}]   ;;  %s12058_s13 = inlined_call_operand.vmem [shape: f32[2,1,16], index: 13, kind: input, shape index: {}]   ;;  %s12059_s14 = inlined_call_operand.vmem [shape: f32[2,16,32], index: 14, kind: input, shape index: {}]   ;;  %s12060_s15 = inlined_call_operand.vmem [shape: f32[2,1,32], index: 15, kind: input, shape index: {}]   ;;  %s12061_s16 = inlined_call_operand.vmem [shape: f32[2,3,1,32], index: 16, kind: input, shape index: {}]   ;;  %s12062_s17 = inlined_call_operand.vmem [shape: f32[2,3,1,32], index: 17, kind: input, shape index: {}]   ;;  %s12063_s18 = inlined_call_operand.vmem [shape: f32[1,32], index: 18, kind: input, shape index: {}]   ;;  %s12064_s19 = inlined_call_operand.vmem [shape: f32[1,32], index: 19, kind: input, shape index: {}]   ;;  %s12065_s20 = inlined_call_operand.hbm [shape: f32[8,32], index: 20, kind: output, shape index: {}]  }
   0x1   :  { %12070 = sst [smem:[#allocation5_spill]] %s12045_s0 }
   0x2   :  { %12071 = sst [smem:[#allocation6_spill]] %s12046_s1 }
   0x3   :  { %12072 = sst [smem:[#allocation7_spill]] %s12047_s2 }
   0x4   :  { %12073 = sst [smem:[#allocation8_spill]] %s12048_s3 }
   0x5   :  { %12074 = sst [smem:[#allocation9_spill]] %s12049_s4 }
   0x6   :  { %s12075_s23 = sld [smem:[#allocation5_spill]]  ;;  %vm72_vm0 = vcmask 261120  }
   0xc   :  { %v10540_v0 = vld [vmem:[%s12075_s23] sm:$0xff] }
   0xd   :  { %25 = vsyncpa [#allocation3], 0  ;;  %v73_v1 = vsel %vm72_vm0, %v10540_v0, 0.0  ;;  %s12076_s25 = sld [smem:[#allocation9_spill]]  ;;  %v10428_v12 = vmov 0.0|0.0   ;;  %vm10429_vm1 = vmmov 0  }
   0xe   :  { %74 = vadd.xlane.f32.xlu0 %v73_v1  ;;  %9999 = vmatprep.subr.bf16.mxu0 %v10428_v12  ;;  %v10430_v20 = vmov 0.0   ;;  %v8444_v29 = vld [vmem:[%s12061_s16] ss:$0 sm:$0xff]  ;;  %v125_v48 = vld [vmem:[%s12050_s5 + $0x8] sm:$0xff]  ;;  %v126_v53 = vld [vmem:[%s12050_s5 + $0x10] sm:$0xff]  ;;  %vm1088_vm4 = vcmask 64512  }
   0xf   :  { %10005 = vmatprep.subr.bf16.mxu1 %v10428_v12  ;;  %9203 = vmatprep.mubr.msk.f32.mxu0 %vm10429_vm1, %v10430_v20  ;;  %v8445_v36 = vld [vmem:[%s12062_s17] ss:$0 sm:$0xff]  ;;  %v129_v50 = vld [vmem:[%s12050_s5 + $0x28] sm:$0xff]  ;;  %v127_v54 = vld [vmem:[%s12050_s5 + $0x18] sm:$0xff]  ;;  %s12077_s21 = sld [smem:[#allocation7_spill]]  ;;  %s12078_s30 = sld [smem:[#allocation6_spill]] }
  0x10   :  { %9214 = vmatprep.mubr.msk.f32.mxu1 %vm10429_vm1, %v10430_v20  ;;  %v124_v47 = vld [vmem:[%s12050_s5] sm:$0xff]  ;;  %v130_v55 = vld [vmem:[%s12050_s5 + $0x30] sm:$0xff]  ;;  %v131_v56 = vld [vmem:[%s12050_s5 + $0x38] sm:$0xff]  ;;  %v10027_v57 = vpack.c.bf16 %v127_v54, %v126_v53  ;;  %s12079_s22 = sld [smem:[#allocation8_spill]]  ;;  %vm4145_vm9 = vcmask 130048   ;;  %s10431_s29 = smov [#allocation2]  }
  0x11   :  { %v128_v49 = vld [vmem:[%s12050_s5 + $0x20] sm:$0xff]  ;;  %v10024_v51 = vpack.c.bf16 %v125_v48, %v124_v47  ;;  %v10033_v58 = vpack.c.bf16 %v131_v56, %v130_v55  ;;  %v133_v60 = vld [vmem:[%s12050_s5 + $0x48] sm:$0xff]  ;;  %s8436_s0 = sshll.u32 %s10431_s29, 4  ;;  %s8437_s0 = int_to_ptr.vmem [resolvable:$true] %s8436_s0 }
  0x12   :  { %v10030_v52 = vpack.c.bf16 %v129_v50, %v128_v49  ;;  %v132_v59 = vld [vmem:[%s12050_s5 + $0x40] sm:$0xff]  ;;  %v137_v62 = vld [vmem:[%s12050_s5 + $0x68] sm:$0xff]  ;;  %p10409_p1 = scmp.lt.s32.totalorder %s8437_s0, %s8437_s0 }
  0x13   :  { %v108_v7 = vld [vmem:[%s12076_s25] sm:$0xff]  ;;  %v109_v8 = vld [vmem:[%s12076_s25 + $0x8] sm:$0xff]  ;;  %v110_v14 = vld [vmem:[%s12076_s25 + $0x10] sm:$0xff]  ;;  %v10036_v63 = vpack.c.bf16 %v133_v60, %v132_v59 }
  0x14   :  { %v112_v9 = vld [vmem:[%s12076_s25 + $0x20] sm:$0xff]  ;;  %v10000_v10 = vpack.c.bf16 %v109_v8, %v108_v7  ;;  %v113_v11 = vld [vmem:[%s12076_s25 + $0x28] sm:$0xff]  ;;  %v111_v15 = vld [vmem:[%s12076_s25 + $0x18] sm:$0xff] }
  0x15   :  { %v10006_v13 = vpack.c.bf16 %v113_v11, %v112_v9  ;;  %v114_v16 = vld [vmem:[%s12076_s25 + $0x30] sm:$0xff]  ;;  %v10003_v17 = vpack.c.bf16 %v111_v15, %v110_v14  ;;  %v115_v18 = vld [vmem:[%s12076_s25 + $0x38] sm:$0xff]  ;;  %v116_v30 = vld [vmem:[%s12076_s25 + $0x40] sm:$0xff] }
  0x16   :  { %10001 = vmatpush3.bf16.msra.mxu0 %v10000_v10  ;;  %v10009_v19 = vpack.c.bf16 %v115_v18, %v114_v16  ;;  %v117_v32 = vld [vmem:[%s12076_s25 + $0x48] sm:$0xff]  ;;  %v120_v33 = vld [vmem:[%s12076_s25 + $0x60] sm:$0xff]  ;;  %v118_v40 = vld [vmem:[%s12076_s25 + $0x50] sm:$0xff] }
  0x17   :  { %10007 = vmatpush3.bf16.msra.mxu1 %v10006_v13  ;;  %10002 = vmatprep.subr.bf16.mxu0 %v10428_v12  ;;  %v121_v34 = vld [vmem:[%s12076_s25 + $0x68] sm:$0xff]  ;;  %v10012_v38 = vpack.c.bf16 %v117_v32, %v116_v30  ;;  %v119_v42 = vld [vmem:[%s12076_s25 + $0x58] sm:$0xff]  ;;  %v122_v43 = vld [vmem:[%s12076_s25 + $0x70] sm:$0xff] }
  0x18   :  { %10008 = vmatprep.subr.bf16.mxu1 %v10428_v12  ;;  %v10018_v39 = vpack.c.bf16 %v121_v34, %v120_v33  ;;  %v123_v44 = vld [vmem:[%s12076_s25 + $0x78] sm:$0xff]  ;;  %v10015_v45 = vpack.c.bf16 %v119_v42, %v118_v40  ;;  %v136_v61 = vld [vmem:[%s12050_s5 + $0x60] sm:$0xff]  ;;  %v141_v9 = vld [vmem:[%s12051_s6 + $0x8] sm:$0xff] }
  0x19   :  { %v10021_v46 = vpack.c.bf16 %v123_v44, %v122_v43  ;;  %v10042_v1 = vpack.c.bf16 %v137_v62, %v136_v61  ;;  %v140_v8 = vld [vmem:[%s12051_s6] sm:$0xff]  ;;  %v145_v11 = vld [vmem:[%s12051_s6 + $0x28] sm:$0xff]  ;;  %v142_v15 = vld [vmem:[%s12051_s6 + $0x10] sm:$0xff] }
  0x1a   :  { %10004 = vmatpush3.bf16.msra.mxu0 %v10003_v17  ;;  %v144_v10 = vld [vmem:[%s12051_s6 + $0x20] sm:$0xff]  ;;  %v10048_v13 = vpack.c.bf16 %v141_v9, %v140_v8  ;;  %v143_v16 = vld [vmem:[%s12051_s6 + $0x18] sm:$0xff]  ;;  %v146_v17 = vld [vmem:[%s12051_s6 + $0x30] sm:$0xff] }
  0x1b   :  { %10010 = vmatpush3.bf16.msra.mxu1 %v10009_v19  ;;  %10011 = vmatprep.subr.bf16.mxu0 %v10428_v12  ;;  %v10054_v14 = vpack.c.bf16 %v145_v11, %v144_v10  ;;  %v147_v18 = vld [vmem:[%s12051_s6 + $0x38] sm:$0xff]  ;;  %v10051_v19 = vpack.c.bf16 %v143_v16, %v142_v15  ;;  %v154_v30 = vld [vmem:[%s12051_s6 + $0x70] sm:$0xff]  ;;  %v8454_v43 = vld [vmem:[%s12054_s9] ss:$0 sm:$0xff] }
  0x1c   :  { %10017 = vmatprep.subr.bf16.mxu1 %v10428_v12  ;;  %v8447_v47 = vld [vmem:[%s12053_s8 + $0x1] ss:$0 sm:$0xff]  ;;  %v8456_v54 = vld [vmem:[%s12054_s9 + $0x2] ss:$0 sm:$0xff]  ;;  %v8457_v55 = vld [vmem:[%s12054_s9 + $0x3] ss:$0 sm:$0xff] }
  0x1d   :  { %v8449_v59 = vld [vmem:[%s12053_s8 + $0x3] ss:$0 sm:$0xff] }
  0x9b   :  { %v75_v2 = vpop.xlane.xlu0 %74 }
  0x9c   :  { %v77_v3 = vmul.f32 0.03125, %v75_v2  ;;  %v134_v2 = vld [vmem:[%s12050_s5 + $0x50] sm:$0xff] }
  0x9e   :  { %v78_v4 = vsub.f32 %v10540_v0, %v77_v3  ;;  %v135_v3 = vld [vmem:[%s12050_s5 + $0x58] sm:$0xff] }
  0xa0   :  { %v79_v5 = vmul.f32 %v78_v4, %v78_v4  ;;  %v99_v31 = vmul.f32 %v8444_v29, %v78_v4  ;;  %v138_v4 = vld [vmem:[%s12050_s5 + $0x70] sm:$0xff]  ;;  %v151_v29 = vld [vmem:[%s12051_s6 + $0x58] sm:$0xff] }
  0xa2   :  { %v80_v6 = vsel %vm72_vm0, %v79_v5, 0.0  ;;  %v139_v5 = vld [vmem:[%s12050_s5 + $0x78] sm:$0xff] }
  0xa3   :  { %81 = vadd.xlane.f32.xlu0 %v80_v6  ;;  %v10039_v6 = vpack.c.bf16 %v135_v3, %v134_v2  ;;  %v10045_v7 = vpack.c.bf16 %v139_v5, %v138_v4  ;;  %v8462_v3 = vld [vmem:[%s12055_s10] ss:$0 sm:$0xff]  ;;  %v8463_v4 = vld [vmem:[%s12055_s10 + $0x1] ss:$0 sm:$0xff] }
 0x130   :  { %v82_v21 = vpop.xlane.xlu0 %81 }
 0x131   :  { %v83_v22 = vmul.f32 0.032258064, %v82_v21  ;;  %v10057_v21 = vpack.c.bf16 %v147_v18, %v146_v17  ;;  %v68_v18 = vld [vmem:[%s12077_s21] sm:$0xff] }
 0x133   :  { %10309 = vrsqrt.f32 %v83_v22  ;;  %vm86_vm2 = vcmp.eq.f32.partialorder %v83_v22, inf  ;;  %v89_v25 = vand.u32 2147483648, %v83_v22  ;;  %vm88_vm3 = vcmp.eq.f32.partialorder %v83_v22, 0.0 }
 0x13d   :  { %v10310_v23 = vpop.eup %10309 }
 0x13e   :  { %v85_v24 = vmul.f32 %v10310_v23, %v83_v22  ;;  %v149_v23 = vld [vmem:[%s12051_s6 + $0x48] sm:$0xff] }
 0x140   :  { %v87_v26 = vsel %vm86_vm2, %v83_v22, %v85_v24  ;;  %v148_v22 = vld [vmem:[%s12051_s6 + $0x40] sm:$0xff] }
 0x141   :  { %v90_v27 = vsel %vm88_vm3, %v89_v25, %v87_v26  ;;  %v152_v24 = vld [vmem:[%s12051_s6 + $0x60] sm:$0xff]  ;;  %v153_v25 = vld [vmem:[%s12051_s6 + $0x68] sm:$0xff]  ;;  %v10060_v26 = vpack.c.bf16 %v149_v23, %v148_v22 }
 0x142   :  { %v91_v28 = vadd.f32 1e-06, %v90_v27  ;;  %v10066_v27 = vpack.c.bf16 %v153_v25, %v152_v24 }
 0x144   :  { %10311 = vrcp.f32 %v91_v28  ;;  %v150_v28 = vld [vmem:[%s12051_s6 + $0x50] sm:$0xff] }
 0x145   :  { %v10063_v32 = vpack.c.bf16 %v151_v29, %v150_v28 }
 0x14e   :  { %v10312_v35 = vpop.eup %10311 }
 0x14f   :  { %v100_v37 = vmul.f32 %v10312_v35, %v99_v31  ;;  %v155_v31 = vld [vmem:[%s12051_s6 + $0x78] sm:$0xff] }
 0x150   :  { %v10069_v33 = vpack.c.bf16 %v155_v31, %v154_v30 }
 0x151   :  { %v10601_v41 = vadd.f32 %v8445_v36, %v100_v37 }
 0x153   :  { %9204 = vmatmul.mubr.msk.f32.vlgmr.msra.gmra.mrb[0].mxu0 %vm72_vm0, %v10601_v41  ;;  %9215 = vmatmul.mubr.msk.f32.vlgmr.msra.gmra.mrb[0].mxu1 %vm72_vm0, %v10601_v41 }
 0x154   :  { %10013 = vmatpush3.bf16.msra.mxu0 %v10012_v38  ;;  %10019 = vmatpush3.bf16.msra.mxu1 %v10018_v39 }
 0x155   :  { %10014 = vmatprep.subr.bf16.mxu0 %v10428_v12  ;;  %10020 = vmatprep.subr.bf16.mxu1 %v10428_v12 }
 0x156   :  { %9225 = vmatprep.mubr.msk.f32.mxu0 %vm10429_vm1, %v10430_v20  ;;  %9236 = vmatprep.mubr.msk.f32.mxu1 %vm10429_vm1, %v10430_v20 }
 0x158   :  { %10016 = vmatpush3.bf16.msra.mxu0 %v10015_v45  ;;  %10022 = vmatpush3.bf16.msra.mxu1 %v10021_v46  ;;  %v8446_v46 = vld [vmem:[%s12053_s8] ss:$0 sm:$0xff] }
 0x159   :  { %10023 = vmatprep.subr.bf16.mxu0 %v10428_v12  ;;  %10029 = vmatprep.subr.bf16.mxu1 %v10428_v12 }
 0x15b   :  { %9226 = vmatmul.mubr.msk.f32.vlgmr.msra.gmra.mrb[2].mxu0 %vm72_vm0, %v10601_v41  ;;  %9237 = vmatmul.mubr.msk.f32.vlgmr.msra.gmra.mrb[2].mxu1 %vm72_vm0, %v10601_v41 }
 0x15c   :  { %10025 = vmatpush3.bf16.msra.mxu0 %v10024_v51  ;;  %10031 = vmatpush3.bf16.msra.mxu1 %v10030_v52 }
 0x15d   :  { %10026 = vmatprep.subr.bf16.mxu0 %v10428_v12  ;;  %10032 = vmatprep.subr.bf16.mxu1 %v10428_v12 }
 0x15e   :  { %9247 = vmatprep.mubr.msk.f32.mxu0 %vm10429_vm1, %v10430_v20  ;;  %9258 = vmatprep.mubr.msk.f32.mxu1 %vm10429_vm1, %v10430_v20 }
 0x160   :  { %10028 = vmatpush3.bf16.msra.mxu0 %v10027_v57  ;;  %10034 = vmatpush3.bf16.msra.mxu1 %v10033_v58  ;;  %v8448_v58 = vld [vmem:[%s12053_s8 + $0x2] ss:$0 sm:$0xff] }
 0x161   :  { %10035 = vmatprep.subr.bf16.mxu0 %v10428_v12  ;;  %10041 = vmatprep.subr.bf16.mxu1 %v10428_v12 }
 0x163   :  { %9248 = vmatmul.mubr.msk.f32.vlgmr.msra.gmra.mrb[4].mxu0 %vm72_vm0, %v10601_v41  ;;  %9259 = vmatmul.mubr.msk.f32.vlgmr.msra.gmra.mrb[4].mxu1 %vm72_vm0, %v10601_v41 }
 0x164   :  { %10037 = vmatpush3.bf16.msra.mxu0 %v10036_v63  ;;  %10043 = vmatpush3.bf16.msra.mxu1 %v10042_v1 }
 0x165   :  { %10038 = vmatprep.subr.bf16.mxu0 %v10428_v12  ;;  %10044 = vmatprep.subr.bf16.mxu1 %v10428_v12 }
 0x166   :  { %9269 = vmatprep.mubr.msk.f32.mxu0 %vm10429_vm1, %v10430_v20  ;;  %9280 = vmatprep.mubr.msk.f32.mxu1 %vm10429_vm1, %v10430_v20 }
 0x168   :  { %10040 = vmatpush3.bf16.msra.mxu0 %v10039_v6  ;;  %10046 = vmatpush3.bf16.msra.mxu1 %v10045_v7 }
 0x169   :  { %10047 = vmatprep.subr.bf16.mxu0 %v10428_v12  ;;  %10053 = vmatprep.subr.bf16.mxu1 %v10428_v12 }
 0x16b   :  { %9270 = vmatmul.mubr.msk.f32.vlgmr.msra.gmra.mrb[6].mxu0 %vm72_vm0, %v10601_v41  ;;  %9281 = vmatmul.mubr.msk.f32.vlgmr.msra.gmra.mrb[6].mxu1 %vm72_vm0, %v10601_v41 }
 0x16c   :  { %10049 = vmatpush3.bf16.msra.mxu0 %v10048_v13  ;;  %10055 = vmatpush3.bf16.msra.mxu1 %v10054_v14 }
 0x16d   :  { %10050 = vmatprep.subr.bf16.mxu0 %v10428_v12  ;;  %10056 = vmatprep.subr.bf16.mxu1 %v10428_v12 }
 0x16e   :  { %9291 = vmatprep.mubr.msk.f32.mxu0 %vm10429_vm1, %v10430_v20  ;;  %9302 = vmatprep.mubr.msk.f32.mxu1 %vm10429_vm1, %v10430_v20 }
 0x170   :  { %10052 = vmatpush3.bf16.msra.mxu0 %v10051_v19  ;;  %10058 = vmatpush3.bf16.msra.mxu1 %v10057_v21 }
 0x171   :  { %10059 = vmatprep.subr.bf16.mxu0 %v10428_v12  ;;  %10065 = vmatprep.subr.bf16.mxu1 %v10428_v12 }
 0x173   :  { %9292 = vmatmul.mubr.msk.f32.vlgmr.msra.gmra.mrb[8].mxu0 %vm72_vm0, %v10601_v41  ;;  %9303 = vmatmul.mubr.msk.f32.vlgmr.msra.gmra.mrb[8].mxu1 %vm72_vm0, %v10601_v41 }
 0x174   :  { %10061 = vmatpush3.bf16.msra.mxu0 %v10060_v26  ;;  %10067 = vmatpush3.bf16.msra.mxu1 %v10066_v27 }
 0x175   :  { %10062 = vmatprep.subr.bf16.mxu0 %v10428_v12  ;;  %10068 = vmatprep.subr.bf16.mxu1 %v10428_v12 }
 0x176   :  { %9313 = vmatprep.mubr.msk.f32.mxu0 %vm10429_vm1, %v10430_v20  ;;  %9324 = vmatprep.mubr.msk.f32.mxu1 %vm10429_vm1, %v10430_v20 }
 0x178   :  { %10064 = vmatpush3.bf16.msra.mxu0 %v10063_v32  ;;  %10070 = vmatpush3.bf16.msra.mxu1 %v10069_v33 }
 0x179   :  { %9327 = vmatprep.subr.mxu0 %v10430_v20  ;;  %9332 = vmatprep.subr.mxu1 %v10430_v20 }
 0x17b   :  { %9314 = vmatmul.mubr.msk.f32.vlgmr.msra.gmra.mrb[10].mxu0 %vm72_vm0, %v10601_v41  ;;  %9325 = vmatmul.mubr.msk.f32.vlgmr.msra.gmra.mrb[10].mxu1 %vm72_vm0, %v10601_v41  ;;  %v8455_v41 = vld [vmem:[%s12054_s9 + $0x1] ss:$0 sm:$0xff] }
 0x17c   :  { %9329 = vmatprep.mubr.msk.f32.mxu0 %vm10429_vm1, %v10430_v20  ;;  %9334 = vmatprep.mubr.msk.f32.mxu1 %vm10429_vm1, %v10430_v20 }
 0x226   :  { %v266_v34 = vpop.f32.mrb[0].mxu0  ;;  %v336_v35 = vpop.f32.mrb[0].mxu1 }
 0x227   :  { %v9205_v36 = vpop.f32.mrb[1].mxu0  ;;  %v9216_v37 = vpop.f32.mrb[1].mxu1  ;;  %v267_v52 = vadd.f32 %v8446_v46, %v266_v34  ;;  %v337_v53 = vadd.f32 %v8447_v47, %v336_v35 }
 0x22e   :  { %v406_v38 = vpop.f32.mrb[2].mxu0  ;;  %v476_v39 = vpop.f32.mrb[2].mxu1 }
 0x22f   :  { %v9227_v40 = vpop.f32.mrb[3].mxu0  ;;  %v9238_v42 = vpop.f32.mrb[3].mxu1  ;;  %v407_v1 = vadd.f32 %v8448_v58, %v406_v38  ;;  %v477_v2 = vadd.f32 %v8449_v59, %v476_v39 }
 0x236   :  { %v570_v44 = vpop.f32.mrb[4].mxu0  ;;  %v640_v45 = vpop.f32.mrb[4].mxu1 }
 0x237   :  { %v571_v48 = vadd.f32 %v8454_v43, %v570_v44  ;;  %v641_v49 = vadd.f32 %v8455_v41, %v640_v45  ;;  %v9249_v50 = vpop.f32.mrb[5].mxu0  ;;  %v9260_v51 = vpop.f32.mrb[5].mxu1 }
 0x239   :  { %9328 = vmatpush3.xpose.msk.msra.mxu0 %vm1088_vm4, %v571_v48  ;;  %9333 = vmatpush3.xpose.msk.msra.mxu1 %vm1088_vm4, %v641_v49 }
 0x23a   :  { %9337 = vmatprep.subr.mxu0 %v10430_v20  ;;  %9342 = vmatprep.subr.mxu1 %v10430_v20 }
 0x23c   :  { %9330 = vmatmul.mubr.msk.f32.vlgmr.msra.gmra.mrb[12].mxu0 %vm1088_vm4, %v267_v52  ;;  %9335 = vmatmul.mubr.msk.f32.vlgmr.msra.gmra.mrb[12].mxu1 %vm1088_vm4, %v337_v53 }
 0x23d   :  { %9339 = vmatprep.mubr.msk.f32.mxu0 %vm10429_vm1, %v10430_v20  ;;  %9344 = vmatprep.mubr.msk.f32.mxu1 %vm10429_vm1, %v10430_v20 }
 0x23e   :  { %v710_v56 = vpop.f32.mrb[6].mxu0  ;;  %v780_v57 = vpop.f32.mrb[6].mxu1 }
 0x23f   :  { %v711_v60 = vadd.f32 %v8456_v54, %v710_v56  ;;  %v781_v61 = vadd.f32 %v8457_v55, %v780_v57  ;;  %v9271_v62 = vpop.f32.mrb[7].mxu0  ;;  %v9282_v63 = vpop.f32.mrb[7].mxu1 }
 0x240   :  { %v8464_v62 = vld [vmem:[%s12055_s10 + $0x2] ss:$0 sm:$0xff] }
 0x241   :  { %9338 = vmatpush3.xpose.msk.msra.mxu0 %vm1088_vm4, %v711_v60  ;;  %9343 = vmatpush3.xpose.msk.msra.mxu1 %vm1088_vm4, %v781_v61 }
 0x242   :  { %9347 = vmatprep.subr.mxu0 %v10430_v20  ;;  %9352 = vmatprep.subr.mxu1 %v10430_v20 }
 0x244   :  { %9340 = vmatmul.mubr.msk.f32.vlgmr.msra.gmra.mrb[14].mxu0 %vm1088_vm4, %v407_v1  ;;  %9345 = vmatmul.mubr.msk.f32.vlgmr.msra.gmra.mrb[14].mxu1 %vm1088_vm4, %v477_v2 }
 0x245   :  { %9349 = vmatprep.mubr.msk.f32.mxu0 %vm10429_vm1, %v10430_v20  ;;  %9354 = vmatprep.mubr.msk.f32.mxu1 %vm10429_vm1, %v10430_v20 }
 0x246   :  { %v874_v5 = vpop.f32.mrb[8].mxu0  ;;  %v944_v6 = vpop.f32.mrb[8].mxu1 }
 0x247   :  { %v875_v7 = vadd.f32 %v8462_v3, %v874_v5  ;;  %v945_v8 = vadd.f32 %v8463_v4, %v944_v6  ;;  %v9293_v9 = vpop.f32.mrb[9].mxu0  ;;  %v9304_v10 = vpop.f32.mrb[9].mxu1  ;;  %v8465_v3 = vld [vmem:[%s12055_s10 + $0x3] ss:$0 sm:$0xff] }
 0x249   :  { %9348 = vmatpush3.msra.mxu0 %v875_v7  ;;  %9353 = vmatpush3.msra.mxu1 %v945_v8 }
 0x24a   :  { %9357 = vmatprep.subr.mxu0 %v10430_v20  ;;  %9362 = vmatprep.subr.mxu1 %v10430_v20 }
 0x24e   :  { %v10828_v11 = vpop.f32.mrb[10].mxu0  ;;  %v10830_v13 = vpop.f32.mrb[10].mxu1 }
 0x24f   :  { %v9315_v14 = vpop.f32.mrb[11].mxu0  ;;  %v9326_v15 = vpop.f32.mrb[11].mxu1  ;;  %v1015_v2 = vadd.f32 %v8464_v62, %v10828_v11  ;;  %v1085_v6 = vadd.f32 %v8465_v3, %v10830_v13  ;;  %v156_v11 = vld [vmem:[%s12052_s7] sm:$0xff]  ;;  %v157_v13 = vld [vmem:[%s12052_s7 + $0x8] sm:$0xff] }
 0x250   :  { %v158_v14 = vld [vmem:[%s12052_s7 + $0x10] sm:$0xff] }
 0x30f   :  { %v1161_v16 = vpop.f32.mrb[12].mxu0  ;;  %v1237_v17 = vpop.f32.mrb[12].mxu1 }
 0x310   :  { %v1393_v19 = vmul.f32 0.35355338, %v1161_v16  ;;  %v1394_v21 = vmul.f32 0.35355338, %v1237_v17  ;;  %v9331_v22 = vpop.f32.mrb[13].mxu0  ;;  %v9336_v23 = vpop.f32.mrb[13].mxu1 }
 0x311   :  { %v159_v17 = vld [vmem:[%s12052_s7 + $0x18] sm:$0xff] }
 0x312   :  { %v1397_v24 = vadd.f32 %v1393_v19, %v68_v18  ;;  %v1398_v25 = vadd.f32 %v1394_v21, %v68_v18 }
 0x314   :  { %v1401_v26 = vsel %vm1088_vm4, %v1397_v24, -inf  ;;  %v1404_v29 = vsel %vm1088_vm4, %v1398_v25, -inf }
 0x315   :  { %1402 = vmax.xlane.f32.xlu1 %v1401_v26 }
 0x317   :  { %v1313_v27 = vpop.f32.mrb[14].mxu0  ;;  %v1389_v28 = vpop.f32.mrb[14].mxu1 }
 0x318   :  { %v1395_v30 = vmul.f32 0.35355338, %v1313_v27  ;;  %v1396_v31 = vmul.f32 0.35355338, %v1389_v28  ;;  %v9341_v32 = vpop.f32.mrb[15].mxu0  ;;  %v9346_v33 = vpop.f32.mrb[15].mxu1 }
 0x319   :  { %1405 = vmax.xlane.f32.xlu1 %v1404_v29 }
 0x31a   :  { %v1400_v34 = vadd.f32 %v1396_v31, %v68_v18  ;;  %v1399_v35 = vadd.f32 %v1395_v30, %v68_v18 }
 0x31c   :  { %v1410_v36 = vsel %vm1088_vm4, %v1400_v34, -inf  ;;  %v1407_v37 = vsel %vm1088_vm4, %v1399_v35, -inf }
 0x31d   :  { %1411 = vmax.xlane.f32.xlu1 %v1410_v36  ;;  %1408 = vmax.xlane.f32.xlu0 %v1407_v37 }
 0x3a2   :  { %v1403_v38 = vpop.xlane.xlu1 %1402 }
 0x3a3   :  { %v1413_v39 = vsub.f32 %v1397_v24, %v1403_v38 }
 0x3a5   :  { %v1417_v40 = vmul.f32 1.442695, %v1413_v39 }
 0x3a6   :  { %v1406_v42 = vpop.xlane.xlu1 %1405 }
 0x3a7   :  { %10313 = vpow2.f32 %v1417_v40  ;;  %v1414_v43 = vsub.f32 %v1398_v25, %v1406_v42 }
 0x3a9   :  { %v1419_v41 = vmul.f32 1.442695, %v1414_v43 }
 0x3aa   :  { %v1412_v44 = vpop.xlane.xlu1 %1411  ;;  %v1409_v45 = vpop.xlane.xlu0 %1408 }
 0x3ab   :  { %10315 = vpow2.f32 %v1419_v41  ;;  %v1416_v46 = vsub.f32 %v1400_v34, %v1412_v44  ;;  %v1415_v47 = vsub.f32 %v1399_v35, %v1409_v45  ;;  %v8486_v35 = vld [vmem:[%s12056_s11] ss:$0 sm:$0xff] }
 0x3ac   :  { %v8491_v45 = vld [vmem:[%s12076_s25 + $0x80] sm:$0xff] }
 0x3ad   :  { %v1423_v48 = vmul.f32 1.442695, %v1416_v46  ;;  %v1421_v49 = vmul.f32 1.442695, %v1415_v47  ;;  %v8495_v46 = vld [vmem:[%s12076_s25 + $0xa0] sm:$0xff] }
 0x3af   :  { %10317 = vpow2.f32 %v1423_v48  ;;  %v8496_v48 = vld [vmem:[%s12076_s25 + $0xa8] sm:$0xff] }
 0x3b0   :  { %10319 = vpow2.f32 %v1421_v49  ;;  %v8493_v49 = vld [vmem:[%s12076_s25 + $0x90] sm:$0xff] }
 0x3b1   :  { %v10314_v50 = vpop.eup %10313 }
 0x3b2   :  { %v1425_v51 = vsel %vm1088_vm4, %v10314_v50, 0.0 }
 0x3b3   :  { %1426 = vadd.xlane.f32.xlu0 %v1425_v51  ;;  %v10078_v51 = vpack.c.bf16 %v8496_v48, %v8495_v46  ;;  %v8523_v46 = vld [vmem:[%s12051_s6 + $0x80] sm:$0xff] }
 0x3b4   :  { %v8527_v48 = vld [vmem:[%s12051_s6 + $0xa0] sm:$0xff] }
 0x3b5   :  { %v10316_v52 = vpop.eup %10315 }
 0x3b6   :  { %v1428_v53 = vsel %vm1088_vm4, %v10316_v52, 0.0 }
 0x3b7   :  { %1429 = vadd.xlane.f32.xlu1 %v1428_v53  ;;  %v8498_v53 = vld [vmem:[%s12076_s25 + $0xb8] sm:$0xff] }
 0x3b9   :  { %v10318_v54 = vpop.eup %10317 }
 0x3ba   :  { %v10320_v55 = vpop.eup %10319  ;;  %v1434_v56 = vsel %vm1088_vm4, %v10318_v54, 0.0 }
 0x3bb   :  { %1435 = vadd.xlane.f32.xlu1 %v1434_v56  ;;  %v1431_v57 = vsel %vm1088_vm4, %v10320_v55, 0.0 }
 0x3bc   :  { %1432 = vadd.xlane.f32.xlu0 %v1431_v57 }
 0x440   :  { %v1427_v58 = vpop.xlane.xlu0 %1426 }
 0x441   :  { %10321 = vrcp.f32 %v1427_v58 }
 0x444   :  { %v1430_v59 = vpop.xlane.xlu1 %1429 }
 0x445   :  { %10323 = vrcp.f32 %v1430_v59 }
 0x448   :  { %v1436_v60 = vpop.xlane.xlu1 %1435 }
 0x449   :  { %10325 = vrcp.f32 %v1436_v60  ;;  %v1433_v61 = vpop.xlane.xlu0 %1432 }
 0x44a   :  { %10327 = vrcp.f32 %v1433_v61 }
 0x44b   :  { %v10322_v63 = vpop.eup %10321 }
 0x44c   :  { %v1441_v1 = vmul.f32 %v10322_v63, %v10314_v50  ;;  %v8494_v50 = vld [vmem:[%s12076_s25 + $0x98] sm:$0xff] }
 0x44e   :  { %9350 = vmatmul.mubr.msk.f32.vlgmr.msra.gmra.mrb[16].mxu0 %vm1088_vm4, %v1441_v1  ;;  %v8489_v1 = vld [vmem:[%s12061_s16 + $0x1] ss:$0 sm:$0xff] }
 0x44f   :  { %v10324_v4 = vpop.eup %10323  ;;  %9358 = vmatpush3.msra.mxu0 %v1015_v2  ;;  %9359 = vmatprep.mubr.msk.f32.mxu0 %vm10429_vm1, %v10430_v20  ;;  %v8499_v2 = vld [vmem:[%s12076_s25 + $0xc0] sm:$0xff] }
 0x450   :  { %v1442_v5 = vmul.f32 %v10324_v4, %v10316_v52  ;;  %9367 = vmatprep.subr.mxu0 %v10430_v20  ;;  %v8497_v52 = vld [vmem:[%s12076_s25 + $0xb0] sm:$0xff]  ;;  %v8500_v4 = vld [vmem:[%s12076_s25 + $0xc8] sm:$0xff] }
 0x452   :  { %9355 = vmatmul.mubr.msk.f32.vlgmr.msra.gmra.mrb[16].mxu1 %vm1088_vm4, %v1442_v5  ;;  %v8503_v5 = vld [vmem:[%s12076_s25 + $0xe0] sm:$0xff] }
 0x453   :  { %v10326_v7 = vpop.eup %10325  ;;  %9363 = vmatpush3.msra.mxu1 %v1085_v6  ;;  %9364 = vmatprep.mubr.msk.f32.mxu1 %vm10429_vm1, %v10430_v20  ;;  %v8504_v6 = vld [vmem:[%s12076_s25 + $0xe8] sm:$0xff] }
 0x454   :  { %v10328_v8 = vpop.eup %10327  ;;  %v1444_v9 = vmul.f32 %v10326_v7, %v10318_v54  ;;  %9372 = vmatprep.subr.mxu1 %v10430_v20  ;;  %v10075_v54 = vpack.c.bf16 %v8494_v50, %v8493_v49  ;;  %v8528_v49 = vld [vmem:[%s12051_s6 + $0xa8] sm:$0xff] }
 0x455   :  { %v1443_v10 = vmul.f32 %v10328_v8, %v10320_v55  ;;  %v10081_v55 = vpack.c.bf16 %v8498_v53, %v8497_v52  ;;  %v8490_v8 = vld [vmem:[%s12062_s17 + $0x1] ss:$0 sm:$0xff]  ;;  %v8525_v52 = vld [vmem:[%s12051_s6 + $0x90] sm:$0xff]  ;;  %v8526_v53 = vld [vmem:[%s12051_s6 + $0x98] sm:$0xff] }
 0x456   :  { %9365 = vmatmul.mubr.msk.f32.vlgmr.msra.gmra.mrb[18].mxu1 %vm1088_vm4, %v1444_v9 }
 0x457   :  { %9360 = vmatmul.mubr.msk.f32.vlgmr.msra.gmra.mrb[18].mxu0 %vm1088_vm4, %v1443_v10  ;;  %9374 = vmatprep.mubr.msk.f32.mxu1 %vm10429_vm1, %v10430_v20  ;;  %v10084_v10 = vpack.c.bf16 %v8500_v4, %v8499_v2  ;;  %v8534_v2 = vld [vmem:[%s12051_s6 + $0xd8] sm:$0xff] }
 0x458   :  { %9369 = vmatprep.mubr.msk.f32.mxu0 %vm10429_vm1, %v10430_v20  ;;  %9368 = vmatpush3.msra.mxu0 %v156_v11  ;;  %v10090_v11 = vpack.c.bf16 %v8504_v6, %v8503_v5  ;;  %v8538_v5 = vld [vmem:[%s12051_s6 + $0xf8] sm:$0xff] }
 0x459   :  { %9377 = vmatprep.subr.mxu0 %v10430_v20  ;;  %9373 = vmatpush3.msra.mxu1 %v157_v13  ;;  %v8501_v13 = vld [vmem:[%s12076_s25 + $0xd0] sm:$0xff] }
 0x45a   :  { %9382 = vmatprep.subr.mxu1 %v10430_v20 }
 0x521   :  { %v1514_v15 = vpop.f32.mrb[16].mxu0 }
 0x522   :  { %v9351_v16 = vpop.f32.mrb[17].mxu0  ;;  %9370 = vmatmul.mubr.msk.f32.vlgmr.msra.gmra.mrb[20].mxu0 %vm1088_vm4, %v1514_v15  ;;  %v8502_v15 = vld [vmem:[%s12076_s25 + $0xd8] sm:$0xff] }
 0x523   :  { %9378 = vmatpush3.msra.mxu0 %v158_v14  ;;  %9379 = vmatprep.mubr.msk.f32.mxu0 %vm10429_vm1, %v10430_v20  ;;  %v8505_v16 = vld [vmem:[%s12076_s25 + $0xf0] sm:$0xff] }
 0x524   :  { %10071 = vmatprep.subr.bf16.mxu0 %v10428_v12 }
 0x525   :  { %v1587_v18 = vpop.f32.mrb[16].mxu1 }
 0x526   :  { %v9356_v19 = vpop.f32.mrb[17].mxu1  ;;  %9375 = vmatmul.mubr.msk.f32.vlgmr.msra.gmra.mrb[20].mxu1 %vm1088_vm4, %v1587_v18  ;;  %v10087_v18 = vpack.c.bf16 %v8502_v15, %v8501_v13 }
 0x527   :  { %9383 = vmatpush3.msra.mxu1 %v159_v17  ;;  %9384 = vmatprep.mubr.msk.f32.mxu1 %vm10429_vm1, %v10430_v20  ;;  %v8506_v17 = vld [vmem:[%s12076_s25 + $0xf8] sm:$0xff] }
 0x528   :  { %10077 = vmatprep.subr.bf16.mxu1 %v10428_v12  ;;  %v10093_v19 = vpack.c.bf16 %v8506_v17, %v8505_v16  ;;  %v8564_v16 = vld [vmem:[%s12054_s9 + $0x4] ss:$0 sm:$0xff]  ;;  %v8565_v17 = vld [vmem:[%s12054_s9 + $0x5] ss:$0 sm:$0xff] }
 0x529   :  { %v1733_v21 = vpop.f32.mrb[18].mxu1 }
 0x52a   :  { %v1660_v22 = vpop.f32.mrb[18].mxu0  ;;  %v9366_v23 = vpop.f32.mrb[19].mxu1  ;;  %9385 = vmatmul.mubr.msk.f32.vlgmr.msra.gmra.mrb[22].mxu1 %vm1088_vm4, %v1733_v21  ;;  %v8507_v21 = vld [vmem:[%s12050_s5 + $0x80] sm:$0xff] }
 0x52b   :  { %v9361_v24 = vpop.f32.mrb[19].mxu0  ;;  %9380 = vmatmul.mubr.msk.f32.vlgmr.msra.gmra.mrb[22].mxu0 %vm1088_vm4, %v1660_v22  ;;  %9406 = vmatprep.mubr.msk.f32.mxu1 %vm10429_vm1, %v10430_v20  ;;  %v8508_v22 = vld [vmem:[%s12050_s5 + $0x88] sm:$0xff]  ;;  %v8511_v23 = vld [vmem:[%s12050_s5 + $0xa0] sm:$0xff] }
 0x52c   :  { %9395 = vmatprep.mubr.msk.f32.mxu0 %vm10429_vm1, %v10430_v20  ;;  %10079 = vmatpush3.bf16.msra.mxu1 %v10078_v51  ;;  %v8512_v24 = vld [vmem:[%s12050_s5 + $0xa8] sm:$0xff]  ;;  %v10126_v51 = vpack.c.bf16 %v8528_v49, %v8527_v48 }
 0x52d   :  { %10080 = vmatprep.subr.bf16.mxu1 %v10428_v12 }
 0x530   :  { %10082 = vmatpush3.bf16.msra.mxu1 %v10081_v55  ;;  %v10123_v55 = vpack.c.bf16 %v8526_v53, %v8525_v52 }
 0x531   :  { %10089 = vmatprep.subr.bf16.mxu1 %v10428_v12 }
 0x5f5   :  { %v1806_v25 = vpop.f32.mrb[20].mxu0 }
 0x5f6   :  { %v9371_v26 = vpop.f32.mrb[21].mxu0 }
 0x5f7   :  { %v10102_v26 = vpack.c.bf16 %v8512_v24, %v8511_v23 }
 0x5f9   :  { %v1879_v27 = vpop.f32.mrb[20].mxu1 }
 0x5fa   :  { %v2029_v28 = vadd.f32 %v1879_v27, %v1806_v25  ;;  %v9376_v29 = vpop.f32.mrb[21].mxu1  ;;  %v10096_v25 = vpack.c.bf16 %v8508_v22, %v8507_v21  ;;  %v8509_v27 = vld [vmem:[%s12050_s5 + $0x90] sm:$0xff]  ;;  %v8556_v21 = vld [vmem:[%s12053_s8 + $0x4] ss:$0 sm:$0xff]  ;;  %v8557_v22 = vld [vmem:[%s12053_s8 + $0x5] ss:$0 sm:$0xff] }
 0x5fb   :  { %v8513_v29 = vld [vmem:[%s12050_s5 + $0xb0] sm:$0xff] }
 0x5fd   :  { %v2025_v30 = vpop.f32.mrb[22].mxu1 }
 0x5fe   :  { %v1952_v31 = vpop.f32.mrb[22].mxu0  ;;  %v9386_v32 = vpop.f32.mrb[23].mxu1 }
 0x5ff   :  { %v2030_v33 = vadd.f32 %v2029_v28, %v1952_v31  ;;  %v9381_v34 = vpop.f32.mrb[23].mxu0  ;;  %v8510_v28 = vld [vmem:[%s12050_s5 + $0x98] sm:$0xff] }
 0x600   :  { %v10099_v31 = vpack.c.bf16 %v8510_v28, %v8509_v27  ;;  %v8516_v34 = vld [vmem:[%s12050_s5 + $0xc8] sm:$0xff] }
 0x601   :  { %v2031_v36 = vadd.f32 %v2030_v33, %v2025_v30  ;;  %v8514_v30 = vld [vmem:[%s12050_s5 + $0xb8] sm:$0xff]  ;;  %v8515_v33 = vld [vmem:[%s12050_s5 + $0xc0] sm:$0xff] }
 0x602   :  { %v10105_v32 = vpack.c.bf16 %v8514_v30, %v8513_v29  ;;  %v8566_v29 = vld [vmem:[%s12054_s9 + $0x6] ss:$0 sm:$0xff]  ;;  %v8567_v30 = vld [vmem:[%s12054_s9 + $0x7] ss:$0 sm:$0xff] }
 0x603   :  { %v2038_v37 = vadd.f32 %v8486_v35, %v2031_v36  ;;  %v8519_v35 = vld [vmem:[%s12050_s5 + $0xe0] sm:$0xff]  ;;  %v8520_v36 = vld [vmem:[%s12050_s5 + $0xe8] sm:$0xff] }
 0x605   :  { %v10897_v38 = vadd.f32 %v2038_v37, %v10540_v0  ;;  %v8492_v0 = vld [vmem:[%s12076_s25 + $0x88] sm:$0xff]  ;;  %v11018_v37 = vld [vmem:[%s12078_s30] sm:$0xff] }
 0x606   :  { %v10072_v47 = vpack.c.bf16 %v8492_v0, %v8491_v45 }
 0x607   :  { %v2044_v39 = vsel %vm72_vm0, %v10897_v38, 0.0 }
 0x608   :  { %2045 = vadd.xlane.f32.xlu0 %v2044_v39  ;;  %10073 = vmatpush3.bf16.msra.mxu0 %v10072_v47  ;;  %v10108_v39 = vpack.c.bf16 %v8516_v34, %v8515_v33  ;;  %v8524_v47 = vld [vmem:[%s12051_s6 + $0x88] sm:$0xff]  ;;  %v8558_v33 = vld [vmem:[%s12053_s8 + $0x6] ss:$0 sm:$0xff]  ;;  %v8559_v34 = vld [vmem:[%s12053_s8 + $0x7] ss:$0 sm:$0xff] }
 0x609   :  { %10074 = vmatprep.subr.bf16.mxu0 %v10428_v12  ;;  %v10120_v50 = vpack.c.bf16 %v8524_v47, %v8523_v46 }
 0x60c   :  { %10076 = vmatpush3.bf16.msra.mxu0 %v10075_v54  ;;  %v8529_v54 = vld [vmem:[%s12051_s6 + $0xb0] sm:$0xff] }
 0x60d   :  { %10083 = vmatprep.subr.bf16.mxu0 %v10428_v12 }
 0x695   :  { %v2046_v40 = vpop.xlane.xlu0 %2045 }
 0x696   :  { %v2047_v42 = vmul.f32 0.03125, %v2046_v40  ;;  %v10114_v40 = vpack.c.bf16 %v8520_v36, %v8519_v35 }
 0x698   :  { %v2048_v43 = vsub.f32 %v10897_v38, %v2047_v42  ;;  %v8517_v42 = vld [vmem:[%s12050_s5 + $0xd0] sm:$0xff] }
 0x69a   :  { %v2049_v41 = vmul.f32 %v2048_v43, %v2048_v43  ;;  %v2069_v3 = vmul.f32 %v8489_v1, %v2048_v43  ;;  %v8518_v43 = vld [vmem:[%s12050_s5 + $0xd8] sm:$0xff]  ;;  %v8533_v1 = vld [vmem:[%s12051_s6 + $0xd0] sm:$0xff] }
 0x69b   :  { %v10111_v45 = vpack.c.bf16 %v8518_v43, %v8517_v42  ;;  %v10135_v4 = vpack.c.bf16 %v8534_v2, %v8533_v1  ;;  %v8572_v43 = vld [vmem:[%s12055_s10 + $0x4] ss:$0 sm:$0xff] }
 0x69c   :  { %v2050_v44 = vsel %vm72_vm0, %v2049_v41, 0.0  ;;  %v8521_v41 = vld [vmem:[%s12050_s5 + $0xf0] sm:$0xff] }
 0x69d   :  { %2051 = vadd.xlane.f32.xlu1 %v2050_v44  ;;  %v8522_v44 = vld [vmem:[%s12050_s5 + $0xf8] sm:$0xff] }
 0x69e   :  { %v10117_v0 = vpack.c.bf16 %v8522_v44, %v8521_v41  ;;  %v8573_v41 = vld [vmem:[%s12055_s10 + $0x5] ss:$0 sm:$0xff] }
 0x72a   :  { %v2052_v56 = vpop.xlane.xlu1 %2051 }
 0x72b   :  { %v2053_v57 = vmul.f32 0.032258064, %v2052_v56  ;;  %v8530_v56 = vld [vmem:[%s12051_s6 + $0xb8] sm:$0xff] }
 0x72d   :  { %10329 = vrsqrt.f32 %v2053_v57  ;;  %vm2056_vm5 = vcmp.eq.f32.partialorder %v2053_v57, inf  ;;  %v2059_v60 = vand.u32 2147483648, %v2053_v57  ;;  %vm2058_vm6 = vcmp.eq.f32.partialorder %v2053_v57, 0.0 }
 0x737   :  { %v10330_v58 = vpop.eup %10329 }
 0x738   :  { %v2055_v59 = vmul.f32 %v10330_v58, %v2053_v57  ;;  %v8531_v58 = vld [vmem:[%s12051_s6 + $0xc0] sm:$0xff] }
 0x73a   :  { %v2057_v61 = vsel %vm2056_vm5, %v2053_v57, %v2055_v59  ;;  %v10129_v57 = vpack.c.bf16 %v8530_v56, %v8529_v54  ;;  %v8532_v59 = vld [vmem:[%s12051_s6 + $0xc8] sm:$0xff] }
 0x73b   :  { %v2060_v62 = vsel %vm2058_vm6, %v2059_v60, %v2057_v61  ;;  %v10132_v60 = vpack.c.bf16 %v8532_v59, %v8531_v58  ;;  %v8535_v61 = vld [vmem:[%s12051_s6 + $0xe0] sm:$0xff] }
 0x73c   :  { %v2061_v63 = vadd.f32 1e-06, %v2060_v62  ;;  %v8536_v62 = vld [vmem:[%s12051_s6 + $0xe8] sm:$0xff] }
 0x73e   :  { %10331 = vrcp.f32 %v2061_v63  ;;  %v10138_v63 = vpack.c.bf16 %v8536_v62, %v8535_v61 }
 0x748   :  { %v10332_v7 = vpop.eup %10331 }
 0x749   :  { %v2070_v9 = vmul.f32 %v10332_v7, %v2069_v3  ;;  %v8537_v3 = vld [vmem:[%s12051_s6 + $0xf0] sm:$0xff] }
 0x74a   :  { %v10141_v6 = vpack.c.bf16 %v8538_v5, %v8537_v3 }
 0x74b   :  { %v2077_v14 = vadd.f32 %v8490_v8, %v2070_v9 }
 0x74d   :  { %9396 = vmatmul.mubr.msk.f32.vlgmr.msra.gmra.mrb[24].mxu0 %vm72_vm0, %v2077_v14  ;;  %9407 = vmatmul.mubr.msk.f32.vlgmr.msra.gmra.mrb[24].mxu1 %vm72_vm0, %v2077_v14 }
 0x74e   :  { %10085 = vmatpush3.bf16.msra.mxu0 %v10084_v10  ;;  %10091 = vmatpush3.bf16.msra.mxu1 %v10090_v11 }
 0x74f   :  { %10086 = vmatprep.subr.bf16.mxu0 %v10428_v12  ;;  %10092 = vmatprep.subr.bf16.mxu1 %v10428_v12 }
 0x750   :  { %9417 = vmatprep.mubr.msk.f32.mxu0 %vm10429_vm1, %v10430_v20  ;;  %9428 = vmatprep.mubr.msk.f32.mxu1 %vm10429_vm1, %v10430_v20 }
 0x752   :  { %10088 = vmatpush3.bf16.msra.mxu0 %v10087_v18  ;;  %10094 = vmatpush3.bf16.msra.mxu1 %v10093_v19 }
 0x753   :  { %10095 = vmatprep.subr.bf16.mxu0 %v10428_v12  ;;  %10101 = vmatprep.subr.bf16.mxu1 %v10428_v12 }
 0x755   :  { %9418 = vmatmul.mubr.msk.f32.vlgmr.msra.gmra.mrb[26].mxu0 %vm72_vm0, %v2077_v14  ;;  %9429 = vmatmul.mubr.msk.f32.vlgmr.msra.gmra.mrb[26].mxu1 %vm72_vm0, %v2077_v14 }
 0x756   :  { %10097 = vmatpush3.bf16.msra.mxu0 %v10096_v25  ;;  %10103 = vmatpush3.bf16.msra.mxu1 %v10102_v26 }
 0x757   :  { %10098 = vmatprep.subr.bf16.mxu0 %v10428_v12  ;;  %10104 = vmatprep.subr.bf16.mxu1 %v10428_v12 }
 0x758   :  { %9439 = vmatprep.mubr.msk.f32.mxu0 %vm10429_vm1, %v10430_v20  ;;  %9450 = vmatprep.mubr.msk.f32.mxu1 %vm10429_vm1, %v10430_v20 }
 0x75a   :  { %10100 = vmatpush3.bf16.msra.mxu0 %v10099_v31  ;;  %10106 = vmatpush3.bf16.msra.mxu1 %v10105_v32 }
 0x75b   :  { %10107 = vmatprep.subr.bf16.mxu0 %v10428_v12  ;;  %10113 = vmatprep.subr.bf16.mxu1 %v10428_v12 }
 0x75d   :  { %9440 = vmatmul.mubr.msk.f32.vlgmr.msra.gmra.mrb[28].mxu0 %vm72_vm0, %v11018_v37  ;;  %9451 = vmatmul.mubr.msk.f32.vlgmr.msra.gmra.mrb[28].mxu1 %vm72_vm0, %v11018_v37 }
 0x75e   :  { %10109 = vmatpush3.bf16.msra.mxu0 %v10108_v39  ;;  %10115 = vmatpush3.bf16.msra.mxu1 %v10114_v40 }
 0x75f   :  { %10110 = vmatprep.subr.bf16.mxu0 %v10428_v12  ;;  %10116 = vmatprep.subr.bf16.mxu1 %v10428_v12 }
 0x760   :  { %9461 = vmatprep.mubr.msk.f32.mxu0 %vm10429_vm1, %v10430_v20  ;;  %9472 = vmatprep.mubr.msk.f32.mxu1 %vm10429_vm1, %v10430_v20 }
 0x762   :  { %10112 = vmatpush3.bf16.msra.mxu0 %v10111_v45  ;;  %10118 = vmatpush3.bf16.msra.mxu1 %v10117_v0 }
 0x763   :  { %10119 = vmatprep.subr.bf16.mxu0 %v10428_v12  ;;  %10125 = vmatprep.subr.bf16.mxu1 %v10428_v12 }
 0x765   :  { %9462 = vmatmul.mubr.msk.f32.vlgmr.msra.gmra.mrb[30].mxu0 %vm72_vm0, %v11018_v37  ;;  %9473 = vmatmul.mubr.msk.f32.vlgmr.msra.gmra.mrb[30].mxu1 %vm72_vm0, %v11018_v37 }
 0x766   :  { %10121 = vmatpush3.bf16.msra.mxu0 %v10120_v50  ;;  %10127 = vmatpush3.bf16.msra.mxu1 %v10126_v51 }
 0x767   :  { %10122 = vmatprep.subr.bf16.mxu0 %v10428_v12  ;;  %10128 = vmatprep.subr.bf16.mxu1 %v10428_v12 }
 0x768   :  { %9483 = vmatprep.mubr.msk.f32.mxu0 %vm10429_vm1, %v10430_v20  ;;  %9494 = vmatprep.mubr.msk.f32.mxu1 %vm10429_vm1, %v10430_v20 }
 0x76a   :  { %10124 = vmatpush3.bf16.msra.mxu0 %v10123_v55  ;;  %10130 = vmatpush3.bf16.msra.mxu1 %v10129_v57  ;;  %v69_v55 = vld [vmem:[%s12079_s22] sm:$0xff] }
 0x76b   :  { %10131 = vmatprep.subr.bf16.mxu0 %v10428_v12  ;;  %10137 = vmatprep.subr.bf16.mxu1 %v10428_v12 }
 0x76d   :  { %9484 = vmatmul.mubr.msk.f32.vlgmr.msra.gmra.mrb[32].mxu0 %vm72_vm0, %v11018_v37  ;;  %9495 = vmatmul.mubr.msk.f32.vlgmr.msra.gmra.mrb[32].mxu1 %vm72_vm0, %v11018_v37 }
 0x76e   :  { %10133 = vmatpush3.bf16.msra.mxu0 %v10132_v60  ;;  %10139 = vmatpush3.bf16.msra.mxu1 %v10138_v63 }
 0x76f   :  { %10134 = vmatprep.subr.bf16.mxu0 %v10428_v12  ;;  %10140 = vmatprep.subr.bf16.mxu1 %v10428_v12 }
 0x770   :  { %9505 = vmatprep.mubr.msk.f32.mxu0 %vm10429_vm1, %v10430_v20  ;;  %9516 = vmatprep.mubr.msk.f32.mxu1 %vm10429_vm1, %v10430_v20 }
 0x772   :  { %10136 = vmatpush3.bf16.msra.mxu0 %v10135_v4  ;;  %10142 = vmatpush3.bf16.msra.mxu1 %v10141_v6 }
 0x773   :  { %9519 = vmatprep.subr.mxu0 %v10430_v20  ;;  %9524 = vmatprep.subr.mxu1 %v10430_v20 }
 0x775   :  { %9506 = vmatmul.mubr.msk.f32.vlgmr.msra.gmra.mrb[34].mxu0 %vm72_vm0, %v11018_v37  ;;  %9517 = vmatmul.mubr.msk.f32.vlgmr.msra.gmra.mrb[34].mxu1 %vm72_vm0, %v11018_v37 }
 0x776   :  { %9521 = vmatprep.mubr.msk.f32.mxu0 %vm10429_vm1, %v10430_v20  ;;  %9526 = vmatprep.mubr.msk.f32.mxu1 %vm10429_vm1, %v10430_v20 }
 0x820   :  { %v2244_v7 = vpop.f32.mrb[24].mxu0  ;;  %v2314_v8 = vpop.f32.mrb[24].mxu1 }
 0x821   :  { %v9397_v9 = vpop.f32.mrb[25].mxu0  ;;  %v9408_v10 = vpop.f32.mrb[25].mxu1  ;;  %v2245_v27 = vadd.f32 %v8556_v21, %v2244_v7  ;;  %v2315_v28 = vadd.f32 %v8557_v22, %v2314_v8 }
 0x828   :  { %v2384_v11 = vpop.f32.mrb[26].mxu0  ;;  %v2454_v13 = vpop.f32.mrb[26].mxu1 }
 0x829   :  { %v9419_v14 = vpop.f32.mrb[27].mxu0  ;;  %v9430_v15 = vpop.f32.mrb[27].mxu1  ;;  %v2385_v40 = vadd.f32 %v8558_v33, %v2384_v11  ;;  %v2455_v42 = vadd.f32 %v8559_v34, %v2454_v13 }
 0x830   :  { %v2551_v18 = vpop.f32.mrb[28].mxu0  ;;  %v2621_v19 = vpop.f32.mrb[28].mxu1 }
 0x831   :  { %v2552_v23 = vadd.f32 %v8564_v16, %v2551_v18  ;;  %v2622_v24 = vadd.f32 %v8565_v17, %v2621_v19  ;;  %v9441_v25 = vpop.f32.mrb[29].mxu0  ;;  %v9452_v26 = vpop.f32.mrb[29].mxu1 }
 0x833   :  { %9520 = vmatpush3.xpose.msk.msra.mxu0 %vm1088_vm4, %v2552_v23  ;;  %9525 = vmatpush3.xpose.msk.msra.mxu1 %vm1088_vm4, %v2622_v24 }
 0x834   :  { %9529 = vmatprep.subr.mxu0 %v10430_v20  ;;  %9534 = vmatprep.subr.mxu1 %v10430_v20 }
 0x836   :  { %9522 = vmatmul.mubr.msk.f32.vlgmr.msra.gmra.mrb[36].mxu0 %vm1088_vm4, %v2245_v27  ;;  %9527 = vmatmul.mubr.msk.f32.vlgmr.msra.gmra.mrb[36].mxu1 %vm1088_vm4, %v2315_v28 }
 0x837   :  { %9531 = vmatprep.mubr.msk.f32.mxu0 %vm10429_vm1, %v10430_v20  ;;  %9536 = vmatprep.mubr.msk.f32.mxu1 %vm10429_vm1, %v10430_v20 }
 0x838   :  { %v2691_v31 = vpop.f32.mrb[30].mxu0  ;;  %v2761_v32 = vpop.f32.mrb[30].mxu1 }
 0x839   :  { %v2692_v35 = vadd.f32 %v8566_v29, %v2691_v31  ;;  %v2762_v36 = vadd.f32 %v8567_v30, %v2761_v32  ;;  %v9463_v37 = vpop.f32.mrb[31].mxu0  ;;  %v9474_v39 = vpop.f32.mrb[31].mxu1 }
 0x83a   :  { %v8575_v37 = vld [vmem:[%s12055_s10 + $0x7] ss:$0 sm:$0xff] }
 0x83b   :  { %9530 = vmatpush3.xpose.msk.msra.mxu0 %vm1088_vm4, %v2692_v35  ;;  %9535 = vmatpush3.xpose.msk.msra.mxu1 %vm1088_vm4, %v2762_v36 }
 0x83c   :  { %9539 = vmatprep.subr.mxu0 %v10430_v20  ;;  %9544 = vmatprep.subr.mxu1 %v10430_v20 }
 0x83e   :  { %9532 = vmatmul.mubr.msk.f32.vlgmr.msra.gmra.mrb[38].mxu0 %vm1088_vm4, %v2385_v40  ;;  %9537 = vmatmul.mubr.msk.f32.vlgmr.msra.gmra.mrb[38].mxu1 %vm1088_vm4, %v2455_v42  ;;  %v8574_v40 = vld [vmem:[%s12055_s10 + $0x6] ss:$0 sm:$0xff] }
 0x83f   :  { %9541 = vmatprep.mubr.msk.f32.mxu0 %vm10429_vm1, %v10430_v20  ;;  %9546 = vmatprep.mubr.msk.f32.mxu1 %vm10429_vm1, %v10430_v20 }
 0x840   :  { %v2855_v44 = vpop.f32.mrb[32].mxu0  ;;  %v2925_v46 = vpop.f32.mrb[32].mxu1 }
 0x841   :  { %v2856_v45 = vadd.f32 %v8572_v43, %v2855_v44  ;;  %v9485_v0 = vpop.f32.mrb[33].mxu0  ;;  %v2926_v47 = vadd.f32 %v8573_v41, %v2925_v46  ;;  %v9496_v48 = vpop.f32.mrb[33].mxu1 }
 0x843   :  { %9540 = vmatpush3.msra.mxu0 %v2856_v45  ;;  %9545 = vmatpush3.msra.mxu1 %v2926_v47 }
 0x844   :  { %9549 = vmatprep.subr.mxu0 %v10430_v20  ;;  %9554 = vmatprep.subr.mxu1 %v10430_v20 }
 0x848   :  { %v11178_v49 = vpop.f32.mrb[34].mxu0  ;;  %v11180_v50 = vpop.f32.mrb[34].mxu1 }
 0x849   :  { %v9507_v51 = vpop.f32.mrb[35].mxu0  ;;  %v9518_v52 = vpop.f32.mrb[35].mxu1  ;;  %v3066_v41 = vadd.f32 %v8575_v37, %v11180_v50  ;;  %v2996_v45 = vadd.f32 %v8574_v40, %v11178_v49  ;;  %v8539_v49 = vld [vmem:[%s12052_s7 + $0x20] sm:$0xff]  ;;  %v8540_v50 = vld [vmem:[%s12052_s7 + $0x28] sm:$0xff] }
 0x84a   :  { %v8542_v51 = vld [vmem:[%s12052_s7 + $0x38] sm:$0xff]  ;;  %v4143_v40 = vld [vmem:[%s12059_s14] sm:$0xff] }
 0x909   :  { %v3141_v53 = vpop.f32.mrb[36].mxu0  ;;  %v3217_v54 = vpop.f32.mrb[36].mxu1 }
 0x90a   :  { %v3373_v56 = vmul.f32 0.35355338, %v3141_v53  ;;  %v3374_v57 = vmul.f32 0.35355338, %v3217_v54  ;;  %v9523_v58 = vpop.f32.mrb[37].mxu0  ;;  %v9528_v59 = vpop.f32.mrb[37].mxu1 }
 0x90b   :  { %v8541_v53 = vld [vmem:[%s12052_s7 + $0x30] sm:$0xff] }
 0x90c   :  { %v3378_v60 = vadd.f32 %v3374_v57, %v69_v55  ;;  %v3377_v61 = vadd.f32 %v3373_v56, %v69_v55 }
 0x90e   :  { %v3384_v62 = vsel %vm1088_vm4, %v3378_v60, -inf  ;;  %v3381_v63 = vsel %vm1088_vm4, %v3377_v61, -inf }
 0x90f   :  { %3385 = vmax.xlane.f32.xlu1 %v3384_v62  ;;  %3382 = vmax.xlane.f32.xlu0 %v3381_v63 }
 0x911   :  { %v3293_v1 = vpop.f32.mrb[38].mxu0  ;;  %v3369_v2 = vpop.f32.mrb[38].mxu1 }
 0x912   :  { %v3375_v3 = vmul.f32 0.35355338, %v3293_v1  ;;  %v3376_v4 = vmul.f32 0.35355338, %v3369_v2  ;;  %v9533_v5 = vpop.f32.mrb[39].mxu0  ;;  %v9538_v6 = vpop.f32.mrb[39].mxu1 }
 0x914   :  { %v3380_v7 = vadd.f32 %v3376_v4, %v69_v55  ;;  %v3379_v8 = vadd.f32 %v3375_v3, %v69_v55 }
 0x916   :  { %v3390_v9 = vsel %vm1088_vm4, %v3380_v7, -inf  ;;  %v3387_v10 = vsel %vm1088_vm4, %v3379_v8, -inf }
 0x917   :  { %3391 = vmax.xlane.f32.xlu1 %v3390_v9  ;;  %3388 = vmax.xlane.f32.xlu0 %v3387_v10 }
 0x99c   :  { %v3386_v11 = vpop.xlane.xlu1 %3385  ;;  %v3383_v13 = vpop.xlane.xlu0 %3382 }
 0x99d   :  { %v3394_v14 = vsub.f32 %v3378_v60, %v3386_v11  ;;  %v3393_v15 = vsub.f32 %v3377_v61, %v3383_v13 }
 0x99f   :  { %v3399_v16 = vmul.f32 1.442695, %v3394_v14  ;;  %v3397_v17 = vmul.f32 1.442695, %v3393_v15 }
 0x9a1   :  { %10333 = vpow2.f32 %v3399_v16 }
 0x9a2   :  { %10335 = vpow2.f32 %v3397_v17 }
 0x9a4   :  { %v3392_v18 = vpop.xlane.xlu1 %3391  ;;  %v3389_v19 = vpop.xlane.xlu0 %3388 }
 0x9a5   :  { %v3396_v21 = vsub.f32 %v3380_v7, %v3392_v18  ;;  %v3395_v22 = vsub.f32 %v3379_v8, %v3389_v19  ;;  %v8596_v8 = vld [vmem:[%s12056_s11 + $0x1] ss:$0 sm:$0xff] }
 0x9a6   :  { %v4058_v19 = vld [vmem:[%s12057_s12] sm:$0xff] }
 0x9a7   :  { %v3403_v23 = vmul.f32 1.442695, %v3396_v21  ;;  %v3401_v24 = vmul.f32 1.442695, %v3395_v22  ;;  %v4059_v21 = vld [vmem:[%s12057_s12 + $0x8] sm:$0xff] }
 0x9a8   :  { %v10144_v22 = vpack.c.bf16 %v4059_v21, %v4058_v19  ;;  %v8618_v19 = vld [vmem:[%s12076_s25 + $0x148] sm:$0xff]  ;;  %v8621_v21 = vld [vmem:[%s12076_s25 + $0x160] sm:$0xff] }
 0x9a9   :  { %10337 = vpow2.f32 %v3403_v23  ;;  %v4061_v23 = vld [vmem:[%s12057_s12 + $0x18] sm:$0xff] }
 0x9aa   :  { %10339 = vpow2.f32 %v3401_v24 }
 0x9ab   :  { %v10334_v25 = vpop.eup %10333 }
 0x9ac   :  { %v10336_v26 = vpop.eup %10335  ;;  %v3408_v27 = vsel %vm1088_vm4, %v10334_v25, 0.0 }
 0x9ad   :  { %3409 = vadd.xlane.f32.xlu1 %v3408_v27  ;;  %v3405_v28 = vsel %vm1088_vm4, %v10336_v26, 0.0 }
 0x9ae   :  { %3406 = vadd.xlane.f32.xlu0 %v3405_v28 }
 0x9b3   :  { %v10338_v29 = vpop.eup %10337 }
 0x9b4   :  { %v10340_v30 = vpop.eup %10339  ;;  %v3414_v31 = vsel %vm1088_vm4, %v10338_v29, 0.0 }
 0x9b5   :  { %3415 = vadd.xlane.f32.xlu1 %v3414_v31  ;;  %v3411_v32 = vsel %vm1088_vm4, %v10340_v30, 0.0 }
 0x9b6   :  { %3412 = vadd.xlane.f32.xlu0 %v3411_v32 }
 0xa3a   :  { %v3410_v33 = vpop.xlane.xlu1 %3409 }
 0xa3b   :  { %10341 = vrcp.f32 %v3410_v33  ;;  %v3407_v34 = vpop.xlane.xlu0 %3406  ;;  %v8599_v33 = vld [vmem:[%s12061_s16 + $0x2] ss:$0 sm:$0xff] }
 0xa3c   :  { %10343 = vrcp.f32 %v3407_v34 }
 0xa42   :  { %v3416_v35 = vpop.xlane.xlu1 %3415 }
 0xa43   :  { %10345 = vrcp.f32 %v3416_v35  ;;  %v3413_v36 = vpop.xlane.xlu0 %3412 }
 0xa44   :  { %10347 = vrcp.f32 %v3413_v36  ;;  %v8600_v36 = vld [vmem:[%s12062_s17 + $0x2] ss:$0 sm:$0xff] }
 0xa45   :  { %v10342_v39 = vpop.eup %10341 }
 0xa46   :  { %v10344_v42 = vpop.eup %10343  ;;  %v3422_v43 = vmul.f32 %v10342_v39, %v10334_v25 }
 0xa47   :  { %v3421_v44 = vmul.f32 %v10344_v42, %v10336_v26  ;;  %v4144_v42 = vld [vmem:[%s12059_s14 + $0x8] sm:$0xff] }
 0xa48   :  { %9547 = vmatmul.mubr.msk.f32.vlgmr.msra.gmra.mrb[40].mxu1 %vm1088_vm4, %v3422_v43  ;;  %v10150_v43 = vpack.c.bf16 %v4144_v42, %v4143_v40  ;;  %v8627_v42 = vld [vmem:[%s12050_s5 + $0x110] sm:$0xff] }
 0xa49   :  { %9542 = vmatmul.mubr.msk.f32.vlgmr.msra.gmra.mrb[40].mxu0 %vm1088_vm4, %v3421_v44  ;;  %9555 = vmatpush3.msra.mxu1 %v3066_v41  ;;  %v8601_v41 = vld [vmem:[%s12058_s13] ss:$0 sm:$0xff] }
 0xa4a   :  { %9550 = vmatpush3.msra.mxu0 %v2996_v45  ;;  %9551 = vmatprep.mubr.msk.f32.mxu0 %vm10429_vm1, %v10430_v20 }
 0xa4b   :  { %9556 = vmatprep.mubr.msk.f32.mxu1 %vm10429_vm1, %v10430_v20  ;;  %9559 = vmatprep.subr.mxu0 %v10430_v20 }
 0xa4c   :  { %9564 = vmatprep.subr.mxu1 %v10430_v20 }
 0xa4d   :  { %v10346_v0 = vpop.eup %10345 }
 0xa4e   :  { %v10348_v46 = vpop.eup %10347  ;;  %v3424_v47 = vmul.f32 %v10346_v0, %v10338_v29 }
 0xa4f   :  { %v3423_v48 = vmul.f32 %v10348_v46, %v10340_v30 }
 0xa50   :  { %9557 = vmatmul.mubr.msk.f32.vlgmr.msra.gmra.mrb[42].mxu1 %vm1088_vm4, %v3424_v47 }
 0xa51   :  { %9552 = vmatmul.mubr.msk.f32.vlgmr.msra.gmra.mrb[42].mxu0 %vm1088_vm4, %v3423_v48  ;;  %9566 = vmatprep.mubr.msk.f32.mxu1 %vm10429_vm1, %v10430_v20  ;;  %v8604_v48 = vld [vmem:[%s12060_s15] ss:$0 sm:$0xff] }
 0xa52   :  { %9561 = vmatprep.mubr.msk.f32.mxu0 %vm10429_vm1, %v10430_v20  ;;  %9560 = vmatpush3.msra.mxu0 %v8539_v49 }
 0xa53   :  { %9565 = vmatpush3.msra.mxu1 %v8540_v50  ;;  %9569 = vmatprep.subr.mxu0 %v10430_v20 }
 0xa54   :  { %9574 = vmatprep.subr.mxu1 %v10430_v20 }
 0xb1b   :  { %v3567_v52 = vpop.f32.mrb[40].mxu1 }
 0xb1c   :  { %v3494_v54 = vpop.f32.mrb[40].mxu0  ;;  %v9548_v55 = vpop.f32.mrb[41].mxu1  ;;  %9567 = vmatmul.mubr.msk.f32.vlgmr.msra.gmra.mrb[44].mxu1 %vm1088_vm4, %v3567_v52 }
 0xb1d   :  { %v9543_v56 = vpop.f32.mrb[41].mxu0  ;;  %9562 = vmatmul.mubr.msk.f32.vlgmr.msra.gmra.mrb[44].mxu0 %vm1088_vm4, %v3494_v54  ;;  %9575 = vmatpush3.msra.mxu1 %v8542_v51 }
 0xb1e   :  { %9570 = vmatpush3.msra.mxu0 %v8541_v53  ;;  %9571 = vmatprep.mubr.msk.f32.mxu0 %vm10429_vm1, %v10430_v20 }
 0xb1f   :  { %9576 = vmatprep.mubr.msk.f32.mxu1 %vm10429_vm1, %v10430_v20  ;;  %10143 = vmatprep.subr.bf16.mxu0 %v10428_v12 }
 0xb20   :  { %10149 = vmatprep.subr.bf16.mxu1 %v10428_v12 }
 0xb23   :  { %v3713_v57 = vpop.f32.mrb[42].mxu1 }
 0xb24   :  { %v3640_v58 = vpop.f32.mrb[42].mxu0  ;;  %v9558_v59 = vpop.f32.mrb[43].mxu1  ;;  %9577 = vmatmul.mubr.msk.f32.vlgmr.msra.gmra.mrb[46].mxu1 %vm1088_vm4, %v3713_v57 }
 0xb25   :  { %v9553_v60 = vpop.f32.mrb[43].mxu0  ;;  %9572 = vmatmul.mubr.msk.f32.vlgmr.msra.gmra.mrb[46].mxu0 %vm1088_vm4, %v3640_v58  ;;  %9594 = vmatprep.mubr.msk.f32.mxu1 %vm10429_vm1, %v10430_v20  ;;  %v8609_v58 = vld [vmem:[%s12076_s25 + $0x100] sm:$0xff]  ;;  %v8610_v59 = vld [vmem:[%s12076_s25 + $0x108] sm:$0xff] }
 0xb26   :  { %9587 = vmatprep.mubr.msk.f32.mxu0 %vm10429_vm1, %v10430_v20  ;;  %10145 = vmatpush3.bf16.msra.mxu0 %v10144_v22  ;;  %v8613_v60 = vld [vmem:[%s12076_s25 + $0x120] sm:$0xff] }
 0xb27   :  { %10146 = vmatprep.subr.bf16.mxu0 %v10428_v12  ;;  %10151 = vmatpush3.bf16.msra.mxu1 %v10150_v43  ;;  %v8628_v43 = vld [vmem:[%s12050_s5 + $0x118] sm:$0xff] }
 0xb28   :  { %10152 = vmatprep.subr.bf16.mxu1 %v10428_v12 }
 0xbef   :  { %v3859_v61 = vpop.f32.mrb[44].mxu1 }
 0xbf0   :  { %v3786_v62 = vpop.f32.mrb[44].mxu0  ;;  %v9568_v63 = vpop.f32.mrb[45].mxu1 }
 0xbf1   :  { %v4009_v1 = vadd.f32 %v3859_v61, %v3786_v62  ;;  %v9563_v2 = vpop.f32.mrb[45].mxu0  ;;  %v10153_v61 = vpack.c.bf16 %v8610_v59, %v8609_v58  ;;  %v8614_v62 = vld [vmem:[%s12076_s25 + $0x128] sm:$0xff]  ;;  %v8641_v59 = vld [vmem:[%s12051_s6 + $0x100] sm:$0xff] }
 0xbf2   :  { %v10159_v63 = vpack.c.bf16 %v8614_v62, %v8613_v60  ;;  %v8612_v2 = vld [vmem:[%s12076_s25 + $0x118] sm:$0xff]  ;;  %v8642_v60 = vld [vmem:[%s12051_s6 + $0x108] sm:$0xff] }
 0xbf3   :  { %v8646_v62 = vld [vmem:[%s12051_s6 + $0x128] sm:$0xff] }
 0xbf7   :  { %v4005_v3 = vpop.f32.mrb[46].mxu1 }
 0xbf8   :  { %v3932_v4 = vpop.f32.mrb[46].mxu0  ;;  %v9578_v5 = vpop.f32.mrb[47].mxu1 }
 0xbf9   :  { %v4010_v6 = vadd.f32 %v4009_v1, %v3932_v4  ;;  %v9573_v7 = vpop.f32.mrb[47].mxu0  ;;  %v8611_v1 = vld [vmem:[%s12076_s25 + $0x110] sm:$0xff]  ;;  %v8616_v5 = vld [vmem:[%s12076_s25 + $0x138] sm:$0xff] }
 0xbfa   :  { %v10156_v4 = vpack.c.bf16 %v8612_v2, %v8611_v1  ;;  %v8643_v2 = vld [vmem:[%s12051_s6 + $0x110] sm:$0xff] }
 0xbfb   :  { %v4011_v9 = vadd.f32 %v4010_v6, %v4005_v3  ;;  %v8615_v3 = vld [vmem:[%s12076_s25 + $0x130] sm:$0xff] }
 0xbfc   :  { %v10162_v6 = vpack.c.bf16 %v8616_v5, %v8615_v3  ;;  %v8644_v3 = vld [vmem:[%s12051_s6 + $0x118] sm:$0xff] }
 0xbfd   :  { %v4018_v10 = vadd.f32 %v8596_v8, %v4011_v9  ;;  %v8648_v5 = vld [vmem:[%s12051_s6 + $0x138] sm:$0xff] }
 0xbff   :  { %v4019_v11 = vadd.f32 %v4018_v10, %v10897_v38  ;;  %v4060_v38 = vld [vmem:[%s12057_s12 + $0x10] sm:$0xff] }
 0xc00   :  { %v10147_v24 = vpack.c.bf16 %v4061_v23, %v4060_v38  ;;  %v8622_v38 = vld [vmem:[%s12076_s25 + $0x168] sm:$0xff]  ;;  %v8608_v23 = vld [vmem:[%s12062_s17 + $0x3] ss:$0 sm:$0xff] }
 0xc01   :  { %v4024_v13 = vsel %vm72_vm0, %v4019_v11, 0.0 }
 0xc02   :  { %4025 = vadd.xlane.f32.xlu0 %v4024_v13  ;;  %10148 = vmatpush3.bf16.msra.mxu0 %v10147_v24 }
 0xc03   :  { %10158 = vmatprep.subr.bf16.mxu0 %v10428_v12 }
 0xc8f   :  { %v4026_v14 = vpop.xlane.xlu0 %4025 }
 0xc90   :  { %v4027_v15 = vmul.f32 0.03125, %v4026_v14 }
 0xc92   :  { %v4028_v16 = vsub.f32 %v4019_v11, %v4027_v15 }
 0xc94   :  { %v4029_v17 = vmul.f32 %v4028_v16, %v4028_v16  ;;  %v4049_v34 = vmul.f32 %v8599_v33, %v4028_v16  ;;  %v8607_v16 = vld [vmem:[%s12061_s16 + $0x3] ss:$0 sm:$0xff] }
 0xc96   :  { %v4030_v18 = vsel %vm72_vm0, %v4029_v17, 0.0  ;;  %v8617_v17 = vld [vmem:[%s12076_s25 + $0x140] sm:$0xff] }
 0xc97   :  { %4031 = vadd.xlane.f32.xlu1 %v4030_v18 }
 0xd24   :  { %v4032_v25 = vpop.xlane.xlu1 %4031 }
 0xd25   :  { %v4033_v26 = vmul.f32 0.032258064, %v4032_v25  ;;  %v10165_v25 = vpack.c.bf16 %v8618_v19, %v8617_v17  ;;  %v8655_v17 = vld [vmem:[%s12051_s6 + $0x170] sm:$0xff] }
 0xd27   :  { %10349 = vrsqrt.f32 %v4033_v26  ;;  %vm4036_vm7 = vcmp.eq.f32.partialorder %v4033_v26, inf  ;;  %v4039_v29 = vand.u32 2147483648, %v4033_v26  ;;  %vm4038_vm8 = vcmp.eq.f32.partialorder %v4033_v26, 0.0 }
 0xd31   :  { %v10350_v27 = vpop.eup %10349 }
 0xd32   :  { %v4035_v28 = vmul.f32 %v10350_v27, %v4033_v26  ;;  %v8619_v27 = vld [vmem:[%s12076_s25 + $0x150] sm:$0xff] }
 0xd34   :  { %v4037_v30 = vsel %vm4036_vm7, %v4033_v26, %v4035_v28  ;;  %v10171_v26 = vpack.c.bf16 %v8622_v38, %v8621_v21 }
 0xd35   :  { %v4040_v31 = vsel %vm4038_vm8, %v4039_v29, %v4037_v30  ;;  %v8620_v29 = vld [vmem:[%s12076_s25 + $0x158] sm:$0xff]  ;;  %v8623_v30 = vld [vmem:[%s12076_s25 + $0x170] sm:$0xff] }
 0xd36   :  { %v4041_v32 = vadd.f32 1e-06, %v4040_v31  ;;  %v8624_v31 = vld [vmem:[%s12076_s25 + $0x178] sm:$0xff] }
 0xd37   :  { %v10174_v33 = vpack.c.bf16 %v8624_v31, %v8623_v30  ;;  %v8682_v30 = vld [vmem:[%s12054_s9 + $0x8] ss:$0 sm:$0xff] }
 0xd38   :  { %10351 = vrcp.f32 %v4041_v32  ;;  %v10168_v32 = vpack.c.bf16 %v8620_v29, %v8619_v27 }
 0xd42   :  { %v10352_v35 = vpop.eup %10351 }
 0xd43   :  { %v4050_v37 = vmul.f32 %v10352_v35, %v4049_v34  ;;  %v8625_v34 = vld [vmem:[%s12050_s5 + $0x100] sm:$0xff]  ;;  %v8626_v35 = vld [vmem:[%s12050_s5 + $0x108] sm:$0xff] }
 0xd45   :  { %v4057_v39 = vadd.f32 %v8600_v36, %v4050_v37  ;;  %v8629_v36 = vld [vmem:[%s12050_s5 + $0x120] sm:$0xff]  ;;  %v8630_v37 = vld [vmem:[%s12050_s5 + $0x128] sm:$0xff] }
 0xd46   :  { %v10183_v40 = vpack.c.bf16 %v8630_v37, %v8629_v36 }
 0xd47   :  { %9588 = vmatmul.mubr.msk.f32.vlgmr.msra.gmra.mrb[48].mxu0 %vm72_vm0, %v4057_v39  ;;  %v10177_v39 = vpack.c.bf16 %v8626_v35, %v8625_v34  ;;  %v8675_v34 = vld [vmem:[%s12053_s8 + $0x9] ss:$0 sm:$0xff] }
 0xd48   :  { %9616 = vmatprep.mubr.msk.f32.mxu0 %vm10429_vm1, %v10430_v20  ;;  %10160 = vmatpush3.bf16.msra.mxu0 %v10159_v63  ;;  %v10201_v63 = vpack.c.bf16 %v8642_v60, %v8641_v59 }
 0xd49   :  { %10161 = vmatprep.subr.bf16.mxu0 %v10428_v12 }
 0xd4c   :  { %10163 = vmatpush3.bf16.msra.mxu0 %v10162_v6  ;;  %v10204_v6 = vpack.c.bf16 %v8644_v3, %v8643_v2 }
 0xd4d   :  { %10170 = vmatprep.subr.bf16.mxu0 %v10428_v12 }
 0xe1a   :  { %v4138_v44 = vpop.f32.mrb[48].mxu0 }
 0xe1b   :  { %v4139_v45 = vadd.f32 %v8601_v41, %v4138_v44  ;;  %v9589_v0 = vpop.f32.mrb[49].mxu0  ;;  %v8631_v41 = vld [vmem:[%s12050_s5 + $0x130] sm:$0xff]  ;;  %v8632_v44 = vld [vmem:[%s12050_s5 + $0x138] sm:$0xff] }
 0xe1c   :  { %v10186_v0 = vpack.c.bf16 %v8632_v44, %v8631_v41  ;;  %v8685_v41 = vld [vmem:[%s12054_s9 + $0xb] ss:$0 sm:$0xff] }
 0xe1d   :  { %v4142_v46 = vmax.f32 %v4139_v45, 0.0  ;;  %v10180_v45 = vpack.c.bf16 %v8628_v43, %v8627_v42  ;;  %v8684_v43 = vld [vmem:[%s12054_s9 + $0xa] ss:$0 sm:$0xff] }
 0xe1f   :  { %9595 = vmatmul.mubr.msk.f32.vlgmr.msra.gmra.mrb[48].mxu1 %vm4145_vm9, %v4142_v46  ;;  %v8633_v46 = vld [vmem:[%s12050_s5 + $0x140] sm:$0xff] }
 0xe20   :  { %9605 = vmatprep.mubr.msk.f32.mxu1 %vm10429_vm1, %v10430_v20  ;;  %10154 = vmatpush3.bf16.msra.mxu1 %v10153_v61  ;;  %v8645_v61 = vld [vmem:[%s12051_s6 + $0x120] sm:$0xff] }
 0xe21   :  { %10155 = vmatprep.subr.bf16.mxu1 %v10428_v12  ;;  %v10207_v1 = vpack.c.bf16 %v8646_v62, %v8645_v61 }
 0xe24   :  { %10157 = vmatpush3.bf16.msra.mxu1 %v10156_v4  ;;  %v8647_v4 = vld [vmem:[%s12051_s6 + $0x130] sm:$0xff] }
 0xe25   :  { %10164 = vmatprep.subr.bf16.mxu1 %v10428_v12 }
 0xef2   :  { %v4215_v47 = vpop.f32.mrb[48].mxu1 }
 0xef3   :  { %v4219_v49 = vadd.f32 %v4215_v47, %v4019_v11  ;;  %v9596_v50 = vpop.f32.mrb[49].mxu1  ;;  %v8634_v47 = vld [vmem:[%s12050_s5 + $0x148] sm:$0xff] }
 0xef4   :  { %v10189_v50 = vpack.c.bf16 %v8634_v47, %v8633_v46  ;;  %v8677_v46 = vld [vmem:[%s12053_s8 + $0xb] ss:$0 sm:$0xff] }
 0xef5   :  { %v11288_v51 = vadd.f32 %v8604_v48, %v4219_v49  ;;  %v8637_v48 = vld [vmem:[%s12050_s5 + $0x160] sm:$0xff]  ;;  %v8638_v49 = vld [vmem:[%s12050_s5 + $0x168] sm:$0xff] }
 0xef7   :  { %v4232_v52 = vsel %vm72_vm0, %v11288_v51, 0.0 }
 0xef8   :  { %4233 = vadd.xlane.f32.xlu0 %v4232_v52  ;;  %v10195_v52 = vpack.c.bf16 %v8638_v49, %v8637_v48 }
 0xf85   :  { %v4234_v53 = vpop.xlane.xlu0 %4233 }
 0xf86   :  { %v4235_v54 = vmul.f32 0.03125, %v4234_v53  ;;  %v8635_v53 = vld [vmem:[%s12050_s5 + $0x150] sm:$0xff] }
 0xf88   :  { %v4236_v55 = vsub.f32 %v11288_v51, %v4235_v54  ;;  %v8636_v54 = vld [vmem:[%s12050_s5 + $0x158] sm:$0xff] }
 0xf8a   :  { %v4237_v56 = vmul.f32 %v4236_v55, %v4236_v55  ;;  %v4257_v18 = vmul.f32 %v8607_v16, %v4236_v55  ;;  %v8639_v55 = vld [vmem:[%s12050_s5 + $0x170] sm:$0xff]  ;;  %v8652_v16 = vld [vmem:[%s12051_s6 + $0x158] sm:$0xff] }
 0xf8c   :  { %v4238_v57 = vsel %vm72_vm0, %v4237_v56, 0.0  ;;  %v8640_v56 = vld [vmem:[%s12050_s5 + $0x178] sm:$0xff] }
 0xf8d   :  { %4239 = vadd.xlane.f32.xlu1 %v4238_v57  ;;  %v10192_v57 = vpack.c.bf16 %v8636_v54, %v8635_v53  ;;  %v10198_v58 = vpack.c.bf16 %v8640_v56, %v8639_v55  ;;  %v8690_v54 = vld [vmem:[%s12055_s10 + $0x8] ss:$0 sm:$0xff]  ;;  %v8691_v55 = vld [vmem:[%s12055_s10 + $0x9] ss:$0 sm:$0xff] }
0x101a   :  { %v4240_v7 = vpop.xlane.xlu1 %4239 }
0x101b   :  { %v4241_v8 = vmul.f32 0.032258064, %v4240_v7  ;;  %v10210_v7 = vpack.c.bf16 %v8648_v5, %v8647_v4 }
0x101d   :  { %10353 = vrsqrt.f32 %v4241_v8  ;;  %vm4244_vm10 = vcmp.eq.f32.partialorder %v4241_v8, inf  ;;  %v4247_v11 = vand.u32 2147483648, %v4241_v8  ;;  %vm4246_vm11 = vcmp.eq.f32.partialorder %v4241_v8, 0.0 }
0x1027   :  { %v10354_v9 = vpop.eup %10353 }
0x1028   :  { %v4243_v10 = vmul.f32 %v10354_v9, %v4241_v8  ;;  %v8650_v9 = vld [vmem:[%s12051_s6 + $0x148] sm:$0xff] }
0x102a   :  { %v4245_v13 = vsel %vm4244_vm10, %v4241_v8, %v4243_v10  ;;  %v8649_v8 = vld [vmem:[%s12051_s6 + $0x140] sm:$0xff] }
0x102b   :  { %v4248_v14 = vsel %vm4246_vm11, %v4247_v11, %v4245_v13  ;;  %v8653_v10 = vld [vmem:[%s12051_s6 + $0x160] sm:$0xff]  ;;  %v8654_v11 = vld [vmem:[%s12051_s6 + $0x168] sm:$0xff]  ;;  %v10213_v13 = vpack.c.bf16 %v8650_v9, %v8649_v8 }
0x102c   :  { %v4249_v15 = vadd.f32 1e-06, %v4248_v14  ;;  %v10219_v14 = vpack.c.bf16 %v8654_v11, %v8653_v10  ;;  %v10401_v9 = vld [vmem:[%s12077_s21] sm:$0xff] }
0x102e   :  { %10355 = vrcp.f32 %v4249_v15  ;;  %v8651_v15 = vld [vmem:[%s12051_s6 + $0x150] sm:$0xff] }
0x102f   :  { %v10216_v19 = vpack.c.bf16 %v8652_v16, %v8651_v15 }
0x1038   :  { %v10356_v22 = vpop.eup %10355 }
0x1039   :  { %v4258_v24 = vmul.f32 %v10356_v22, %v4257_v18  ;;  %v8656_v18 = vld [vmem:[%s12051_s6 + $0x178] sm:$0xff] }
0x103a   :  { %v10222_v21 = vpack.c.bf16 %v8656_v18, %v8655_v17 }
0x103b   :  { %v11343_v28 = vadd.f32 %v8608_v23, %v4258_v24 }
0x103d   :  { %9606 = vmatmul.mubr.msk.f32.vlgmr.msra.gmra.mrb[50].mxu1 %vm72_vm0, %v11343_v28  ;;  %9617 = vmatmul.mubr.msk.f32.vlgmr.msra.gmra.mrb[50].mxu0 %vm72_vm0, %v11343_v28 }
0x103e   :  { %10166 = vmatpush3.bf16.msra.mxu1 %v10165_v25  ;;  %10172 = vmatpush3.bf16.msra.mxu0 %v10171_v26 }
0x103f   :  { %10167 = vmatprep.subr.bf16.mxu1 %v10428_v12  ;;  %10173 = vmatprep.subr.bf16.mxu0 %v10428_v12 }
0x1040   :  { %9627 = vmatprep.mubr.msk.f32.mxu1 %vm10429_vm1, %v10430_v20  ;;  %9638 = vmatprep.mubr.msk.f32.mxu0 %vm10429_vm1, %v10430_v20 }
0x1042   :  { %10169 = vmatpush3.bf16.msra.mxu1 %v10168_v32  ;;  %10175 = vmatpush3.bf16.msra.mxu0 %v10174_v33  ;;  %v8674_v33 = vld [vmem:[%s12053_s8 + $0x8] ss:$0 sm:$0xff] }
0x1043   :  { %10176 = vmatprep.subr.bf16.mxu1 %v10428_v12  ;;  %10182 = vmatprep.subr.bf16.mxu0 %v10428_v12 }
0x1045   :  { %9628 = vmatmul.mubr.msk.f32.vlgmr.msra.gmra.mrb[52].mxu1 %vm72_vm0, %v11343_v28  ;;  %9639 = vmatmul.mubr.msk.f32.vlgmr.msra.gmra.mrb[52].mxu0 %vm72_vm0, %v11343_v28 }
0x1046   :  { %10178 = vmatpush3.bf16.msra.mxu1 %v10177_v39  ;;  %10184 = vmatpush3.bf16.msra.mxu0 %v10183_v40 }
0x1047   :  { %10179 = vmatprep.subr.bf16.mxu1 %v10428_v12  ;;  %10185 = vmatprep.subr.bf16.mxu0 %v10428_v12 }
0x1048   :  { %9649 = vmatprep.mubr.msk.f32.mxu1 %vm10429_vm1, %v10430_v20  ;;  %9660 = vmatprep.mubr.msk.f32.mxu0 %vm10429_vm1, %v10430_v20 }
0x104a   :  { %10181 = vmatpush3.bf16.msra.mxu1 %v10180_v45  ;;  %10187 = vmatpush3.bf16.msra.mxu0 %v10186_v0  ;;  %v8676_v0 = vld [vmem:[%s12053_s8 + $0xa] ss:$0 sm:$0xff] }
0x104b   :  { %10188 = vmatprep.subr.bf16.mxu1 %v10428_v12  ;;  %10194 = vmatprep.subr.bf16.mxu0 %v10428_v12 }
0x104d   :  { %9650 = vmatmul.mubr.msk.f32.vlgmr.msra.gmra.mrb[54].mxu1 %vm72_vm0, %v11343_v28  ;;  %9661 = vmatmul.mubr.msk.f32.vlgmr.msra.gmra.mrb[54].mxu0 %vm72_vm0, %v11343_v28 }
0x104e   :  { %10190 = vmatpush3.bf16.msra.mxu1 %v10189_v50  ;;  %10196 = vmatpush3.bf16.msra.mxu0 %v10195_v52 }
0x104f   :  { %10191 = vmatprep.subr.bf16.mxu1 %v10428_v12  ;;  %10197 = vmatprep.subr.bf16.mxu0 %v10428_v12 }
0x1050   :  { %9671 = vmatprep.mubr.msk.f32.mxu1 %vm10429_vm1, %v10430_v20  ;;  %9682 = vmatprep.mubr.msk.f32.mxu0 %vm10429_vm1, %v10430_v20 }
0x1052   :  { %10193 = vmatpush3.bf16.msra.mxu1 %v10192_v57  ;;  %10199 = vmatpush3.bf16.msra.mxu0 %v10198_v58 }
0x1053   :  { %10200 = vmatprep.subr.bf16.mxu1 %v10428_v12  ;;  %10206 = vmatprep.subr.bf16.mxu0 %v10428_v12 }
0x1055   :  { %9672 = vmatmul.mubr.msk.f32.vlgmr.msra.gmra.mrb[56].mxu1 %vm72_vm0, %v11343_v28  ;;  %9683 = vmatmul.mubr.msk.f32.vlgmr.msra.gmra.mrb[56].mxu0 %vm72_vm0, %v11343_v28 }
0x1056   :  { %10202 = vmatpush3.bf16.msra.mxu1 %v10201_v63  ;;  %10208 = vmatpush3.bf16.msra.mxu0 %v10207_v1 }
0x1057   :  { %10203 = vmatprep.subr.bf16.mxu1 %v10428_v12  ;;  %10209 = vmatprep.subr.bf16.mxu0 %v10428_v12 }
0x1058   :  { %9693 = vmatprep.mubr.msk.f32.mxu1 %vm10429_vm1, %v10430_v20  ;;  %9704 = vmatprep.mubr.msk.f32.mxu0 %vm10429_vm1, %v10430_v20 }
0x105a   :  { %10205 = vmatpush3.bf16.msra.mxu1 %v10204_v6  ;;  %10211 = vmatpush3.bf16.msra.mxu0 %v10210_v7 }
0x105b   :  { %10212 = vmatprep.subr.bf16.mxu1 %v10428_v12  ;;  %10218 = vmatprep.subr.bf16.mxu0 %v10428_v12 }
0x105d   :  { %9694 = vmatmul.mubr.msk.f32.vlgmr.msra.gmra.mrb[58].mxu1 %vm72_vm0, %v11343_v28  ;;  %9705 = vmatmul.mubr.msk.f32.vlgmr.msra.gmra.mrb[58].mxu0 %vm72_vm0, %v11343_v28 }
0x105e   :  { %10214 = vmatpush3.bf16.msra.mxu1 %v10213_v13  ;;  %10220 = vmatpush3.bf16.msra.mxu0 %v10219_v14 }
0x105f   :  { %10215 = vmatprep.subr.bf16.mxu1 %v10428_v12  ;;  %10221 = vmatprep.subr.bf16.mxu0 %v10428_v12 }
0x1060   :  { %9715 = vmatprep.mubr.msk.f32.mxu1 %vm10429_vm1, %v10430_v20  ;;  %9726 = vmatprep.mubr.msk.f32.mxu0 %vm10429_vm1, %v10430_v20 }
0x1062   :  { %10217 = vmatpush3.bf16.msra.mxu1 %v10216_v19  ;;  %10223 = vmatpush3.bf16.msra.mxu0 %v10222_v21 }
0x1063   :  { %9729 = vmatprep.subr.mxu1 %v10430_v20  ;;  %9734 = vmatprep.subr.mxu0 %v10430_v20 }
0x1065   :  { %9716 = vmatmul.mubr.msk.f32.vlgmr.msra.gmra.mrb[60].mxu1 %vm72_vm0, %v11343_v28  ;;  %9727 = vmatmul.mubr.msk.f32.vlgmr.msra.gmra.mrb[60].mxu0 %vm72_vm0, %v11343_v28  ;;  %v8683_v28 = vld [vmem:[%s12054_s9 + $0x9] ss:$0 sm:$0xff] }
0x1066   :  { %9731 = vmatprep.mubr.msk.f32.mxu1 %vm10429_vm1, %v10430_v20  ;;  %9736 = vmatprep.mubr.msk.f32.mxu0 %vm10429_vm1, %v10430_v20 }
0x1110   :  { %v4432_v38 = vpop.f32.mrb[50].mxu1  ;;  %v4502_v22 = vpop.f32.mrb[50].mxu0 }
0x1111   :  { %v9607_v23 = vpop.f32.mrb[51].mxu1  ;;  %v9618_v24 = vpop.f32.mrb[51].mxu0  ;;  %v4433_v40 = vadd.f32 %v8674_v33, %v4432_v38  ;;  %v4503_v42 = vadd.f32 %v8675_v34, %v4502_v22 }
0x1118   :  { %v4572_v25 = vpop.f32.mrb[52].mxu1  ;;  %v4642_v26 = vpop.f32.mrb[52].mxu0 }
0x1119   :  { %v9629_v27 = vpop.f32.mrb[53].mxu1  ;;  %v9640_v29 = vpop.f32.mrb[53].mxu0  ;;  %v4573_v52 = vadd.f32 %v8676_v0, %v4572_v25  ;;  %v4643_v53 = vadd.f32 %v8677_v46, %v4642_v26 }
0x1120   :  { %v4736_v31 = vpop.f32.mrb[54].mxu1  ;;  %v4806_v32 = vpop.f32.mrb[54].mxu0 }
0x1121   :  { %v4737_v35 = vadd.f32 %v8682_v30, %v4736_v31  ;;  %v4807_v36 = vadd.f32 %v8683_v28, %v4806_v32  ;;  %v9651_v37 = vpop.f32.mrb[55].mxu1  ;;  %v9662_v39 = vpop.f32.mrb[55].mxu0 }
0x1123   :  { %9730 = vmatpush3.xpose.msk.msra.mxu1 %vm1088_vm4, %v4737_v35  ;;  %9735 = vmatpush3.xpose.msk.msra.mxu0 %vm1088_vm4, %v4807_v36 }
0x1124   :  { %9739 = vmatprep.subr.mxu1 %v10430_v20  ;;  %9744 = vmatprep.subr.mxu0 %v10430_v20 }
0x1126   :  { %9732 = vmatmul.mubr.msk.f32.vlgmr.msra.gmra.mrb[62].mxu1 %vm1088_vm4, %v4433_v40  ;;  %9737 = vmatmul.mubr.msk.f32.vlgmr.msra.gmra.mrb[62].mxu0 %vm1088_vm4, %v4503_v42 }
0x1127   :  { %9741 = vmatprep.mubr.msk.f32.mxu1 %vm10429_vm1, %v10430_v20  ;;  %9746 = vmatprep.mubr.msk.f32.mxu0 %vm10429_vm1, %v10430_v20 }
0x1128   :  { %v4876_v44 = vpop.f32.mrb[56].mxu1  ;;  %v4946_v45 = vpop.f32.mrb[56].mxu0 }
0x1129   :  { %v4877_v47 = vadd.f32 %v8684_v43, %v4876_v44  ;;  %v4947_v48 = vadd.f32 %v8685_v41, %v4946_v45  ;;  %v9673_v49 = vpop.f32.mrb[57].mxu1  ;;  %v9684_v50 = vpop.f32.mrb[57].mxu0 }
0x112a   :  { %v8692_v49 = vld [vmem:[%s12055_s10 + $0xa] ss:$0 sm:$0xff] }
0x112b   :  { %9740 = vmatpush3.xpose.msk.msra.mxu1 %vm1088_vm4, %v4877_v47  ;;  %9745 = vmatpush3.xpose.msk.msra.mxu0 %vm1088_vm4, %v4947_v48 }
0x112c   :  { %9749 = vmatprep.subr.mxu1 %v10430_v20  ;;  %9754 = vmatprep.subr.mxu0 %v10430_v20 }
0x112e   :  { %9742 = vmatmul.mubr.msk.f32.vlgmr.msra.gmra.mrb[64].mxu1 %vm1088_vm4, %v4573_v52  ;;  %9747 = vmatmul.mubr.msk.f32.vlgmr.msra.gmra.mrb[64].mxu0 %vm1088_vm4, %v4643_v53  ;;  %v8693_v52 = vld [vmem:[%s12055_s10 + $0xb] ss:$0 sm:$0xff] }
0x112f   :  { %9751 = vmatprep.mubr.msk.f32.mxu1 %vm10429_vm1, %v10430_v20  ;;  %9756 = vmatprep.mubr.msk.f32.mxu0 %vm10429_vm1, %v10430_v20 }
0x1130   :  { %v5040_v56 = vpop.f32.mrb[58].mxu1  ;;  %v5110_v57 = vpop.f32.mrb[58].mxu0 }
0x1131   :  { %v5041_v58 = vadd.f32 %v8690_v54, %v5040_v56  ;;  %v5111_v59 = vadd.f32 %v8691_v55, %v5110_v57  ;;  %v9695_v60 = vpop.f32.mrb[59].mxu1  ;;  %v9706_v61 = vpop.f32.mrb[59].mxu0 }
0x1133   :  { %9750 = vmatpush3.msra.mxu1 %v5041_v58  ;;  %9755 = vmatpush3.msra.mxu0 %v5111_v59 }
0x1134   :  { %9759 = vmatprep.subr.mxu1 %v10430_v20  ;;  %9764 = vmatprep.subr.mxu0 %v10430_v20 }
0x1138   :  { %v11570_v62 = vpop.f32.mrb[60].mxu1  ;;  %v11572_v63 = vpop.f32.mrb[60].mxu0 }
0x1139   :  { %v9717_v1 = vpop.f32.mrb[61].mxu1  ;;  %v9728_v2 = vpop.f32.mrb[61].mxu0  ;;  %v5181_v55 = vadd.f32 %v8692_v49, %v11570_v62  ;;  %v5251_v57 = vadd.f32 %v8693_v52, %v11572_v63  ;;  %v8657_v62 = vld [vmem:[%s12052_s7 + $0x40] sm:$0xff]  ;;  %v8658_v63 = vld [vmem:[%s12052_s7 + $0x48] sm:$0xff] }
0x113a   :  { %v8659_v1 = vld [vmem:[%s12052_s7 + $0x50] sm:$0xff]  ;;  %v8717_v52 = vld [vmem:[%s12061_s16 + $0x4] ss:$0 sm:$0xff] }
0x11f9   :  { %v5326_v3 = vpop.f32.mrb[62].mxu1  ;;  %v5402_v4 = vpop.f32.mrb[62].mxu0 }
0x11fa   :  { %v5558_v5 = vmul.f32 0.35355338, %v5326_v3  ;;  %v5559_v6 = vmul.f32 0.35355338, %v5402_v4  ;;  %v9733_v7 = vpop.f32.mrb[63].mxu1  ;;  %v9738_v8 = vpop.f32.mrb[63].mxu0 }
0x11fb   :  { %v8660_v3 = vld [vmem:[%s12052_s7 + $0x58] sm:$0xff] }
0x11fc   :  { %v5562_v10 = vadd.f32 %v10401_v9, %v5558_v5  ;;  %v5563_v11 = vadd.f32 %v10401_v9, %v5559_v6 }
0x11fe   :  { %v5566_v13 = vsel %vm1088_vm4, %v5562_v10, -inf  ;;  %v5569_v14 = vsel %vm1088_vm4, %v5563_v11, -inf }
0x11ff   :  { %5567 = vmax.xlane.f32.xlu0 %v5566_v13  ;;  %5570 = vmax.xlane.f32.xlu1 %v5569_v14 }
0x1201   :  { %v5478_v15 = vpop.f32.mrb[64].mxu1  ;;  %v5554_v16 = vpop.f32.mrb[64].mxu0 }
0x1202   :  { %v5560_v17 = vmul.f32 0.35355338, %v5478_v15  ;;  %v5561_v18 = vmul.f32 0.35355338, %v5554_v16  ;;  %v9743_v19 = vpop.f32.mrb[65].mxu1  ;;  %v9748_v21 = vpop.f32.mrb[65].mxu0 }
0x1204   :  { %v5564_v38 = vadd.f32 %v10401_v9, %v5560_v17  ;;  %v5565_v22 = vadd.f32 %v10401_v9, %v5561_v18 }
0x1206   :  { %v5572_v23 = vsel %vm1088_vm4, %v5564_v38, -inf  ;;  %v5575_v24 = vsel %vm1088_vm4, %v5565_v22, -inf }
0x1207   :  { %5573 = vmax.xlane.f32.xlu0 %v5572_v23  ;;  %5576 = vmax.xlane.f32.xlu1 %v5575_v24 }
0x128c   :  { %v5568_v25 = vpop.xlane.xlu0 %5567  ;;  %v5571_v26 = vpop.xlane.xlu1 %5570 }
0x128d   :  { %v5578_v27 = vsub.f32 %v5562_v10, %v5568_v25  ;;  %v5579_v29 = vsub.f32 %v5563_v11, %v5571_v26 }
0x128f   :  { %v5582_v30 = vmul.f32 1.442695, %v5578_v27  ;;  %v5584_v28 = vmul.f32 1.442695, %v5579_v29 }
0x1291   :  { %10357 = vpow2.f32 %v5582_v30 }
0x1292   :  { %10359 = vpow2.f32 %v5584_v28 }
0x1294   :  { %v5574_v31 = vpop.xlane.xlu0 %5573  ;;  %v5577_v32 = vpop.xlane.xlu1 %5576 }
0x1295   :  { %v5580_v33 = vsub.f32 %v5564_v38, %v5574_v31  ;;  %v5581_v34 = vsub.f32 %v5565_v22, %v5577_v32  ;;  %v8714_v38 = vld [vmem:[%s12056_s11 + $0x2] ss:$0 sm:$0xff] }
0x1296   :  { %v8719_v32 = vld [vmem:[%s12076_s25 + $0x180] sm:$0xff] }
0x1297   :  { %v5586_v35 = vmul.f32 1.442695, %v5580_v33  ;;  %v5588_v36 = vmul.f32 1.442695, %v5581_v34  ;;  %v8723_v33 = vld [vmem:[%s12076_s25 + $0x1a0] sm:$0xff] }
0x1299   :  { %10361 = vpow2.f32 %v5586_v35  ;;  %v8724_v35 = vld [vmem:[%s12076_s25 + $0x1a8] sm:$0xff] }
0x129a   :  { %10363 = vpow2.f32 %v5588_v36  ;;  %v8721_v36 = vld [vmem:[%s12076_s25 + $0x190] sm:$0xff] }
0x129b   :  { %v10358_v37 = vpop.eup %10357 }
0x129c   :  { %v10360_v39 = vpop.eup %10359  ;;  %v5590_v40 = vsel %vm1088_vm4, %v10358_v37, 0.0 }
0x129d   :  { %5591 = vadd.xlane.f32.xlu0 %v5590_v40  ;;  %v5593_v42 = vsel %vm1088_vm4, %v10360_v39, 0.0  ;;  %v8725_v40 = vld [vmem:[%s12076_s25 + $0x1b0] sm:$0xff] }
0x129e   :  { %5594 = vadd.xlane.f32.xlu1 %v5593_v42  ;;  %v8726_v42 = vld [vmem:[%s12076_s25 + $0x1b8] sm:$0xff] }
0x12a3   :  { %v10362_v43 = vpop.eup %10361 }
0x12a4   :  { %v10364_v41 = vpop.eup %10363  ;;  %v5596_v44 = vsel %vm1088_vm4, %v10362_v43, 0.0 }
0x12a5   :  { %5597 = vadd.xlane.f32.xlu0 %v5596_v44  ;;  %v5599_v45 = vsel %vm1088_vm4, %v10364_v41, 0.0 }
0x12a6   :  { %5600 = vadd.xlane.f32.xlu1 %v5599_v45 }
0x132a   :  { %v5592_v0 = vpop.xlane.xlu0 %5591 }
0x132b   :  { %10365 = vrcp.f32 %v5592_v0  ;;  %v5595_v46 = vpop.xlane.xlu1 %5594 }
0x132c   :  { %10367 = vrcp.f32 %v5595_v46 }
0x1332   :  { %v5598_v47 = vpop.xlane.xlu0 %5597 }
0x1333   :  { %10369 = vrcp.f32 %v5598_v47  ;;  %v5601_v48 = vpop.xlane.xlu1 %5600 }
0x1334   :  { %10371 = vrcp.f32 %v5601_v48 }
0x1335   :  { %v10366_v50 = vpop.eup %10365 }
0x1336   :  { %v10368_v53 = vpop.eup %10367  ;;  %v5606_v54 = vmul.f32 %v10366_v50, %v10358_v37  ;;  %v8722_v37 = vld [vmem:[%s12076_s25 + $0x198] sm:$0xff] }
0x1337   :  { %v5607_v56 = vmul.f32 %v10368_v53, %v10360_v39  ;;  %v10231_v39 = vpack.c.bf16 %v8724_v35, %v8723_v33  ;;  %v8727_v53 = vld [vmem:[%s12076_s25 + $0x1c0] sm:$0xff] }
0x1338   :  { %9752 = vmatmul.mubr.msk.f32.vlgmr.msra.gmra.mrb[66].mxu1 %vm1088_vm4, %v5606_v54  ;;  %v8751_v33 = vld [vmem:[%s12051_s6 + $0x180] sm:$0xff] }
0x1339   :  { %9757 = vmatmul.mubr.msk.f32.vlgmr.msra.gmra.mrb[66].mxu0 %vm1088_vm4, %v5607_v56  ;;  %9760 = vmatpush3.msra.mxu1 %v5181_v55  ;;  %v8728_v55 = vld [vmem:[%s12076_s25 + $0x1c8] sm:$0xff]  ;;  %v8731_v56 = vld [vmem:[%s12076_s25 + $0x1e0] sm:$0xff] }
0x133a   :  { %9765 = vmatpush3.msra.mxu0 %v5251_v57  ;;  %9761 = vmatprep.mubr.msk.f32.mxu1 %vm10429_vm1, %v10430_v20  ;;  %v8732_v57 = vld [vmem:[%s12076_s25 + $0x1e8] sm:$0xff]  ;;  %v8755_v35 = vld [vmem:[%s12051_s6 + $0x1a0] sm:$0xff] }
0x133b   :  { %9766 = vmatprep.mubr.msk.f32.mxu0 %vm10429_vm1, %v10430_v20  ;;  %9769 = vmatprep.subr.mxu1 %v10430_v20 }
0x133c   :  { %9774 = vmatprep.subr.mxu0 %v10430_v20 }
0x133d   :  { %v10370_v58 = vpop.eup %10369 }
0x133e   :  { %v10372_v59 = vpop.eup %10371  ;;  %v5608_v60 = vmul.f32 %v10370_v58, %v10362_v43  ;;  %v10228_v43 = vpack.c.bf16 %v8722_v37, %v8721_v36  ;;  %v8756_v36 = vld [vmem:[%s12051_s6 + $0x1a8] sm:$0xff] }
0x133f   :  { %v5609_v61 = vmul.f32 %v10372_v59, %v10364_v41  ;;  %v10234_v41 = vpack.c.bf16 %v8726_v42, %v8725_v40  ;;  %v8718_v59 = vld [vmem:[%s12062_s17 + $0x4] ss:$0 sm:$0xff]  ;;  %v8753_v40 = vld [vmem:[%s12051_s6 + $0x190] sm:$0xff]  ;;  %v8754_v42 = vld [vmem:[%s12051_s6 + $0x198] sm:$0xff] }
0x1340   :  { %9762 = vmatmul.mubr.msk.f32.vlgmr.msra.gmra.mrb[68].mxu1 %vm1088_vm4, %v5608_v60 }
0x1341   :  { %9767 = vmatmul.mubr.msk.f32.vlgmr.msra.gmra.mrb[68].mxu0 %vm1088_vm4, %v5609_v61  ;;  %9771 = vmatprep.mubr.msk.f32.mxu1 %vm10429_vm1, %v10430_v20  ;;  %v10237_v61 = vpack.c.bf16 %v8728_v55, %v8727_v53  ;;  %v8762_v53 = vld [vmem:[%s12051_s6 + $0x1d8] sm:$0xff] }
0x1342   :  { %9776 = vmatprep.mubr.msk.f32.mxu0 %vm10429_vm1, %v10430_v20  ;;  %9770 = vmatpush3.msra.mxu1 %v8657_v62  ;;  %v10243_v62 = vpack.c.bf16 %v8732_v57, %v8731_v56  ;;  %v8766_v56 = vld [vmem:[%s12051_s6 + $0x1f8] sm:$0xff] }
0x1343   :  { %9775 = vmatpush3.msra.mxu0 %v8658_v63  ;;  %9779 = vmatprep.subr.mxu1 %v10430_v20  ;;  %v8729_v63 = vld [vmem:[%s12076_s25 + $0x1d0] sm:$0xff] }
0x1344   :  { %9784 = vmatprep.subr.mxu0 %v10430_v20 }
0x140b   :  { %v5679_v2 = vpop.f32.mrb[66].mxu1 }
0x140c   :  { %v5752_v4 = vpop.f32.mrb[66].mxu0  ;;  %v9753_v5 = vpop.f32.mrb[67].mxu1  ;;  %9772 = vmatmul.mubr.msk.f32.vlgmr.msra.gmra.mrb[70].mxu1 %vm1088_vm4, %v5679_v2  ;;  %v8730_v2 = vld [vmem:[%s12076_s25 + $0x1d8] sm:$0xff] }
0x140d   :  { %v9758_v6 = vpop.f32.mrb[67].mxu0  ;;  %9777 = vmatmul.mubr.msk.f32.vlgmr.msra.gmra.mrb[70].mxu0 %vm1088_vm4, %v5752_v4  ;;  %9780 = vmatpush3.msra.mxu1 %v8659_v1  ;;  %v8734_v4 = vld [vmem:[%s12076_s25 + $0x1f8] sm:$0xff]  ;;  %v10240_v5 = vpack.c.bf16 %v8730_v2, %v8729_v63 }
0x140e   :  { %9781 = vmatprep.mubr.msk.f32.mxu1 %vm10429_vm1, %v10430_v20  ;;  %9785 = vmatpush3.msra.mxu0 %v8660_v3  ;;  %v8733_v3 = vld [vmem:[%s12076_s25 + $0x1f0] sm:$0xff] }
0x140f   :  { %9786 = vmatprep.mubr.msk.f32.mxu0 %vm10429_vm1, %v10430_v20  ;;  %10224 = vmatprep.subr.bf16.mxu1 %v10428_v12  ;;  %v10246_v6 = vpack.c.bf16 %v8734_v4, %v8733_v3  ;;  %v8792_v3 = vld [vmem:[%s12054_s9 + $0xc] ss:$0 sm:$0xff]  ;;  %v8793_v4 = vld [vmem:[%s12054_s9 + $0xd] ss:$0 sm:$0xff] }
0x1410   :  { %10230 = vmatprep.subr.bf16.mxu0 %v10428_v12 }
0x1413   :  { %v5825_v7 = vpop.f32.mrb[68].mxu1 }
0x1414   :  { %v5898_v8 = vpop.f32.mrb[68].mxu0  ;;  %v9763_v9 = vpop.f32.mrb[69].mxu1  ;;  %9782 = vmatmul.mubr.msk.f32.vlgmr.msra.gmra.mrb[72].mxu1 %vm1088_vm4, %v5825_v7  ;;  %v8735_v7 = vld [vmem:[%s12050_s5 + $0x180] sm:$0xff] }
0x1415   :  { %v9768_v10 = vpop.f32.mrb[69].mxu0  ;;  %9787 = vmatmul.mubr.msk.f32.vlgmr.msra.gmra.mrb[72].mxu0 %vm1088_vm4, %v5898_v8  ;;  %9797 = vmatprep.mubr.msk.f32.mxu1 %vm10429_vm1, %v10430_v20  ;;  %v8736_v8 = vld [vmem:[%s12050_s5 + $0x188] sm:$0xff]  ;;  %v8739_v9 = vld [vmem:[%s12050_s5 + $0x1a0] sm:$0xff] }
0x1416   :  { %9808 = vmatprep.mubr.msk.f32.mxu0 %vm10429_vm1, %v10430_v20  ;;  %10232 = vmatpush3.bf16.msra.mxu0 %v10231_v39  ;;  %v8740_v10 = vld [vmem:[%s12050_s5 + $0x1a8] sm:$0xff]  ;;  %v10279_v39 = vpack.c.bf16 %v8756_v36, %v8755_v35 }
0x1417   :  { %10233 = vmatprep.subr.bf16.mxu0 %v10428_v12 }
0x141a   :  { %10235 = vmatpush3.bf16.msra.mxu0 %v10234_v41  ;;  %v10276_v41 = vpack.c.bf16 %v8754_v42, %v8753_v40 }
0x141b   :  { %10242 = vmatprep.subr.bf16.mxu0 %v10428_v12 }
0x14df   :  { %v5971_v11 = vpop.f32.mrb[70].mxu1 }
0x14e0   :  { %v6044_v13 = vpop.f32.mrb[70].mxu0  ;;  %v9773_v14 = vpop.f32.mrb[71].mxu1 }
0x14e1   :  { %v6194_v15 = vadd.f32 %v6044_v13, %v5971_v11  ;;  %v9778_v16 = vpop.f32.mrb[71].mxu0  ;;  %v10249_v11 = vpack.c.bf16 %v8736_v8, %v8735_v7  ;;  %v10255_v13 = vpack.c.bf16 %v8740_v10, %v8739_v9  ;;  %v8737_v14 = vld [vmem:[%s12050_s5 + $0x190] sm:$0xff]  ;;  %v8784_v7 = vld [vmem:[%s12053_s8 + $0xc] ss:$0 sm:$0xff]  ;;  %v8785_v8 = vld [vmem:[%s12053_s8 + $0xd] ss:$0 sm:$0xff] }
0x14e2   :  { %v8741_v16 = vld [vmem:[%s12050_s5 + $0x1b0] sm:$0xff] }
0x14e7   :  { %v6117_v17 = vpop.f32.mrb[72].mxu1 }
0x14e8   :  { %v6195_v18 = vadd.f32 %v6194_v15, %v6117_v17  ;;  %v6190_v19 = vpop.f32.mrb[72].mxu0  ;;  %v9783_v21 = vpop.f32.mrb[73].mxu1  ;;  %v8738_v15 = vld [vmem:[%s12050_s5 + $0x198] sm:$0xff] }
0x14e9   :  { %v9788_v22 = vpop.f32.mrb[73].mxu0  ;;  %v8742_v17 = vld [vmem:[%s12050_s5 + $0x1b8] sm:$0xff]  ;;  %v8743_v21 = vld [vmem:[%s12050_s5 + $0x1c0] sm:$0xff] }
0x14ea   :  { %v6196_v23 = vadd.f32 %v6195_v18, %v6190_v19  ;;  %v10252_v18 = vpack.c.bf16 %v8738_v15, %v8737_v14  ;;  %v10258_v19 = vpack.c.bf16 %v8742_v17, %v8741_v16  ;;  %v8747_v22 = vld [vmem:[%s12050_s5 + $0x1e0] sm:$0xff]  ;;  %v8794_v16 = vld [vmem:[%s12054_s9 + $0xe] ss:$0 sm:$0xff]  ;;  %v8795_v17 = vld [vmem:[%s12054_s9 + $0xf] ss:$0 sm:$0xff] }
0x14ec   :  { %v6203_v24 = vadd.f32 %v8714_v38, %v6196_v23  ;;  %v8744_v38 = vld [vmem:[%s12050_s5 + $0x1c8] sm:$0xff] }
0x14ed   :  { %v8748_v23 = vld [vmem:[%s12050_s5 + $0x1e8] sm:$0xff] }
0x14ee   :  { %v11639_v25 = vadd.f32 %v6203_v24, %v11288_v51  ;;  %v8720_v51 = vld [vmem:[%s12076_s25 + $0x188] sm:$0xff]  ;;  %v10261_v24 = vpack.c.bf16 %v8744_v38, %v8743_v21 }
0x14ef   :  { %v10225_v34 = vpack.c.bf16 %v8720_v51, %v8719_v32  ;;  %v8786_v21 = vld [vmem:[%s12053_s8 + $0xe] ss:$0 sm:$0xff]  ;;  %v8787_v38 = vld [vmem:[%s12053_s8 + $0xf] ss:$0 sm:$0xff] }
0x14f0   :  { %v6209_v26 = vsel %vm72_vm0, %v11639_v25, 0.0 }
0x14f1   :  { %6210 = vadd.xlane.f32.xlu0 %v6209_v26  ;;  %10226 = vmatpush3.bf16.msra.mxu1 %v10225_v34  ;;  %v10267_v26 = vpack.c.bf16 %v8748_v23, %v8747_v22  ;;  %v8752_v34 = vld [vmem:[%s12051_s6 + $0x188] sm:$0xff] }
0x14f2   :  { %10227 = vmatprep.subr.bf16.mxu1 %v10428_v12  ;;  %v10273_v37 = vpack.c.bf16 %v8752_v34, %v8751_v33 }
0x14f5   :  { %10229 = vmatpush3.bf16.msra.mxu1 %v10228_v43  ;;  %v8757_v43 = vld [vmem:[%s12051_s6 + $0x1b0] sm:$0xff] }
0x14f6   :  { %10236 = vmatprep.subr.bf16.mxu1 %v10428_v12 }
0x157e   :  { %v6211_v27 = vpop.xlane.xlu0 %6210 }
0x157f   :  { %v6212_v29 = vmul.f32 0.03125, %v6211_v27  ;;  %v8745_v27 = vld [vmem:[%s12050_s5 + $0x1d0] sm:$0xff] }
0x1581   :  { %v6213_v30 = vsub.f32 %v11639_v25, %v6212_v29  ;;  %v8746_v29 = vld [vmem:[%s12050_s5 + $0x1d8] sm:$0xff] }
0x1582   :  { %v10264_v32 = vpack.c.bf16 %v8746_v29, %v8745_v27 }
0x1583   :  { %v6214_v28 = vmul.f32 %v6213_v30, %v6213_v30  ;;  %v6234_v54 = vmul.f32 %v8717_v52, %v6213_v30  ;;  %v8749_v30 = vld [vmem:[%s12050_s5 + $0x1f0] sm:$0xff] }
0x1584   :  { %v8761_v52 = vld [vmem:[%s12051_s6 + $0x1d0] sm:$0xff] }
0x1585   :  { %v6215_v31 = vsel %vm72_vm0, %v6214_v28, 0.0  ;;  %v8750_v28 = vld [vmem:[%s12050_s5 + $0x1f8] sm:$0xff]  ;;  %v10288_v55 = vpack.c.bf16 %v8762_v53, %v8761_v52 }
0x1586   :  { %6216 = vadd.xlane.f32.xlu1 %v6215_v31  ;;  %v11774_v31 = vld [vmem:[%s12078_s30] sm:$0xff]  ;;  %v10270_v51 = vpack.c.bf16 %v8750_v28, %v8749_v30  ;;  %v8800_v30 = vld [vmem:[%s12055_s10 + $0xc] ss:$0 sm:$0xff]  ;;  %v8801_v28 = vld [vmem:[%s12055_s10 + $0xd] ss:$0 sm:$0xff] }
0x1613   :  { %v6217_v44 = vpop.xlane.xlu1 %6216 }
0x1614   :  { %v6218_v45 = vmul.f32 0.032258064, %v6217_v44  ;;  %v8758_v44 = vld [vmem:[%s12051_s6 + $0x1b8] sm:$0xff] }
0x1616   :  { %10373 = vrsqrt.f32 %v6218_v45  ;;  %vm6221_vm12 = vcmp.eq.f32.partialorder %v6218_v45, inf  ;;  %v6224_v47 = vand.u32 2147483648, %v6218_v45  ;;  %vm6223_vm13 = vcmp.eq.f32.partialorder %v6218_v45, 0.0 }
0x1620   :  { %v10374_v0 = vpop.eup %10373 }
0x1621   :  { %v6220_v46 = vmul.f32 %v10374_v0, %v6218_v45  ;;  %v10282_v0 = vpack.c.bf16 %v8758_v44, %v8757_v43 }
0x1623   :  { %v6222_v48 = vsel %vm6221_vm12, %v6218_v45, %v6220_v46  ;;  %v8759_v45 = vld [vmem:[%s12051_s6 + $0x1c0] sm:$0xff]  ;;  %v8760_v46 = vld [vmem:[%s12051_s6 + $0x1c8] sm:$0xff] }
0x1624   :  { %v6225_v49 = vsel %vm6223_vm13, %v6224_v47, %v6222_v48  ;;  %v8763_v47 = vld [vmem:[%s12051_s6 + $0x1e0] sm:$0xff]  ;;  %v8764_v48 = vld [vmem:[%s12051_s6 + $0x1e8] sm:$0xff] }
0x1625   :  { %v6226_v50 = vadd.f32 1e-06, %v6225_v49  ;;  %v10285_v49 = vpack.c.bf16 %v8760_v46, %v8759_v45  ;;  %v10403_v46 = vld [vmem:[%s12079_s22] sm:$0xff] }
0x1627   :  { %10375 = vrcp.f32 %v6226_v50  ;;  %v10291_v50 = vpack.c.bf16 %v8764_v48, %v8763_v47 }
0x1631   :  { %v10376_v58 = vpop.eup %10375 }
0x1632   :  { %v6235_v60 = vmul.f32 %v10376_v58, %v6234_v54  ;;  %v8765_v54 = vld [vmem:[%s12051_s6 + $0x1f0] sm:$0xff] }
0x1633   :  { %v10294_v57 = vpack.c.bf16 %v8766_v56, %v8765_v54 }
0x1634   :  { %v6242_v1 = vadd.f32 %v8718_v59, %v6235_v60 }
0x1636   :  { %9798 = vmatmul.mubr.msk.f32.vlgmr.msra.gmra.mrb[74].mxu1 %vm72_vm0, %v6242_v1  ;;  %9809 = vmatmul.mubr.msk.f32.vlgmr.msra.gmra.mrb[74].mxu0 %vm72_vm0, %v6242_v1 }
0x1637   :  { %10238 = vmatpush3.bf16.msra.mxu1 %v10237_v61  ;;  %10244 = vmatpush3.bf16.msra.mxu0 %v10243_v62 }
0x1638   :  { %10239 = vmatprep.subr.bf16.mxu1 %v10428_v12  ;;  %10245 = vmatprep.subr.bf16.mxu0 %v10428_v12 }
0x1639   :  { %9819 = vmatprep.mubr.msk.f32.mxu1 %vm10429_vm1, %v10430_v20  ;;  %9830 = vmatprep.mubr.msk.f32.mxu0 %vm10429_vm1, %v10430_v20 }
0x163b   :  { %10241 = vmatpush3.bf16.msra.mxu1 %v10240_v5  ;;  %10247 = vmatpush3.bf16.msra.mxu0 %v10246_v6 }
0x163c   :  { %10248 = vmatprep.subr.bf16.mxu1 %v10428_v12  ;;  %10254 = vmatprep.subr.bf16.mxu0 %v10428_v12 }
0x163e   :  { %9820 = vmatmul.mubr.msk.f32.vlgmr.msra.gmra.mrb[76].mxu1 %vm72_vm0, %v6242_v1  ;;  %9831 = vmatmul.mubr.msk.f32.vlgmr.msra.gmra.mrb[76].mxu0 %vm72_vm0, %v6242_v1 }
0x163f   :  { %10250 = vmatpush3.bf16.msra.mxu1 %v10249_v11  ;;  %10256 = vmatpush3.bf16.msra.mxu0 %v10255_v13 }
0x1640   :  { %10251 = vmatprep.subr.bf16.mxu1 %v10428_v12  ;;  %10257 = vmatprep.subr.bf16.mxu0 %v10428_v12 }
0x1641   :  { %9841 = vmatprep.mubr.msk.f32.mxu1 %vm10429_vm1, %v10430_v20  ;;  %9852 = vmatprep.mubr.msk.f32.mxu0 %vm10429_vm1, %v10430_v20 }
0x1643   :  { %10253 = vmatpush3.bf16.msra.mxu1 %v10252_v18  ;;  %10259 = vmatpush3.bf16.msra.mxu0 %v10258_v19 }
0x1644   :  { %10260 = vmatprep.subr.bf16.mxu1 %v10428_v12  ;;  %10266 = vmatprep.subr.bf16.mxu0 %v10428_v12 }
0x1646   :  { %9842 = vmatmul.mubr.msk.f32.vlgmr.msra.gmra.mrb[78].mxu1 %vm72_vm0, %v11774_v31  ;;  %9853 = vmatmul.mubr.msk.f32.vlgmr.msra.gmra.mrb[78].mxu0 %vm72_vm0, %v11774_v31 }
0x1647   :  { %10262 = vmatpush3.bf16.msra.mxu1 %v10261_v24  ;;  %10268 = vmatpush3.bf16.msra.mxu0 %v10267_v26 }
0x1648   :  { %10263 = vmatprep.subr.bf16.mxu1 %v10428_v12  ;;  %10269 = vmatprep.subr.bf16.mxu0 %v10428_v12 }
0x1649   :  { %9863 = vmatprep.mubr.msk.f32.mxu1 %vm10429_vm1, %v10430_v20  ;;  %9874 = vmatprep.mubr.msk.f32.mxu0 %vm10429_vm1, %v10430_v20 }
0x164b   :  { %10265 = vmatpush3.bf16.msra.mxu1 %v10264_v32  ;;  %10271 = vmatpush3.bf16.msra.mxu0 %v10270_v51 }
0x164c   :  { %10272 = vmatprep.subr.bf16.mxu1 %v10428_v12  ;;  %10278 = vmatprep.subr.bf16.mxu0 %v10428_v12 }
0x164e   :  { %9864 = vmatmul.mubr.msk.f32.vlgmr.msra.gmra.mrb[80].mxu1 %vm72_vm0, %v11774_v31  ;;  %9875 = vmatmul.mubr.msk.f32.vlgmr.msra.gmra.mrb[80].mxu0 %vm72_vm0, %v11774_v31 }
0x164f   :  { %10274 = vmatpush3.bf16.msra.mxu1 %v10273_v37  ;;  %10280 = vmatpush3.bf16.msra.mxu0 %v10279_v39 }
0x1650   :  { %10275 = vmatprep.subr.bf16.mxu1 %v10428_v12  ;;  %10281 = vmatprep.subr.bf16.mxu0 %v10428_v12 }
0x1651   :  { %9885 = vmatprep.mubr.msk.f32.mxu1 %vm10429_vm1, %v10430_v20  ;;  %9896 = vmatprep.mubr.msk.f32.mxu0 %vm10429_vm1, %v10430_v20 }
0x1653   :  { %10277 = vmatpush3.bf16.msra.mxu1 %v10276_v41  ;;  %10283 = vmatpush3.bf16.msra.mxu0 %v10282_v0 }
0x1654   :  { %10284 = vmatprep.subr.bf16.mxu1 %v10428_v12  ;;  %10290 = vmatprep.subr.bf16.mxu0 %v10428_v12 }
0x1656   :  { %9886 = vmatmul.mubr.msk.f32.vlgmr.msra.gmra.mrb[82].mxu1 %vm72_vm0, %v11774_v31  ;;  %9897 = vmatmul.mubr.msk.f32.vlgmr.msra.gmra.mrb[82].mxu0 %vm72_vm0, %v11774_v31 }
0x1657   :  { %10286 = vmatpush3.bf16.msra.mxu1 %v10285_v49  ;;  %10292 = vmatpush3.bf16.msra.mxu0 %v10291_v50 }
0x1658   :  { %10287 = vmatprep.subr.bf16.mxu1 %v10428_v12  ;;  %10293 = vmatprep.subr.bf16.mxu0 %v10428_v12 }
0x1659   :  { %9907 = vmatprep.mubr.msk.f32.mxu1 %vm10429_vm1, %v10430_v20  ;;  %9918 = vmatprep.mubr.msk.f32.mxu0 %vm10429_vm1, %v10430_v20 }
0x165b   :  { %10289 = vmatpush3.bf16.msra.mxu1 %v10288_v55  ;;  %10295 = vmatpush3.bf16.msra.mxu0 %v10294_v57 }
0x165c   :  { %9921 = vmatprep.subr.mxu1 %v10430_v20  ;;  %9926 = vmatprep.subr.mxu0 %v10430_v20 }
0x165e   :  { %9908 = vmatmul.mubr.msk.f32.vlgmr.msra.gmra.mrb[84].mxu1 %vm72_vm0, %v11774_v31  ;;  %9919 = vmatmul.mubr.msk.f32.vlgmr.msra.gmra.mrb[84].mxu0 %vm72_vm0, %v11774_v31 }
0x165f   :  { %9923 = vmatprep.mubr.msk.f32.mxu1 %vm10429_vm1, %v10430_v20  ;;  %9928 = vmatprep.mubr.msk.f32.mxu0 %vm10429_vm1, %v10430_v20 }
0x1709   :  { %v6409_v58 = vpop.f32.mrb[74].mxu1  ;;  %v6479_v59 = vpop.f32.mrb[74].mxu0 }
0x170a   :  { %v9799_v60 = vpop.f32.mrb[75].mxu1  ;;  %v9810_v61 = vpop.f32.mrb[75].mxu0  ;;  %v6410_v14 = vadd.f32 %v8784_v7, %v6409_v58  ;;  %v6480_v15 = vadd.f32 %v8785_v8, %v6479_v59 }
0x1711   :  { %v6549_v62 = vpop.f32.mrb[76].mxu1  ;;  %v6619_v63 = vpop.f32.mrb[76].mxu0 }
0x1712   :  { %v9821_v1 = vpop.f32.mrb[77].mxu1  ;;  %v9832_v2 = vpop.f32.mrb[77].mxu0  ;;  %v6550_v27 = vadd.f32 %v8786_v21, %v6549_v62  ;;  %v6620_v29 = vadd.f32 %v8787_v38, %v6619_v63 }
0x1719   :  { %v6713_v5 = vpop.f32.mrb[78].mxu1  ;;  %v6783_v6 = vpop.f32.mrb[78].mxu0 }
0x171a   :  { %v6714_v9 = vadd.f32 %v8792_v3, %v6713_v5  ;;  %v6784_v10 = vadd.f32 %v8793_v4, %v6783_v6  ;;  %v9843_v11 = vpop.f32.mrb[79].mxu1  ;;  %v9854_v13 = vpop.f32.mrb[79].mxu0 }
0x171c   :  { %9922 = vmatpush3.xpose.msk.msra.mxu1 %vm1088_vm4, %v6714_v9  ;;  %9927 = vmatpush3.xpose.msk.msra.mxu0 %vm1088_vm4, %v6784_v10 }
0x171d   :  { %9931 = vmatprep.subr.mxu1 %v10430_v20  ;;  %9936 = vmatprep.subr.mxu0 %v10430_v20 }
0x171f   :  { %9924 = vmatmul.mubr.msk.f32.vlgmr.msra.gmra.mrb[86].mxu1 %vm1088_vm4, %v6410_v14  ;;  %9929 = vmatmul.mubr.msk.f32.vlgmr.msra.gmra.mrb[86].mxu0 %vm1088_vm4, %v6480_v15 }
0x1720   :  { %9933 = vmatprep.mubr.msk.f32.mxu1 %vm10429_vm1, %v10430_v20  ;;  %9938 = vmatprep.mubr.msk.f32.mxu0 %vm10429_vm1, %v10430_v20 }
0x1721   :  { %v6853_v18 = vpop.f32.mrb[80].mxu1  ;;  %v6923_v19 = vpop.f32.mrb[80].mxu0 }
0x1722   :  { %v6854_v22 = vadd.f32 %v8794_v16, %v6853_v18  ;;  %v6924_v23 = vadd.f32 %v8795_v17, %v6923_v19  ;;  %v9865_v24 = vpop.f32.mrb[81].mxu1  ;;  %v9876_v26 = vpop.f32.mrb[81].mxu0 }
0x1723   :  { %v8802_v24 = vld [vmem:[%s12055_s10 + $0xe] ss:$0 sm:$0xff] }
0x1724   :  { %9932 = vmatpush3.xpose.msk.msra.mxu1 %vm1088_vm4, %v6854_v22  ;;  %9937 = vmatpush3.xpose.msk.msra.mxu0 %vm1088_vm4, %v6924_v23 }
0x1725   :  { %9941 = vmatprep.subr.mxu1 %v10430_v20  ;;  %9946 = vmatprep.subr.mxu0 %v10430_v20 }
0x1727   :  { %9934 = vmatmul.mubr.msk.f32.vlgmr.msra.gmra.mrb[88].mxu1 %vm1088_vm4, %v6550_v27  ;;  %9939 = vmatmul.mubr.msk.f32.vlgmr.msra.gmra.mrb[88].mxu0 %vm1088_vm4, %v6620_v29  ;;  %v8803_v27 = vld [vmem:[%s12055_s10 + $0xf] ss:$0 sm:$0xff] }
0x1728   :  { %9943 = vmatprep.mubr.msk.f32.mxu1 %vm10429_vm1, %v10430_v20  ;;  %9948 = vmatprep.mubr.msk.f32.mxu0 %vm10429_vm1, %v10430_v20 }
0x1729   :  { %v7017_v31 = vpop.f32.mrb[82].mxu1  ;;  %v7087_v33 = vpop.f32.mrb[82].mxu0 }
0x172a   :  { %v7018_v32 = vadd.f32 %v8800_v30, %v7017_v31  ;;  %v9887_v51 = vpop.f32.mrb[83].mxu1  ;;  %v7088_v34 = vadd.f32 %v8801_v28, %v7087_v33  ;;  %v9898_v35 = vpop.f32.mrb[83].mxu0 }
0x172c   :  { %9942 = vmatpush3.msra.mxu1 %v7018_v32  ;;  %9947 = vmatpush3.msra.mxu0 %v7088_v34 }
0x172d   :  { %9951 = vmatprep.subr.mxu1 %v10430_v20  ;;  %9956 = vmatprep.subr.mxu0 %v10430_v20 }
0x1731   :  { %v11920_v36 = vpop.f32.mrb[84].mxu1  ;;  %v11922_v37 = vpop.f32.mrb[84].mxu0 }
0x1732   :  { %v9909_v39 = vpop.f32.mrb[85].mxu1  ;;  %v9920_v40 = vpop.f32.mrb[85].mxu0  ;;  %v7158_v28 = vadd.f32 %v8802_v24, %v11920_v36  ;;  %v7228_v32 = vadd.f32 %v8803_v27, %v11922_v37  ;;  %v8767_v36 = vld [vmem:[%s12052_s7 + $0x60] sm:$0xff]  ;;  %v8768_v37 = vld [vmem:[%s12052_s7 + $0x68] sm:$0xff]  ;;  %v8836_v24 = vld [vmem:[%s12059_s14 + $0x10] sm:$0xff] }
0x1733   :  { %v8769_v39 = vld [vmem:[%s12052_s7 + $0x70] sm:$0xff] }
0x17f2   :  { %v7303_v42 = vpop.f32.mrb[86].mxu1  ;;  %v7379_v43 = vpop.f32.mrb[86].mxu0 }
0x17f3   :  { %v7535_v41 = vmul.f32 0.35355338, %v7303_v42  ;;  %v7536_v44 = vmul.f32 0.35355338, %v7379_v43  ;;  %v9925_v45 = vpop.f32.mrb[87].mxu1  ;;  %v9930_v0 = vpop.f32.mrb[87].mxu0 }
0x17f4   :  { %v8770_v42 = vld [vmem:[%s12052_s7 + $0x78] sm:$0xff]  ;;  %s10404_s7 = scalar_lea.vmem %s8437_s0, 128 }
0x17f5   :  { %v7539_v47 = vadd.f32 %v10403_v46, %v7535_v41  ;;  %v7540_v48 = vadd.f32 %v10403_v46, %v7536_v44  ;;  %p10405_p0 = scmp.ne.s32.totalorder %s8437_s0, %s10404_s7  ;;  %p10410_p2 = scmp.lt.s32.totalorder %s10404_s7, %s10404_s7 }
0x17f7   :  { %v7543_v49 = vsel %vm1088_vm4, %v7539_v47, -inf  ;;  %v7546_v50 = vsel %vm1088_vm4, %v7540_v48, -inf  ;;  %p10411_p3 = por %p10410_p2, %p10409_p1 }
0x17f8   :  { %7544 = vmax.xlane.f32.xlu0 %v7543_v49  ;;  %7547 = vmax.xlane.f32.xlu1 %v7546_v50 }
0x17f9   :  { %p10412_p4 = pnand %p10411_p3, %p10405_p0 }
0x17fa   :  { %v7455_v52 = vpop.f32.mrb[88].mxu1  ;;  %v7531_v53 = vpop.f32.mrb[88].mxu0 }
0x17fb   :  { %v7537_v54 = vmul.f32 0.35355338, %v7455_v52  ;;  %v7538_v55 = vmul.f32 0.35355338, %v7531_v53  ;;  %v9935_v56 = vpop.f32.mrb[89].mxu1  ;;  %v9940_v57 = vpop.f32.mrb[89].mxu0 }
0x17fd   :  { %v7541_v58 = vadd.f32 %v10403_v46, %v7537_v54  ;;  %v7542_v59 = vadd.f32 %v10403_v46, %v7538_v55 }
0x17ff   :  { %v7549_v60 = vsel %vm1088_vm4, %v7541_v58, -inf  ;;  %v7552_v61 = vsel %vm1088_vm4, %v7542_v59, -inf }
0x1800   :  { %7550 = vmax.xlane.f32.xlu0 %v7549_v60  ;;  %7553 = vmax.xlane.f32.xlu1 %v7552_v61 }
0x1885   :  { %v7545_v62 = vpop.xlane.xlu0 %7544  ;;  %v7548_v63 = vpop.xlane.xlu1 %7547 }
0x1886   :  { %v7555_v1 = vsub.f32 %v7539_v47, %v7545_v62  ;;  %v7556_v2 = vsub.f32 %v7540_v48, %v7548_v63 }
0x1888   :  { %v7559_v3 = vmul.f32 1.442695, %v7555_v1  ;;  %v7561_v4 = vmul.f32 1.442695, %v7556_v2 }
0x188a   :  { %10377 = vpow2.f32 %v7559_v3 }
0x188b   :  { %10379 = vpow2.f32 %v7561_v4 }
0x188d   :  { %v7551_v5 = vpop.xlane.xlu0 %7550  ;;  %v7554_v6 = vpop.xlane.xlu1 %7553 }
0x188e   :  { %v7557_v7 = vsub.f32 %v7541_v58, %v7551_v5  ;;  %v7558_v8 = vsub.f32 %v7542_v59, %v7554_v6  ;;  %v8824_v58 = vld [vmem:[%s12056_s11 + $0x3] ss:$0 sm:$0xff]  ;;  %v8830_v6 = vld [vmem:[%s12057_s12 + $0x28] sm:$0xff] }
0x188f   :  { %v8829_v5 = vld [vmem:[%s12057_s12 + $0x20] sm:$0xff] }
0x1890   :  { %v7563_v9 = vmul.f32 1.442695, %v7557_v7  ;;  %v7565_v10 = vmul.f32 1.442695, %v7558_v8  ;;  %v10297_v7 = vpack.c.bf16 %v8830_v6, %v8829_v5  ;;  %v8832_v8 = vld [vmem:[%s12057_s12 + $0x38] sm:$0xff] }
0x1892   :  { %10381 = vpow2.f32 %v7563_v9 }
0x1893   :  { %10383 = vpow2.f32 %v7565_v10 }
0x1894   :  { %v10378_v11 = vpop.eup %10377 }
0x1895   :  { %v10380_v13 = vpop.eup %10379  ;;  %v7567_v14 = vsel %vm1088_vm4, %v10378_v11, 0.0 }
0x1896   :  { %7568 = vadd.xlane.f32.xlu0 %v7567_v14  ;;  %v7570_v15 = vsel %vm1088_vm4, %v10380_v13, 0.0 }
0x1897   :  { %7571 = vadd.xlane.f32.xlu1 %v7570_v15 }
0x189c   :  { %v10382_v16 = vpop.eup %10381 }
0x189d   :  { %v10384_v17 = vpop.eup %10383  ;;  %v7573_v18 = vsel %vm1088_vm4, %v10382_v16, 0.0 }
0x189e   :  { %7574 = vadd.xlane.f32.xlu0 %v7573_v18  ;;  %v7576_v19 = vsel %vm1088_vm4, %v10384_v17, 0.0 }
0x189f   :  { %7577 = vadd.xlane.f32.xlu1 %v7576_v19  ;;  %v8827_v19 = vld [vmem:[%s12061_s16 + $0x5] ss:$0 sm:$0xff] }
0x1923   :  { %v7569_v21 = vpop.xlane.xlu0 %7568 }
0x1924   :  { %10385 = vrcp.f32 %v7569_v21  ;;  %v7572_v38 = vpop.xlane.xlu1 %7571 }
0x1925   :  { %10387 = vrcp.f32 %v7572_v38 }
0x192b   :  { %v7575_v22 = vpop.xlane.xlu0 %7574 }
0x192c   :  { %10389 = vrcp.f32 %v7575_v22  ;;  %v7578_v23 = vpop.xlane.xlu1 %7577 }
0x192d   :  { %10391 = vrcp.f32 %v7578_v23 }
0x192e   :  { %v10386_v26 = vpop.eup %10385 }
0x192f   :  { %v10388_v29 = vpop.eup %10387  ;;  %v7583_v30 = vmul.f32 %v10386_v26, %v10378_v11  ;;  %v8837_v26 = vld [vmem:[%s12059_s14 + $0x18] sm:$0xff] }
0x1930   :  { %v7584_v31 = vmul.f32 %v10388_v29, %v10380_v13  ;;  %v10303_v27 = vpack.c.bf16 %v8837_v26, %v8836_v24  ;;  %v8834_v29 = vld [vmem:[%s12058_s13 + $0x1] ss:$0 sm:$0xff] }
0x1931   :  { %9944 = vmatmul.mubr.msk.f32.vlgmr.msra.gmra.mrb[90].mxu1 %vm1088_vm4, %v7583_v30 }
0x1932   :  { %9949 = vmatmul.mubr.msk.f32.vlgmr.msra.gmra.mrb[90].mxu0 %vm1088_vm4, %v7584_v31  ;;  %9952 = vmatpush3.msra.mxu1 %v7158_v28 }
0x1933   :  { %9957 = vmatpush3.msra.mxu0 %v7228_v32  ;;  %9953 = vmatprep.mubr.msk.f32.mxu1 %vm10429_vm1, %v10430_v20 }
0x1934   :  { %9958 = vmatprep.mubr.msk.f32.mxu0 %vm10429_vm1, %v10430_v20  ;;  %9961 = vmatprep.subr.mxu1 %v10430_v20 }
0x1935   :  { %9966 = vmatprep.subr.mxu0 %v10430_v20 }
0x1936   :  { %v10390_v51 = vpop.eup %10389 }
0x1937   :  { %v10392_v33 = vpop.eup %10391  ;;  %v7585_v34 = vmul.f32 %v10390_v51, %v10382_v16 }
0x1938   :  { %v7586_v35 = vmul.f32 %v10392_v33, %v10384_v17  ;;  %v8840_v33 = vld [vmem:[%s12060_s15 + $0x1] ss:$0 sm:$0xff] }
0x1939   :  { %9954 = vmatmul.mubr.msk.f32.vlgmr.msra.gmra.mrb[92].mxu1 %vm1088_vm4, %v7585_v34 }
0x193a   :  { %9959 = vmatmul.mubr.msk.f32.vlgmr.msra.gmra.mrb[92].mxu0 %vm1088_vm4, %v7586_v35  ;;  %9963 = vmatprep.mubr.msk.f32.mxu1 %vm10429_vm1, %v10430_v20 }
0x193b   :  { %9968 = vmatprep.mubr.msk.f32.mxu0 %vm10429_vm1, %v10430_v20  ;;  %9962 = vmatpush3.msra.mxu1 %v8767_v36 }
0x193c   :  { %9967 = vmatpush3.msra.mxu0 %v8768_v37  ;;  %9971 = vmatprep.subr.mxu1 %v10430_v20 }
0x193d   :  { %9976 = vmatprep.subr.mxu0 %v10430_v20 }
0x1a04   :  { %v7656_v40 = vpop.f32.mrb[90].mxu1 }
0x1a05   :  { %v7729_v43 = vpop.f32.mrb[90].mxu0  ;;  %v9945_v41 = vpop.f32.mrb[91].mxu1  ;;  %9964 = vmatmul.mubr.msk.f32.vlgmr.msra.gmra.mrb[94].mxu1 %vm1088_vm4, %v7656_v40 }
0x1a06   :  { %v9950_v44 = vpop.f32.mrb[91].mxu0  ;;  %9969 = vmatmul.mubr.msk.f32.vlgmr.msra.gmra.mrb[94].mxu0 %vm1088_vm4, %v7729_v43  ;;  %9972 = vmatpush3.msra.mxu1 %v8769_v39 }
0x1a07   :  { %9973 = vmatprep.mubr.msk.f32.mxu1 %vm10429_vm1, %v10430_v20  ;;  %9977 = vmatpush3.msra.mxu0 %v8770_v42 }
0x1a08   :  { %9978 = vmatprep.mubr.msk.f32.mxu0 %vm10429_vm1, %v10430_v20  ;;  %10296 = vmatprep.subr.bf16.mxu1 %v10428_v12 }
0x1a09   :  { %10302 = vmatprep.subr.bf16.mxu0 %v10428_v12 }
0x1a0c   :  { %v7802_v45 = vpop.f32.mrb[92].mxu1 }
0x1a0d   :  { %v7875_v0 = vpop.f32.mrb[92].mxu0  ;;  %v9955_v46 = vpop.f32.mrb[93].mxu1  ;;  %9974 = vmatmul.mubr.msk.f32.vlgmr.msra.gmra.mrb[96].mxu1 %vm1088_vm4, %v7802_v45 }
0x1a0e   :  { %v9960_v47 = vpop.f32.mrb[93].mxu0  ;;  %9979 = vmatmul.mubr.msk.f32.vlgmr.msra.gmra.mrb[96].mxu0 %vm1088_vm4, %v7875_v0  ;;  %9989 = vmatprep.mubr.msk.f32.mxu1 %vm10429_vm1, %v10430_v20 }
0x1a0f   :  { %9996 = vmatprep.mubr.msk.f32.mxu0 %vm10429_vm1, %v10430_v20  ;;  %10298 = vmatpush3.bf16.msra.mxu1 %v10297_v7 }
0x1a10   :  { %10299 = vmatprep.subr.bf16.mxu1 %v10428_v12  ;;  %v8828_v12 = vld [vmem:[%s12062_s17 + $0x5] ss:$0 sm:$0xff]  ;;  %10304 = vmatpush3.bf16.msra.mxu0 %v10303_v27 }
0x1ad8   :  { %v7948_v48 = vpop.f32.mrb[94].mxu1 }
0x1ad9   :  { %v8021_v49 = vpop.f32.mrb[94].mxu0  ;;  %v9965_v50 = vpop.f32.mrb[95].mxu1 }
0x1ada   :  { %v8171_v52 = vadd.f32 %v8021_v49, %v7948_v48  ;;  %v9970_v53 = vpop.f32.mrb[95].mxu0 }
0x1ae0   :  { %v8094_v54 = vpop.f32.mrb[96].mxu1 }
0x1ae1   :  { %v8172_v55 = vadd.f32 %v8171_v52, %v8094_v54  ;;  %v8167_v56 = vpop.f32.mrb[96].mxu0  ;;  %v9975_v57 = vpop.f32.mrb[97].mxu1  ;;  %v8841_v52 = vld [vmem:[%s12063_s18] ss:$0 sm:$0xff] }
0x1ae2   :  { %v9980_v59 = vpop.f32.mrb[97].mxu0 }
0x1ae3   :  { %v8173_v60 = vadd.f32 %v8172_v55, %v8167_v56  ;;  %v8842_v55 = vld [vmem:[%s12064_s19] ss:$0 sm:$0xff] }
0x1ae5   :  { %v8180_v61 = vadd.f32 %v8824_v58, %v8173_v60 }
0x1ae7   :  { %v8181_v62 = vadd.f32 %v8180_v61, %v11639_v25  ;;  %v8831_v25 = vld [vmem:[%s12057_s12 + $0x30] sm:$0xff] }
0x1ae8   :  { %v10300_v9 = vpack.c.bf16 %v8832_v8, %v8831_v25 }
0x1ae9   :  { %v8186_v20 = vsel %vm72_vm0, %v8181_v62, 0.0 }
0x1aea   :  { %8187 = vadd.xlane.f32.xlu0 %v8186_v20  ;;  %10301 = vmatpush3.bf16.msra.mxu1 %v10300_v9 }
0x1b77   :  { %v8188_v63 = vpop.xlane.xlu0 %8187 }
0x1b78   :  { %v8189_v1 = vmul.f32 0.03125, %v8188_v63 }
0x1b7a   :  { %v8190_v2 = vsub.f32 %v8181_v62, %v8189_v1 }
0x1b7c   :  { %v8191_v3 = vmul.f32 %v8190_v2, %v8190_v2  ;;  %v8211_v21 = vmul.f32 %v8827_v19, %v8190_v2 }
0x1b7e   :  { %v8192_v4 = vsel %vm72_vm0, %v8191_v3, 0.0 }
0x1b7f   :  { %8193 = vadd.xlane.f32.xlu1 %v8192_v4 }
0x1c0c   :  { %v8194_v10 = vpop.xlane.xlu1 %8193 }
0x1c0d   :  { %v8195_v11 = vmul.f32 0.032258064, %v8194_v10 }
0x1c0f   :  { %10393 = vrsqrt.f32 %v8195_v11  ;;  %vm8198_vm14 = vcmp.eq.f32.partialorder %v8195_v11, inf  ;;  %v8201_v15 = vand.u32 2147483648, %v8195_v11  ;;  %vm8200_vm15 = vcmp.eq.f32.partialorder %v8195_v11, 0.0 }
0x1c19   :  { %v10394_v13 = vpop.eup %10393 }
0x1c1a   :  { %v8197_v14 = vmul.f32 %v10394_v13, %v8195_v11 }
0x1c1c   :  { %v8199_v16 = vsel %vm8198_vm14, %v8195_v11, %v8197_v14 }
0x1c1d   :  { %v8202_v17 = vsel %vm8200_vm15, %v8201_v15, %v8199_v16 }
0x1c1e   :  { %v8203_v18 = vadd.f32 1e-06, %v8202_v17 }
0x1c20   :  { %10395 = vrcp.f32 %v8203_v18 }
0x1c2a   :  { %v10396_v38 = vpop.eup %10395 }
0x1c2b   :  { %v8212_v22 = vmul.f32 %v10396_v38, %v8211_v21 }
0x1c2d   :  { %v8219_v23 = vadd.f32 %v8828_v12, %v8212_v22 }
0x1c2f   :  { %9990 = vmatmul.mubr.msk.f32.vlgmr.msra.gmra.mrb[98].mxu1 %vm72_vm0, %v8219_v23 }
0x1d02   :  { %v8302_v30 = vpop.f32.mrb[98].mxu1 }
0x1d03   :  { %v8303_v28 = vadd.f32 %v8834_v29, %v8302_v30  ;;  %v9991_v31 = vpop.f32.mrb[99].mxu1 }
0x1d05   :  { %v8306_v32 = vmax.f32 %v8303_v28, 0.0 }
0x1d07   :  { %9997 = vmatmul.mubr.msk.f32.vlgmr.msra.gmra.mrb[98].mxu0 %vm4145_vm9, %v8306_v32 }
0x1dda   :  { %v8379_v51 = vpop.f32.mrb[98].mxu0 }
0x1ddb   :  { %v8383_v34 = vadd.f32 %v8379_v51, %v8181_v62  ;;  %v9998_v35 = vpop.f32.mrb[99].mxu0 }
0x1ddd   :  { %v8392_v36 = vadd.f32 %v8840_v33, %v8383_v34 }
0x1ddf   :  { %v8395_v37 = vsel %vm72_vm0, %v8392_v36, 0.0 }
0x1de0   :  { %8396 = vadd.xlane.f32.xlu0 %v8395_v37 }
0x1e6d   :  { %v8397_v39 = vpop.xlane.xlu0 %8396 }
0x1e6e   :  { %v8398_v40 = vmul.f32 0.03125, %v8397_v39 }
0x1e70   :  { %v8399_v42 = vsub.f32 %v8392_v36, %v8398_v40 }
0x1e72   :  { %v8400_v43 = vmul.f32 %v8399_v42, %v8399_v42  ;;  %v8420_v53 = vmul.f32 %v8841_v52, %v8399_v42 }
0x1e74   :  { %v8401_v41 = vsel %vm72_vm0, %v8400_v43, 0.0 }
0x1e75   :  { %8402 = vadd.xlane.f32.xlu1 %v8401_v41 }
0x1f02   :  { %v8403_v44 = vpop.xlane.xlu1 %8402 }
0x1f03   :  { %v8404_v45 = vmul.f32 0.032258064, %v8403_v44 }
0x1f05   :  { %10397 = vrsqrt.f32 %v8404_v45  ;;  %vm8407_vm1 = vcmp.eq.f32.partialorder %v8404_v45, inf  ;;  %v8410_v47 = vand.u32 2147483648, %v8404_v45  ;;  %vm8409_vm2 = vcmp.eq.f32.partialorder %v8404_v45, 0.0 }
0x1f0f   :  { %v10398_v0 = vpop.eup %10397 }
0x1f10   :  { %v8406_v46 = vmul.f32 %v10398_v0, %v8404_v45 }
0x1f12   :  { %v8408_v48 = vsel %vm8407_vm1, %v8404_v45, %v8406_v46 }
0x1f13   :  { %v8411_v49 = vsel %vm8409_vm2, %v8410_v47, %v8408_v48 }
0x1f14   :  { %v8412_v50 = vadd.f32 1e-06, %v8411_v49 }
0x1f16   :  { %10399 = vrcp.f32 %v8412_v50 }
0x1f20   :  { %v10400_v54 = vpop.eup %10399 }
0x1f21   :  { %v8421_v56 = vmul.f32 %v10400_v54, %v8420_v53 }
0x1f23   :  { %v8428_v57 = vadd.f32 %v8842_v55, %v8421_v56 }
0x1f25   :  { %8429 = vst.msk [vmem:[#allocation2] sm:$0xff] %vm72_vm0, %v8428_v57 }
0x1f26   :  { %10415 = shalt.err (!%p10412_p4)
}
0x1f27   :  { %s10416_s23 = scalar_lea.hbm %s12065_s20, 128 }
0x1f28   :  { %p10417_p5 = scmp.ne.s32.totalorder %s12065_s20, %s10416_s23  ;;  %p10420_p6 = scmp.lt.u32.totalorder %s10416_s23, %s12065_s20 }
0x1f2a   :  { %p10422_p7 = pnand %p10420_p6, %p10417_p5 }
0x1f2c   :  { %10425 = shalt.err (!%p10422_p7)
}
0x1f2d   :  { %8439 = dma.vmem_to_hbm [thread:$0]  %s8437_s0, 128, %s12065_s20, [#allocation3]  }
0x1f2e   :  { %10426 = dma.done.wait [#allocation3], 128  }
0x1f2f   :  { %10427 = vsyncadd [#allocation3], 4294967168 }
0x1f30   :  { %8443 = vsyncpa [#allocation3], 1 }

</bundles_post_ra>
